<compile_context>
chip_gen: v6e
topology: v6e:2x2x1
jax: 0.10.0
libtpu: 0.0.40
codegen_flags: <defaults>
</compile_context>

<pallas_src>
import jax
import jax.numpy as jnp
from jax import lax
from jax.experimental import pallas as pl
from jax.experimental.pallas import tpu as pltpu


# ----------------------------- Pallas kernel -------------------------------

def _make_bilstm_kernel(n_layers, T, B, H):
    """Fused stacked bidirectional LSTM kernel (single invocation, no grid)."""
    H2, H4, H6, H8 = 2 * H, 4 * H, 6 * H, 8 * H

    def kernel(*refs):
        x_ref = refs[0]                               # (T*B, D)   f32
        w_refs = refs[1:1 + 3 * n_layers]             # per layer: wih (Din,8H), whh (2H,8H), b (1,8H)
        out_ref = refs[1 + 3 * n_layers]              # (B, 2H)    f32
        gx_ref = refs[2 + 3 * n_layers]               # (T*B, 8H)  f32 scratch (gate pre-acts)
        act_ref = refs[3 + 3 * n_layers]              # (T*B, 2H)  f32 scratch ([h_f | h_r] per t)

        # Lane mask selecting the fwd-direction gate columns of the packed
        # [i_f,i_r, f_f,f_r, o_f,o_r, g_f,g_r] layout (even H-blocks are fwd).
        col = lax.broadcasted_iota(jnp.int32, (B, H8), 1)
        period = 2 * H
        if (period & (period - 1)) == 0:              # power-of-two fast path
            in_period = jnp.bitwise_and(col, period - 1)
        else:
            in_period = col % period
        fwd_mask = in_period < H

        last = n_layers - 1
        for layer in range(n_layers):
            wih, whh, b = w_refs[3 * layer:3 * layer + 3]

            # Hoisted input projection: ONE matmul per layer covers both directions
            # and all timesteps.  (For layer>0 the load of act_ref happens before the
            # recurrence below overwrites it -- same-ref load/store order preserved.)
            x_in = x_ref[...] if layer == 0 else act_ref[...]
            gx_ref[...] = jnp.dot(x_in, wih[...],
                                  preferred_element_type=jnp.float32) + b[...]

            whh_v = whh[...]                          # (2H, 8H), loop-invariant
            h = jnp.zeros((B, H2), jnp.float32)       # [h_f | h_r]
            c = jnp.zeros((B, H2), jnp.float32)       # [c_f | c_r]

            for t in range(T):                        # static unroll: serial recurrence
                tr = T - 1 - t                        # reverse-direction original time
                # fwd gate pre-acts come from time t, rev from time T-1-t.  The select
                # is independent of h, so it overlaps with the previous step's MXU/EUP.
                gx_t = jnp.where(fwd_mask,
                                 gx_ref[t * B:(t + 1) * B, :],
                                 gx_ref[tr * B:(tr + 1) * B, :])
                gates = gx_t + jnp.dot(h, whh_v, preferred_element_type=jnp.float32)
                sig = jax.nn.sigmoid(gates[:, 0:H6])  # [i_f,i_r, f_f,f_r, o_f,o_r]
                g = jnp.tanh(gates[:, H6:H8])         # [g_f, g_r]
                i_g = sig[:, 0:H2]
                f_g = sig[:, H2:H4]
                o_g = sig[:, H4:H6]
                c = f_g * c + i_g * g
                h = o_g * jnp.tanh(c)
                if layer != last:
                    # Layer->layer activations, lane-dense [h_f | h_r] per timestep.
                    act_ref[t * B:(t + 1) * B, 0:H] = h[:, 0:H]
                    act_ref[tr * B:(tr + 1) * B, H:H2] = h[:, H:H2]
                else:
                    # y = out[:, -1]: rev h at original t=T-1 appears at the first
                    # iteration, fwd h at t=T-1 at the last; skip all other stores.
                    if t == 0:
                        out_ref[:, H:H2] = h[:, H:H2]
                    if t == T - 1:
                        out_ref[:, 0:H] = h[:, 0:H]
            # TODO(synk): nn.LSTM inter-layer dropout (p=0.2) is train-mode only;
            # eval-mode forward semantics are implemented here.

    return kernel


def rnn_forward(x_btd, packed_params, hidden_size):
    """Pallas equivalent of RNN.forward: stacked bi-LSTM, return out[:, -1, :]."""
    B, T, D = x_btd.shape
    H = hidden_size
    n_layers = len(packed_params) // 3

    # time-major flattening: row index = t*B + b
    x2d = jnp.transpose(x_btd, (1, 0, 2)).reshape(T * B, D)

    n_inputs = 1 + 3 * n_layers
    return pl.pallas_call(
        _make_bilstm_kernel(n_layers, T, B, H),
        out_shape=jax.ShapeDtypeStruct((B, 2 * H), jnp.float32),
        in_specs=[pl.BlockSpec(memory_space=pltpu.MemorySpace.VMEM)] * n_inputs,
        out_specs=pl.BlockSpec(memory_space=pltpu.MemorySpace.VMEM),
        scratch_shapes=[
            pltpu.VMEM((T * B, 8 * H), jnp.float32),  # gate pre-activations (per layer)
            pltpu.VMEM((T * B, 2 * H), jnp.float32),  # layer->layer activations [fwd|rev]
        ],
    )(x2d, *packed_params)


# --------------------------- parameter init / packing -----------------------

def init_rnn_params(key, embed_dim, hidden_size, n_layers):
    """PyTorch nn.LSTM-style uniform(-k, k) init, k = 1/sqrt(hidden); f32 throughout.
    Returns raw PyTorch-layout params: per layer, per direction (w_ih, w_hh, b_ih, b_hh)
    with gate order [i, f, g, o]."""
    H = hidden_size
    k = 1.0 / (H ** 0.5)
    params = []
    for layer in range(n_layers):
        in_size = embed_dim if layer == 0 else 2 * H
        dirs = []
        for _direction in range(2):                   # forward, reverse
            key, k1, k2, k3, k4 = jax.random.split(key, 5)
            dirs.append((
                jax.random.uniform(k1, (4 * H, in_size), jnp.float32, -k, k),  # w_ih
                jax.random.uniform(k2, (4 * H, H), jnp.float32, -k, k),        # w_hh
                jax.random.uniform(k3, (4 * H,), jnp.float32, -k, k),          # b_ih
                jax.random.uniform(k4, (4 * H,), jnp.float32, -k, k),          # b_hh
            ))
        params.append(tuple(dirs))
    return params


def pack_params(params, hidden_size):
    """Pack PyTorch-layout LSTM weights into the kernel's fused layout (init-time only).

    Per layer the kernel takes:
      wih_fused : (Din, 8H)  columns [i_f,i_r, f_f,f_r, o_f,o_r, g_f,g_r]
      whh_fused : (2H, 8H)   block-diagonal hidden->gate weights for LHS [h_f | h_r]
      b_fused   : (1, 8H)    b_ih + b_hh, same column order
    """
    H = hidden_size
    z = jnp.zeros((H, H), jnp.float32)

    def split4(w_t):  # (rows, 4H) in torch gate order [i, f, g, o]
        return (w_t[:, 0:H], w_t[:, H:2 * H], w_t[:, 2 * H:3 * H], w_t[:, 3 * H:4 * H])

    packed = []
    for (wih_f, whh_f, bih_f, bhh_f), (wih_r, whh_r, bih_r, bhh_r) in params:
        i_f, f_f, g_f, o_f = split4(wih_f.T)
        i_r, f_r, g_r, o_r = split4(wih_r.T)
        wih_fused = jnp.concatenate([i_f, i_r, f_f, f_r, o_f, o_r, g_f, g_r], axis=1)

        hi_f, hf_f, hg_f, ho_f = split4(whh_f.T)
        hi_r, hf_r, hg_r, ho_r = split4(whh_r.T)
        whh_fused = jnp.concatenate([
            jnp.concatenate([hi_f, z, hf_f, z, ho_f, z, hg_f, z], axis=1),  # rows for h_f
            jnp.concatenate([z, hi_r, z, hf_r, z, ho_r, z, hg_r], axis=1),  # rows for h_r
        ], axis=0)

        bi_f, bf_f, bg_f, bo_f = split4((bih_f + bhh_f)[None, :])
        bi_r, bf_r, bg_r, bo_r = split4((bih_r + bhh_r)[None, :])
        b_fused = jnp.concatenate([bi_f, bi_r, bf_f, bf_r, bo_f, bo_r, bg_f, bg_r], axis=1)

        packed += [wih_fused, whh_fused, b_fused]
    return packed


# ------------------------------ pure-JAX ref --------------------------------

def _lstm_layer_ref(x_tbd, w_ih, w_hh, b_ih, b_hh):
    T, B, _ = x_tbd.shape
    H = w_hh.shape[1]
    wih_t, whh_t = w_ih.T, w_hh.T
    b = (b_ih + b_hh)[None, :]

    def step(carry, x_t):
        h, c = carry
        gates = (jnp.dot(x_t, wih_t, precision=lax.Precision.HIGHEST)
                 + jnp.dot(h, whh_t, precision=lax.Precision.HIGHEST) + b)
        i = jax.nn.sigmoid(gates[:, 0:H])
        f = jax.nn.sigmoid(gates[:, H:2 * H])
        g = jnp.tanh(gates[:, 2 * H:3 * H])
        o = jax.nn.sigmoid(gates[:, 3 * H:4 * H])
        c = f * c + i * g
        h = o * jnp.tanh(c)
        return (h, c), h

    init = (jnp.zeros((B, H), jnp.float32), jnp.zeros((B, H), jnp.float32))
    _, hs = lax.scan(step, init, x_tbd)
    return hs


def rnn_forward_ref(x_btd, params):
    inp = jnp.transpose(x_btd, (1, 0, 2))             # (T, B, D)
    for dir_f, dir_r in params:
        out_f = _lstm_layer_ref(inp, *dir_f)
        out_r = _lstm_layer_ref(inp[::-1], *dir_r)[::-1]
        inp = jnp.concatenate([out_f, out_r], axis=-1)
    return jnp.transpose(inp, (1, 0, 2))[:, -1]


# ---------------------------------- main ------------------------------------

if __name__ == "__main__":
    # Small shapes consistent with the module (embed_dim, hidden scaled down).
    B, T = 8, 8
    EMBED_DIM, HIDDEN, N_LAYERS = 64, 32, 3

    key = jax.random.PRNGKey(0)
    kx, kp = jax.random.split(key)
    x = jax.random.normal(kx, (B, T, EMBED_DIM), dtype=jnp.float32)
    params = init_rnn_params(kp, EMBED_DIM, HIDDEN, N_LAYERS)
    packed = pack_params(params, HIDDEN)

    y = jax.block_until_ready(rnn_forward(x, packed, HIDDEN))      # (B, 2*HIDDEN)
    y_ref = jax.block_until_ready(rnn_forward_ref(x, params))

    assert y.shape == (B, 2 * HIDDEN), y.shape
    max_err = float(jnp.max(jnp.abs(y - y_ref)))
    # Both sides are f32 end to end; tolerance covers accumulation-order /
    # transcendental-ulp differences between the fused kernel and the reference.
    assert jnp.allclose(y, y_ref, atol=2e-3, rtol=2e-3), max_err

    print("KERNEL_OK")
</pallas_src>

<mosaic_0001>
module attributes {stable_mosaic.version = 11 : i64} {
  func.func @kernel(%arg0: memref<64x64xf32, #tpu.memory_space<vmem>>, %arg1: memref<64x256xf32, #tpu.memory_space<vmem>>, %arg2: memref<64x256xf32, #tpu.memory_space<vmem>>, %arg3: memref<1x256xf32, #tpu.memory_space<vmem>>, %arg4: memref<64x256xf32, #tpu.memory_space<vmem>>, %arg5: memref<64x256xf32, #tpu.memory_space<vmem>>, %arg6: memref<1x256xf32, #tpu.memory_space<vmem>>, %arg7: memref<64x256xf32, #tpu.memory_space<vmem>>, %arg8: memref<64x256xf32, #tpu.memory_space<vmem>>, %arg9: memref<1x256xf32, #tpu.memory_space<vmem>>, %arg10: memref<8x64xf32, #tpu.memory_space<vmem>>, %arg11: memref<64x256xf32, #tpu.memory_space<vmem>>, %arg12: memref<64x64xf32, #tpu.memory_space<vmem>>) attributes {dimension_semantics = [], scalar_prefetch = 0 : i64, scratch_operands = 2 : i64, tpu.core_type = #tpu.core_type<tc>} {
    %0 = tpu.iota {dimensions = array<i32: 1>} : vector<8x256xi32>
    %c63_i32 = arith.constant 63 : i32
    %1 = vector.broadcast %c63_i32 : i32 to vector<8x256xi32>
    %2 = arith.andi %0, %1 : vector<8x256xi32>
    %c32_i32 = arith.constant 32 : i32
    %3 = vector.broadcast %c32_i32 : i32 to vector<8x256xi32>
    %4 = arith.cmpi slt, %2, %3 : vector<8x256xi32>
    %c0 = arith.constant 0 : index
    %c0_0 = arith.constant 0 : index
    %5 = vector.load %arg0[%c0, %c0_0] : memref<64x64xf32, #tpu.memory_space<vmem>>, vector<64x64xf32>
    %c0_1 = arith.constant 0 : index
    %c0_2 = arith.constant 0 : index
    %6 = vector.load %arg1[%c0_1, %c0_2] : memref<64x256xf32, #tpu.memory_space<vmem>>, vector<64x256xf32>
    %cst = arith.constant dense<0.000000e+00> : vector<64x256xf32>
    %7 = tpu.matmul %5, %6, %cst {dimension_numbers = #tpu.dot_dimension_numbers<[1], [0], [0], [1], [0, 0, 1, 1], [], []>} : vector<64x64xf32>, vector<64x256xf32>, vector<64x256xf32> -> vector<64x256xf32>
    %c0_3 = arith.constant 0 : index
    %c0_4 = arith.constant 0 : index
    %8 = vector.load %arg3[%c0_3, %c0_4] : memref<1x256xf32, #tpu.memory_space<vmem>>, vector<1x256xf32>
    %9 = vector.broadcast %8 : vector<1x256xf32> to vector<64x256xf32>
    %10 = arith.addf %7, %9 : vector<64x256xf32>
    %c0_5 = arith.constant 0 : index
    %c0_6 = arith.constant 0 : index
    %11 = vector.load %arg11[%c0_5, %c0_6] : memref<64x256xf32, #tpu.memory_space<vmem>>, vector<64x256xf32>
    tpu.vector_store %arg11[%c0_5, %c0_6], %10 {strides = array<i32>} : memref<64x256xf32, #tpu.memory_space<vmem>>, vector<64x256xf32>,
    %c0_7 = arith.constant 0 : index
    %c0_8 = arith.constant 0 : index
    %12 = vector.load %arg2[%c0_7, %c0_8] : memref<64x256xf32, #tpu.memory_space<vmem>>, vector<64x256xf32>
    %cst_9 = arith.constant 0.000000e+00 : f32
    %13 = vector.broadcast %cst_9 : f32 to vector<8x64xf32>
    %cst_10 = arith.constant 0.000000e+00 : f32
    %14 = vector.broadcast %cst_10 : f32 to vector<8x64xf32>
    %c0_11 = arith.constant 0 : index
    %c0_12 = arith.constant 0 : index
    %15 = vector.load %arg11[%c0_11, %c0_12] : memref<64x256xf32, #tpu.memory_space<vmem>>, vector<8x256xf32>
    %c56 = arith.constant 56 : index
    %c0_13 = arith.constant 0 : index
    %16 = vector.load %arg11[%c56, %c0_13] : memref<64x256xf32, #tpu.memory_space<vmem>>, vector<8x256xf32>
    %17 = arith.select %4, %15, %16 : vector<8x256xi1>, vector<8x256xf32>
    %cst_14 = arith.constant dense<0.000000e+00> : vector<8x256xf32>
    %18 = tpu.matmul %13, %12, %cst_14 {dimension_numbers = #tpu.dot_dimension_numbers<[1], [0], [0], [1], [0, 0, 1, 1], [], []>} : vector<8x64xf32>, vector<64x256xf32>, vector<8x256xf32> -> vector<8x256xf32>
    %19 = arith.addf %17, %18 : vector<8x256xf32>
    %20 = vector.extract_strided_slice %19 {offsets = [0, 0], sizes = [8, 192], strides = [1, 1]} : vector<8x256xf32> to vector<8x192xf32>
    %21 = arith.negf %20 : vector<8x192xf32>
    %22 = math.exp %21 : vector<8x192xf32>
    %cst_15 = arith.constant 1.000000e+00 : f32
    %23 = vector.broadcast %cst_15 : f32 to vector<8x192xf32>
    %24 = arith.addf %23, %22 : vector<8x192xf32>
    %25 = arith.divf %23, %24 : vector<8x192xf32>
    %26 = vector.extract_strided_slice %19 {offsets = [0, 192], sizes = [8, 64], strides = [1, 1]} : vector<8x256xf32> to vector<8x64xf32>
    %27 = math.tanh %26 : vector<8x64xf32>
    %28 = vector.extract_strided_slice %25 {offsets = [0, 0], sizes = [8, 64], strides = [1, 1]} : vector<8x192xf32> to vector<8x64xf32>
    %29 = vector.extract_strided_slice %25 {offsets = [0, 64], sizes = [8, 64], strides = [1, 1]} : vector<8x192xf32> to vector<8x64xf32>
    %30 = vector.extract_strided_slice %25 {offsets = [0, 128], sizes = [8, 64], strides = [1, 1]} : vector<8x192xf32> to vector<8x64xf32>
    %31 = arith.mulf %29, %14 : vector<8x64xf32>
    %32 = arith.mulf %28, %27 : vector<8x64xf32>
    %33 = arith.addf %31, %32 : vector<8x64xf32>
    %34 = math.tanh %33 : vector<8x64xf32>
    %35 = arith.mulf %30, %34 : vector<8x64xf32>
    %36 = vector.extract_strided_slice %35 {offsets = [0, 0], sizes = [8, 32], strides = [1, 1]} : vector<8x64xf32> to vector<8x32xf32>
    %c0_16 = arith.constant 0 : index
    %c0_17 = arith.constant 0 : index
    %37 = vector.load %arg12[%c0_16, %c0_17] : memref<64x64xf32, #tpu.memory_space<vmem>>, vector<8x32xf32>
    tpu.vector_store %arg12[%c0_16, %c0_17], %36 {strides = array<i32>} : memref<64x64xf32, #tpu.memory_space<vmem>>, vector<8x32xf32>,
    %38 = vector.extract_strided_slice %35 {offsets = [0, 32], sizes = [8, 32], strides = [1, 1]} : vector<8x64xf32> to vector<8x32xf32>
    %c56_18 = arith.constant 56 : index
    %c32 = arith.constant 32 : index
    %39 = vector.load %arg12[%c56_18, %c32] : memref<64x64xf32, #tpu.memory_space<vmem>>, vector<8x32xf32>
    tpu.vector_store %arg12[%c56_18, %c32], %38 {strides = array<i32>} : memref<64x64xf32, #tpu.memory_space<vmem>>, vector<8x32xf32>,
    %c8 = arith.constant 8 : index
    %c0_19 = arith.constant 0 : index
    %40 = vector.load %arg11[%c8, %c0_19] : memref<64x256xf32, #tpu.memory_space<vmem>>, vector<8x256xf32>
    %c48 = arith.constant 48 : index
    %c0_20 = arith.constant 0 : index
    %41 = vector.load %arg11[%c48, %c0_20] : memref<64x256xf32, #tpu.memory_space<vmem>>, vector<8x256xf32>
    %42 = arith.select %4, %40, %41 : vector<8x256xi1>, vector<8x256xf32>
    %cst_21 = arith.constant dense<0.000000e+00> : vector<8x256xf32>
    %43 = tpu.matmul %35, %12, %cst_21 {dimension_numbers = #tpu.dot_dimension_numbers<[1], [0], [0], [1], [0, 0, 1, 1], [], []>} : vector<8x64xf32>, vector<64x256xf32>, vector<8x256xf32> -> vector<8x256xf32>
    %44 = arith.addf %42, %43 : vector<8x256xf32>
    %45 = vector.extract_strided_slice %44 {offsets = [0, 0], sizes = [8, 192], strides = [1, 1]} : vector<8x256xf32> to vector<8x192xf32>
    %46 = arith.negf %45 : vector<8x192xf32>
    %47 = math.exp %46 : vector<8x192xf32>
    %cst_22 = arith.constant 1.000000e+00 : f32
    %48 = vector.broadcast %cst_22 : f32 to vector<8x192xf32>
    %49 = arith.addf %48, %47 : vector<8x192xf32>
    %50 = arith.divf %48, %49 : vector<8x192xf32>
    %51 = vector.extract_strided_slice %44 {offsets = [0, 192], sizes = [8, 64], strides = [1, 1]} : vector<8x256xf32> to vector<8x64xf32>
    %52 = math.tanh %51 : vector<8x64xf32>
    %53 = vector.extract_strided_slice %50 {offsets = [0, 0], sizes = [8, 64], strides = [1, 1]} : vector<8x192xf32> to vector<8x64xf32>
    %54 = vector.extract_strided_slice %50 {offsets = [0, 64], sizes = [8, 64], strides = [1, 1]} : vector<8x192xf32> to vector<8x64xf32>
    %55 = vector.extract_strided_slice %50 {offsets = [0, 128], sizes = [8, 64], strides = [1, 1]} : vector<8x192xf32> to vector<8x64xf32>
    %56 = arith.mulf %54, %33 : vector<8x64xf32>
    %57 = arith.mulf %53, %52 : vector<8x64xf32>
    %58 = arith.addf %56, %57 : vector<8x64xf32>
    %59 = math.tanh %58 : vector<8x64xf32>
    %60 = arith.mulf %55, %59 : vector<8x64xf32>
    %61 = vector.extract_strided_slice %60 {offsets = [0, 0], sizes = [8, 32], strides = [1, 1]} : vector<8x64xf32> to vector<8x32xf32>
    %c8_23 = arith.constant 8 : index
    %c0_24 = arith.constant 0 : index
    %62 = vector.load %arg12[%c8_23, %c0_24] : memref<64x64xf32, #tpu.memory_space<vmem>>, vector<8x32xf32>
    tpu.vector_store %arg12[%c8_23, %c0_24], %61 {strides = array<i32>} : memref<64x64xf32, #tpu.memory_space<vmem>>, vector<8x32xf32>,
    %63 = vector.extract_strided_slice %60 {offsets = [0, 32], sizes = [8, 32], strides = [1, 1]} : vector<8x64xf32> to vector<8x32xf32>
    %c48_25 = arith.constant 48 : index
    %c32_26 = arith.constant 32 : index
    %64 = vector.load %arg12[%c48_25, %c32_26] : memref<64x64xf32, #tpu.memory_space<vmem>>, vector<8x32xf32>
    tpu.vector_store %arg12[%c48_25, %c32_26], %63 {strides = array<i32>} : memref<64x64xf32, #tpu.memory_space<vmem>>, vector<8x32xf32>,
    %c16 = arith.constant 16 : index
    %c0_27 = arith.constant 0 : index
    %65 = vector.load %arg11[%c16, %c0_27] : memref<64x256xf32, #tpu.memory_space<vmem>>, vector<8x256xf32>
    %c40 = arith.constant 40 : index
    %c0_28 = arith.constant 0 : index
    %66 = vector.load %arg11[%c40, %c0_28] : memref<64x256xf32, #tpu.memory_space<vmem>>, vector<8x256xf32>
    %67 = arith.select %4, %65, %66 : vector<8x256xi1>, vector<8x256xf32>
    %cst_29 = arith.constant dense<0.000000e+00> : vector<8x256xf32>
    %68 = tpu.matmul %60, %12, %cst_29 {dimension_numbers = #tpu.dot_dimension_numbers<[1], [0], [0], [1], [0, 0, 1, 1], [], []>} : vector<8x64xf32>, vector<64x256xf32>, vector<8x256xf32> -> vector<8x256xf32>
    %69 = arith.addf %67, %68 : vector<8x256xf32>
    %70 = vector.extract_strided_slice %69 {offsets = [0, 0], sizes = [8, 192], strides = [1, 1]} : vector<8x256xf32> to vector<8x192xf32>
    %71 = arith.negf %70 : vector<8x192xf32>
    %72 = math.exp %71 : vector<8x192xf32>
    %cst_30 = arith.constant 1.000000e+00 : f32
    %73 = vector.broadcast %cst_30 : f32 to vector<8x192xf32>
    %74 = arith.addf %73, %72 : vector<8x192xf32>
    %75 = arith.divf %73, %74 : vector<8x192xf32>
    %76 = vector.extract_strided_slice %69 {offsets = [0, 192], sizes = [8, 64], strides = [1, 1]} : vector<8x256xf32> to vector<8x64xf32>
    %77 = math.tanh %76 : vector<8x64xf32>
    %78 = vector.extract_strided_slice %75 {offsets = [0, 0], sizes = [8, 64], strides = [1, 1]} : vector<8x192xf32> to vector<8x64xf32>
    %79 = vector.extract_strided_slice %75 {offsets = [0, 64], sizes = [8, 64], strides = [1, 1]} : vector<8x192xf32> to vector<8x64xf32>
    %80 = vector.extract_strided_slice %75 {offsets = [0, 128], sizes = [8, 64], strides = [1, 1]} : vector<8x192xf32> to vector<8x64xf32>
    %81 = arith.mulf %79, %58 : vector<8x64xf32>
    %82 = arith.mulf %78, %77 : vector<8x64xf32>
    %83 = arith.addf %81, %82 : vector<8x64xf32>
    %84 = math.tanh %83 : vector<8x64xf32>
    %85 = arith.mulf %80, %84 : vector<8x64xf32>
    %86 = vector.extract_strided_slice %85 {offsets = [0, 0], sizes = [8, 32], strides = [1, 1]} : vector<8x64xf32> to vector<8x32xf32>
    %c16_31 = arith.constant 16 : index
    %c0_32 = arith.constant 0 : index
    %87 = vector.load %arg12[%c16_31, %c0_32] : memref<64x64xf32, #tpu.memory_space<vmem>>, vector<8x32xf32>
    tpu.vector_store %arg12[%c16_31, %c0_32], %86 {strides = array<i32>} : memref<64x64xf32, #tpu.memory_space<vmem>>, vector<8x32xf32>,
    %88 = vector.extract_strided_slice %85 {offsets = [0, 32], sizes = [8, 32], strides = [1, 1]} : vector<8x64xf32> to vector<8x32xf32>
    %c40_33 = arith.constant 40 : index
    %c32_34 = arith.constant 32 : index
    %89 = vector.load %arg12[%c40_33, %c32_34] : memref<64x64xf32, #tpu.memory_space<vmem>>, vector<8x32xf32>
    tpu.vector_store %arg12[%c40_33, %c32_34], %88 {strides = array<i32>} : memref<64x64xf32, #tpu.memory_space<vmem>>, vector<8x32xf32>,
    %c24 = arith.constant 24 : index
    %c0_35 = arith.constant 0 : index
    %90 = vector.load %arg11[%c24, %c0_35] : memref<64x256xf32, #tpu.memory_space<vmem>>, vector<8x256xf32>
    %c32_36 = arith.constant 32 : index
    %c0_37 = arith.constant 0 : index
    %91 = vector.load %arg11[%c32_36, %c0_37] : memref<64x256xf32, #tpu.memory_space<vmem>>, vector<8x256xf32>
    %92 = arith.select %4, %90, %91 : vector<8x256xi1>, vector<8x256xf32>
    %cst_38 = arith.constant dense<0.000000e+00> : vector<8x256xf32>
    %93 = tpu.matmul %85, %12, %cst_38 {dimension_numbers = #tpu.dot_dimension_numbers<[1], [0], [0], [1], [0, 0, 1, 1], [], []>} : vector<8x64xf32>, vector<64x256xf32>, vector<8x256xf32> -> vector<8x256xf32>
    %94 = arith.addf %92, %93 : vector<8x256xf32>
    %95 = vector.extract_strided_slice %94 {offsets = [0, 0], sizes = [8, 192], strides = [1, 1]} : vector<8x256xf32> to vector<8x192xf32>
    %96 = arith.negf %95 : vector<8x192xf32>
    %97 = math.exp %96 : vector<8x192xf32>
    %cst_39 = arith.constant 1.000000e+00 : f32
    %98 = vector.broadcast %cst_39 : f32 to vector<8x192xf32>
    %99 = arith.addf %98, %97 : vector<8x192xf32>
    %100 = arith.divf %98, %99 : vector<8x192xf32>
    %101 = vector.extract_strided_slice %94 {offsets = [0, 192], sizes = [8, 64], strides = [1, 1]} : vector<8x256xf32> to vector<8x64xf32>
    %102 = math.tanh %101 : vector<8x64xf32>
    %103 = vector.extract_strided_slice %100 {offsets = [0, 0], sizes = [8, 64], strides = [1, 1]} : vector<8x192xf32> to vector<8x64xf32>
    %104 = vector.extract_strided_slice %100 {offsets = [0, 64], sizes = [8, 64], strides = [1, 1]} : vector<8x192xf32> to vector<8x64xf32>
    %105 = vector.extract_strided_slice %100 {offsets = [0, 128], sizes = [8, 64], strides = [1, 1]} : vector<8x192xf32> to vector<8x64xf32>
    %106 = arith.mulf %104, %83 : vector<8x64xf32>
    %107 = arith.mulf %103, %102 : vector<8x64xf32>
    %108 = arith.addf %106, %107 : vector<8x64xf32>
    %109 = math.tanh %108 : vector<8x64xf32>
    %110 = arith.mulf %105, %109 : vector<8x64xf32>
    %111 = vector.extract_strided_slice %110 {offsets = [0, 0], sizes = [8, 32], strides = [1, 1]} : vector<8x64xf32> to vector<8x32xf32>
    %c24_40 = arith.constant 24 : index
    %c0_41 = arith.constant 0 : index
    %112 = vector.load %arg12[%c24_40, %c0_41] : memref<64x64xf32, #tpu.memory_space<vmem>>, vector<8x32xf32>
    tpu.vector_store %arg12[%c24_40, %c0_41], %111 {strides = array<i32>} : memref<64x64xf32, #tpu.memory_space<vmem>>, vector<8x32xf32>,
    %113 = vector.extract_strided_slice %110 {offsets = [0, 32], sizes = [8, 32], strides = [1, 1]} : vector<8x64xf32> to vector<8x32xf32>
    %c32_42 = arith.constant 32 : index
    %c32_43 = arith.constant 32 : index
    %114 = vector.load %arg12[%c32_42, %c32_43] : memref<64x64xf32, #tpu.memory_space<vmem>>, vector<8x32xf32>
    tpu.vector_store %arg12[%c32_42, %c32_43], %113 {strides = array<i32>} : memref<64x64xf32, #tpu.memory_space<vmem>>, vector<8x32xf32>,
    %c32_44 = arith.constant 32 : index
    %c0_45 = arith.constant 0 : index
    %115 = vector.load %arg11[%c32_44, %c0_45] : memref<64x256xf32, #tpu.memory_space<vmem>>, vector<8x256xf32>
    %c24_46 = arith.constant 24 : index
    %c0_47 = arith.constant 0 : index
    %116 = vector.load %arg11[%c24_46, %c0_47] : memref<64x256xf32, #tpu.memory_space<vmem>>, vector<8x256xf32>
    %117 = arith.select %4, %115, %116 : vector<8x256xi1>, vector<8x256xf32>
    %cst_48 = arith.constant dense<0.000000e+00> : vector<8x256xf32>
    %118 = tpu.matmul %110, %12, %cst_48 {dimension_numbers = #tpu.dot_dimension_numbers<[1], [0], [0], [1], [0, 0, 1, 1], [], []>} : vector<8x64xf32>, vector<64x256xf32>, vector<8x256xf32> -> vector<8x256xf32>
    %119 = arith.addf %117, %118 : vector<8x256xf32>
    %120 = vector.extract_strided_slice %119 {offsets = [0, 0], sizes = [8, 192], strides = [1, 1]} : vector<8x256xf32> to vector<8x192xf32>
    %121 = arith.negf %120 : vector<8x192xf32>
    %122 = math.exp %121 : vector<8x192xf32>
    %cst_49 = arith.constant 1.000000e+00 : f32
    %123 = vector.broadcast %cst_49 : f32 to vector<8x192xf32>
    %124 = arith.addf %123, %122 : vector<8x192xf32>
    %125 = arith.divf %123, %124 : vector<8x192xf32>
    %126 = vector.extract_strided_slice %119 {offsets = [0, 192], sizes = [8, 64], strides = [1, 1]} : vector<8x256xf32> to vector<8x64xf32>
    %127 = math.tanh %126 : vector<8x64xf32>
    %128 = vector.extract_strided_slice %125 {offsets = [0, 0], sizes = [8, 64], strides = [1, 1]} : vector<8x192xf32> to vector<8x64xf32>
    %129 = vector.extract_strided_slice %125 {offsets = [0, 64], sizes = [8, 64], strides = [1, 1]} : vector<8x192xf32> to vector<8x64xf32>
    %130 = vector.extract_strided_slice %125 {offsets = [0, 128], sizes = [8, 64], strides = [1, 1]} : vector<8x192xf32> to vector<8x64xf32>
    %131 = arith.mulf %129, %108 : vector<8x64xf32>
    %132 = arith.mulf %128, %127 : vector<8x64xf32>
    %133 = arith.addf %131, %132 : vector<8x64xf32>
    %134 = math.tanh %133 : vector<8x64xf32>
    %135 = arith.mulf %130, %134 : vector<8x64xf32>
    %136 = vector.extract_strided_slice %135 {offsets = [0, 0], sizes = [8, 32], strides = [1, 1]} : vector<8x64xf32> to vector<8x32xf32>
    %c32_50 = arith.constant 32 : index
    %c0_51 = arith.constant 0 : index
    %137 = vector.load %arg12[%c32_50, %c0_51] : memref<64x64xf32, #tpu.memory_space<vmem>>, vector<8x32xf32>
    tpu.vector_store %arg12[%c32_50, %c0_51], %136 {strides = array<i32>} : memref<64x64xf32, #tpu.memory_space<vmem>>, vector<8x32xf32>,
    %138 = vector.extract_strided_slice %135 {offsets = [0, 32], sizes = [8, 32], strides = [1, 1]} : vector<8x64xf32> to vector<8x32xf32>
    %c24_52 = arith.constant 24 : index
    %c32_53 = arith.constant 32 : index
    %139 = vector.load %arg12[%c24_52, %c32_53] : memref<64x64xf32, #tpu.memory_space<vmem>>, vector<8x32xf32>
    tpu.vector_store %arg12[%c24_52, %c32_53], %138 {strides = array<i32>} : memref<64x64xf32, #tpu.memory_space<vmem>>, vector<8x32xf32>,
    %c40_54 = arith.constant 40 : index
    %c0_55 = arith.constant 0 : index
    %140 = vector.load %arg11[%c40_54, %c0_55] : memref<64x256xf32, #tpu.memory_space<vmem>>, vector<8x256xf32>
    %c16_56 = arith.constant 16 : index
    %c0_57 = arith.constant 0 : index
    %141 = vector.load %arg11[%c16_56, %c0_57] : memref<64x256xf32, #tpu.memory_space<vmem>>, vector<8x256xf32>
    %142 = arith.select %4, %140, %141 : vector<8x256xi1>, vector<8x256xf32>
    %cst_58 = arith.constant dense<0.000000e+00> : vector<8x256xf32>
    %143 = tpu.matmul %135, %12, %cst_58 {dimension_numbers = #tpu.dot_dimension_numbers<[1], [0], [0], [1], [0, 0, 1, 1], [], []>} : vector<8x64xf32>, vector<64x256xf32>, vector<8x256xf32> -> vector<8x256xf32>
    %144 = arith.addf %142, %143 : vector<8x256xf32>
    %145 = vector.extract_strided_slice %144 {offsets = [0, 0], sizes = [8, 192], strides = [1, 1]} : vector<8x256xf32> to vector<8x192xf32>
    %146 = arith.negf %145 : vector<8x192xf32>
    %147 = math.exp %146 : vector<8x192xf32>
    %cst_59 = arith.constant 1.000000e+00 : f32
    %148 = vector.broadcast %cst_59 : f32 to vector<8x192xf32>
    %149 = arith.addf %148, %147 : vector<8x192xf32>
    %150 = arith.divf %148, %149 : vector<8x192xf32>
    %151 = vector.extract_strided_slice %144 {offsets = [0, 192], sizes = [8, 64], strides = [1, 1]} : vector<8x256xf32> to vector<8x64xf32>
    %152 = math.tanh %151 : vector<8x64xf32>
    %153 = vector.extract_strided_slice %150 {offsets = [0, 0], sizes = [8, 64], strides = [1, 1]} : vector<8x192xf32> to vector<8x64xf32>
    %154 = vector.extract_strided_slice %150 {offsets = [0, 64], sizes = [8, 64], strides = [1, 1]} : vector<8x192xf32> to vector<8x64xf32>
    %155 = vector.extract_strided_slice %150 {offsets = [0, 128], sizes = [8, 64], strides = [1, 1]} : vector<8x192xf32> to vector<8x64xf32>
    %156 = arith.mulf %154, %133 : vector<8x64xf32>
    %157 = arith.mulf %153, %152 : vector<8x64xf32>
    %158 = arith.addf %156, %157 : vector<8x64xf32>
    %159 = math.tanh %158 : vector<8x64xf32>
    %160 = arith.mulf %155, %159 : vector<8x64xf32>
    %161 = vector.extract_strided_slice %160 {offsets = [0, 0], sizes = [8, 32], strides = [1, 1]} : vector<8x64xf32> to vector<8x32xf32>
    %c40_60 = arith.constant 40 : index
    %c0_61 = arith.constant 0 : index
    %162 = vector.load %arg12[%c40_60, %c0_61] : memref<64x64xf32, #tpu.memory_space<vmem>>, vector<8x32xf32>
    tpu.vector_store %arg12[%c40_60, %c0_61], %161 {strides = array<i32>} : memref<64x64xf32, #tpu.memory_space<vmem>>, vector<8x32xf32>,
    %163 = vector.extract_strided_slice %160 {offsets = [0, 32], sizes = [8, 32], strides = [1, 1]} : vector<8x64xf32> to vector<8x32xf32>
    %c16_62 = arith.constant 16 : index
    %c32_63 = arith.constant 32 : index
    %164 = vector.load %arg12[%c16_62, %c32_63] : memref<64x64xf32, #tpu.memory_space<vmem>>, vector<8x32xf32>
    tpu.vector_store %arg12[%c16_62, %c32_63], %163 {strides = array<i32>} : memref<64x64xf32, #tpu.memory_space<vmem>>, vector<8x32xf32>,
    %c48_64 = arith.constant 48 : index
    %c0_65 = arith.constant 0 : index
    %165 = vector.load %arg11[%c48_64, %c0_65] : memref<64x256xf32, #tpu.memory_space<vmem>>, vector<8x256xf32>
    %c8_66 = arith.constant 8 : index
    %c0_67 = arith.constant 0 : index
    %166 = vector.load %arg11[%c8_66, %c0_67] : memref<64x256xf32, #tpu.memory_space<vmem>>, vector<8x256xf32>
    %167 = arith.select %4, %165, %166 : vector<8x256xi1>, vector<8x256xf32>
    %cst_68 = arith.constant dense<0.000000e+00> : vector<8x256xf32>
    %168 = tpu.matmul %160, %12, %cst_68 {dimension_numbers = #tpu.dot_dimension_numbers<[1], [0], [0], [1], [0, 0, 1, 1], [], []>} : vector<8x64xf32>, vector<64x256xf32>, vector<8x256xf32> -> vector<8x256xf32>
    %169 = arith.addf %167, %168 : vector<8x256xf32>
    %170 = vector.extract_strided_slice %169 {offsets = [0, 0], sizes = [8, 192], strides = [1, 1]} : vector<8x256xf32> to vector<8x192xf32>
    %171 = arith.negf %170 : vector<8x192xf32>
    %172 = math.exp %171 : vector<8x192xf32>
    %cst_69 = arith.constant 1.000000e+00 : f32
    %173 = vector.broadcast %cst_69 : f32 to vector<8x192xf32>
    %174 = arith.addf %173, %172 : vector<8x192xf32>
    %175 = arith.divf %173, %174 : vector<8x192xf32>
    %176 = vector.extract_strided_slice %169 {offsets = [0, 192], sizes = [8, 64], strides = [1, 1]} : vector<8x256xf32> to vector<8x64xf32>
    %177 = math.tanh %176 : vector<8x64xf32>
    %178 = vector.extract_strided_slice %175 {offsets = [0, 0], sizes = [8, 64], strides = [1, 1]} : vector<8x192xf32> to vector<8x64xf32>
    %179 = vector.extract_strided_slice %175 {offsets = [0, 64], sizes = [8, 64], strides = [1, 1]} : vector<8x192xf32> to vector<8x64xf32>
    %180 = vector.extract_strided_slice %175 {offsets = [0, 128], sizes = [8, 64], strides = [1, 1]} : vector<8x192xf32> to vector<8x64xf32>
    %181 = arith.mulf %179, %158 : vector<8x64xf32>
    %182 = arith.mulf %178, %177 : vector<8x64xf32>
    %183 = arith.addf %181, %182 : vector<8x64xf32>
    %184 = math.tanh %183 : vector<8x64xf32>
    %185 = arith.mulf %180, %184 : vector<8x64xf32>
    %186 = vector.extract_strided_slice %185 {offsets = [0, 0], sizes = [8, 32], strides = [1, 1]} : vector<8x64xf32> to vector<8x32xf32>
    %c48_70 = arith.constant 48 : index
    %c0_71 = arith.constant 0 : index
    %187 = vector.load %arg12[%c48_70, %c0_71] : memref<64x64xf32, #tpu.memory_space<vmem>>, vector<8x32xf32>
    tpu.vector_store %arg12[%c48_70, %c0_71], %186 {strides = array<i32>} : memref<64x64xf32, #tpu.memory_space<vmem>>, vector<8x32xf32>,
    %188 = vector.extract_strided_slice %185 {offsets = [0, 32], sizes = [8, 32], strides = [1, 1]} : vector<8x64xf32> to vector<8x32xf32>
    %c8_72 = arith.constant 8 : index
    %c32_73 = arith.constant 32 : index
    %189 = vector.load %arg12[%c8_72, %c32_73] : memref<64x64xf32, #tpu.memory_space<vmem>>, vector<8x32xf32>
    tpu.vector_store %arg12[%c8_72, %c32_73], %188 {strides = array<i32>} : memref<64x64xf32, #tpu.memory_space<vmem>>, vector<8x32xf32>,
    %c56_74 = arith.constant 56 : index
    %c0_75 = arith.constant 0 : index
    %190 = vector.load %arg11[%c56_74, %c0_75] : memref<64x256xf32, #tpu.memory_space<vmem>>, vector<8x256xf32>
    %c0_76 = arith.constant 0 : index
    %c0_77 = arith.constant 0 : index
    %191 = vector.load %arg11[%c0_76, %c0_77] : memref<64x256xf32, #tpu.memory_space<vmem>>, vector<8x256xf32>
    %192 = arith.select %4, %190, %191 : vector<8x256xi1>, vector<8x256xf32>
    %cst_78 = arith.constant dense<0.000000e+00> : vector<8x256xf32>
    %193 = tpu.matmul %185, %12, %cst_78 {dimension_numbers = #tpu.dot_dimension_numbers<[1], [0], [0], [1], [0, 0, 1, 1], [], []>} : vector<8x64xf32>, vector<64x256xf32>, vector<8x256xf32> -> vector<8x256xf32>
    %194 = arith.addf %192, %193 : vector<8x256xf32>
    %195 = vector.extract_strided_slice %194 {offsets = [0, 0], sizes = [8, 192], strides = [1, 1]} : vector<8x256xf32> to vector<8x192xf32>
    %196 = arith.negf %195 : vector<8x192xf32>
    %197 = math.exp %196 : vector<8x192xf32>
    %cst_79 = arith.constant 1.000000e+00 : f32
    %198 = vector.broadcast %cst_79 : f32 to vector<8x192xf32>
    %199 = arith.addf %198, %197 : vector<8x192xf32>
    %200 = arith.divf %198, %199 : vector<8x192xf32>
    %201 = vector.extract_strided_slice %194 {offsets = [0, 192], sizes = [8, 64], strides = [1, 1]} : vector<8x256xf32> to vector<8x64xf32>
    %202 = math.tanh %201 : vector<8x64xf32>
    %203 = vector.extract_strided_slice %200 {offsets = [0, 0], sizes = [8, 64], strides = [1, 1]} : vector<8x192xf32> to vector<8x64xf32>
    %204 = vector.extract_strided_slice %200 {offsets = [0, 64], sizes = [8, 64], strides = [1, 1]} : vector<8x192xf32> to vector<8x64xf32>
    %205 = vector.extract_strided_slice %200 {offsets = [0, 128], sizes = [8, 64], strides = [1, 1]} : vector<8x192xf32> to vector<8x64xf32>
    %206 = arith.mulf %204, %183 : vector<8x64xf32>
    %207 = arith.mulf %203, %202 : vector<8x64xf32>
    %208 = arith.addf %206, %207 : vector<8x64xf32>
    %209 = math.tanh %208 : vector<8x64xf32>
    %210 = arith.mulf %205, %209 : vector<8x64xf32>
    %211 = vector.extract_strided_slice %210 {offsets = [0, 0], sizes = [8, 32], strides = [1, 1]} : vector<8x64xf32> to vector<8x32xf32>
    %c56_80 = arith.constant 56 : index
    %c0_81 = arith.constant 0 : index
    %212 = vector.load %arg12[%c56_80, %c0_81] : memref<64x64xf32, #tpu.memory_space<vmem>>, vector<8x32xf32>
    tpu.vector_store %arg12[%c56_80, %c0_81], %211 {strides = array<i32>} : memref<64x64xf32, #tpu.memory_space<vmem>>, vector<8x32xf32>,
    %213 = vector.extract_strided_slice %210 {offsets = [0, 32], sizes = [8, 32], strides = [1, 1]} : vector<8x64xf32> to vector<8x32xf32>
    %c0_82 = arith.constant 0 : index
    %c32_83 = arith.constant 32 : index
    %214 = vector.load %arg12[%c0_82, %c32_83] : memref<64x64xf32, #tpu.memory_space<vmem>>, vector<8x32xf32>
    tpu.vector_store %arg12[%c0_82, %c32_83], %213 {strides = array<i32>} : memref<64x64xf32, #tpu.memory_space<vmem>>, vector<8x32xf32>,
    %c0_84 = arith.constant 0 : index
    %c0_85 = arith.constant 0 : index
    %215 = vector.load %arg12[%c0_84, %c0_85] : memref<64x64xf32, #tpu.memory_space<vmem>>, vector<64x64xf32>
    %c0_86 = arith.constant 0 : index
    %c0_87 = arith.constant 0 : index
    %216 = vector.load %arg4[%c0_86, %c0_87] : memref<64x256xf32, #tpu.memory_space<vmem>>, vector<64x256xf32>
    %cst_88 = arith.constant dense<0.000000e+00> : vector<64x256xf32>
    %217 = tpu.matmul %215, %216, %cst_88 {dimension_numbers = #tpu.dot_dimension_numbers<[1], [0], [0], [1], [0, 0, 1, 1], [], []>} : vector<64x64xf32>, vector<64x256xf32>, vector<64x256xf32> -> vector<64x256xf32>
    %c0_89 = arith.constant 0 : index
    %c0_90 = arith.constant 0 : index
    %218 = vector.load %arg6[%c0_89, %c0_90] : memref<1x256xf32, #tpu.memory_space<vmem>>, vector<1x256xf32>
    %219 = vector.broadcast %218 : vector<1x256xf32> to vector<64x256xf32>
    %220 = arith.addf %217, %219 : vector<64x256xf32>
    %c0_91 = arith.constant 0 : index
    %c0_92 = arith.constant 0 : index
    %221 = vector.load %arg11[%c0_91, %c0_92] : memref<64x256xf32, #tpu.memory_space<vmem>>, vector<64x256xf32>
    tpu.vector_store %arg11[%c0_91, %c0_92], %220 {strides = array<i32>} : memref<64x256xf32, #tpu.memory_space<vmem>>, vector<64x256xf32>,
    %c0_93 = arith.constant 0 : index
    %c0_94 = arith.constant 0 : index
    %222 = vector.load %arg5[%c0_93, %c0_94] : memref<64x256xf32, #tpu.memory_space<vmem>>, vector<64x256xf32>
    %cst_95 = arith.constant 0.000000e+00 : f32
    %223 = vector.broadcast %cst_95 : f32 to vector<8x64xf32>
    %cst_96 = arith.constant 0.000000e+00 : f32
    %224 = vector.broadcast %cst_96 : f32 to vector<8x64xf32>
    %c0_97 = arith.constant 0 : index
    %c0_98 = arith.constant 0 : index
    %225 = vector.load %arg11[%c0_97, %c0_98] : memref<64x256xf32, #tpu.memory_space<vmem>>, vector<8x256xf32>
    %c56_99 = arith.constant 56 : index
    %c0_100 = arith.constant 0 : index
    %226 = vector.load %arg11[%c56_99, %c0_100] : memref<64x256xf32, #tpu.memory_space<vmem>>, vector<8x256xf32>
    %227 = arith.select %4, %225, %226 : vector<8x256xi1>, vector<8x256xf32>
    %cst_101 = arith.constant dense<0.000000e+00> : vector<8x256xf32>
    %228 = tpu.matmul %223, %222, %cst_101 {dimension_numbers = #tpu.dot_dimension_numbers<[1], [0], [0], [1], [0, 0, 1, 1], [], []>} : vector<8x64xf32>, vector<64x256xf32>, vector<8x256xf32> -> vector<8x256xf32>
    %229 = arith.addf %227, %228 : vector<8x256xf32>
    %230 = vector.extract_strided_slice %229 {offsets = [0, 0], sizes = [8, 192], strides = [1, 1]} : vector<8x256xf32> to vector<8x192xf32>
    %231 = arith.negf %230 : vector<8x192xf32>
    %232 = math.exp %231 : vector<8x192xf32>
    %cst_102 = arith.constant 1.000000e+00 : f32
    %233 = vector.broadcast %cst_102 : f32 to vector<8x192xf32>
    %234 = arith.addf %233, %232 : vector<8x192xf32>
    %235 = arith.divf %233, %234 : vector<8x192xf32>
    %236 = vector.extract_strided_slice %229 {offsets = [0, 192], sizes = [8, 64], strides = [1, 1]} : vector<8x256xf32> to vector<8x64xf32>
    %237 = math.tanh %236 : vector<8x64xf32>
    %238 = vector.extract_strided_slice %235 {offsets = [0, 0], sizes = [8, 64], strides = [1, 1]} : vector<8x192xf32> to vector<8x64xf32>
    %239 = vector.extract_strided_slice %235 {offsets = [0, 64], sizes = [8, 64], strides = [1, 1]} : vector<8x192xf32> to vector<8x64xf32>
    %240 = vector.extract_strided_slice %235 {offsets = [0, 128], sizes = [8, 64], strides = [1, 1]} : vector<8x192xf32> to vector<8x64xf32>
    %241 = arith.mulf %239, %224 : vector<8x64xf32>
    %242 = arith.mulf %238, %237 : vector<8x64xf32>
    %243 = arith.addf %241, %242 : vector<8x64xf32>
    %244 = math.tanh %243 : vector<8x64xf32>
    %245 = arith.mulf %240, %244 : vector<8x64xf32>
    %246 = vector.extract_strided_slice %245 {offsets = [0, 0], sizes = [8, 32], strides = [1, 1]} : vector<8x64xf32> to vector<8x32xf32>
    %c0_103 = arith.constant 0 : index
    %c0_104 = arith.constant 0 : index
    %247 = vector.load %arg12[%c0_103, %c0_104] : memref<64x64xf32, #tpu.memory_space<vmem>>, vector<8x32xf32>
    tpu.vector_store %arg12[%c0_103, %c0_104], %246 {strides = array<i32>} : memref<64x64xf32, #tpu.memory_space<vmem>>, vector<8x32xf32>,
    %248 = vector.extract_strided_slice %245 {offsets = [0, 32], sizes = [8, 32], strides = [1, 1]} : vector<8x64xf32> to vector<8x32xf32>
    %c56_105 = arith.constant 56 : index
    %c32_106 = arith.constant 32 : index
    %249 = vector.load %arg12[%c56_105, %c32_106] : memref<64x64xf32, #tpu.memory_space<vmem>>, vector<8x32xf32>
    tpu.vector_store %arg12[%c56_105, %c32_106], %248 {strides = array<i32>} : memref<64x64xf32, #tpu.memory_space<vmem>>, vector<8x32xf32>,
    %c8_107 = arith.constant 8 : index
    %c0_108 = arith.constant 0 : index
    %250 = vector.load %arg11[%c8_107, %c0_108] : memref<64x256xf32, #tpu.memory_space<vmem>>, vector<8x256xf32>
    %c48_109 = arith.constant 48 : index
    %c0_110 = arith.constant 0 : index
    %251 = vector.load %arg11[%c48_109, %c0_110] : memref<64x256xf32, #tpu.memory_space<vmem>>, vector<8x256xf32>
    %252 = arith.select %4, %250, %251 : vector<8x256xi1>, vector<8x256xf32>
    %cst_111 = arith.constant dense<0.000000e+00> : vector<8x256xf32>
    %253 = tpu.matmul %245, %222, %cst_111 {dimension_numbers = #tpu.dot_dimension_numbers<[1], [0], [0], [1], [0, 0, 1, 1], [], []>} : vector<8x64xf32>, vector<64x256xf32>, vector<8x256xf32> -> vector<8x256xf32>
    %254 = arith.addf %252, %253 : vector<8x256xf32>
    %255 = vector.extract_strided_slice %254 {offsets = [0, 0], sizes = [8, 192], strides = [1, 1]} : vector<8x256xf32> to vector<8x192xf32>
    %256 = arith.negf %255 : vector<8x192xf32>
    %257 = math.exp %256 : vector<8x192xf32>
    %cst_112 = arith.constant 1.000000e+00 : f32
    %258 = vector.broadcast %cst_112 : f32 to vector<8x192xf32>
    %259 = arith.addf %258, %257 : vector<8x192xf32>
    %260 = arith.divf %258, %259 : vector<8x192xf32>
    %261 = vector.extract_strided_slice %254 {offsets = [0, 192], sizes = [8, 64], strides = [1, 1]} : vector<8x256xf32> to vector<8x64xf32>
    %262 = math.tanh %261 : vector<8x64xf32>
    %263 = vector.extract_strided_slice %260 {offsets = [0, 0], sizes = [8, 64], strides = [1, 1]} : vector<8x192xf32> to vector<8x64xf32>
    %264 = vector.extract_strided_slice %260 {offsets = [0, 64], sizes = [8, 64], strides = [1, 1]} : vector<8x192xf32> to vector<8x64xf32>
    %265 = vector.extract_strided_slice %260 {offsets = [0, 128], sizes = [8, 64], strides = [1, 1]} : vector<8x192xf32> to vector<8x64xf32>
    %266 = arith.mulf %264, %243 : vector<8x64xf32>
    %267 = arith.mulf %263, %262 : vector<8x64xf32>
    %268 = arith.addf %266, %267 : vector<8x64xf32>
    %269 = math.tanh %268 : vector<8x64xf32>
    %270 = arith.mulf %265, %269 : vector<8x64xf32>
    %271 = vector.extract_strided_slice %270 {offsets = [0, 0], sizes = [8, 32], strides = [1, 1]} : vector<8x64xf32> to vector<8x32xf32>
    %c8_113 = arith.constant 8 : index
    %c0_114 = arith.constant 0 : index
    %272 = vector.load %arg12[%c8_113, %c0_114] : memref<64x64xf32, #tpu.memory_space<vmem>>, vector<8x32xf32>
    tpu.vector_store %arg12[%c8_113, %c0_114], %271 {strides = array<i32>} : memref<64x64xf32, #tpu.memory_space<vmem>>, vector<8x32xf32>,
    %273 = vector.extract_strided_slice %270 {offsets = [0, 32], sizes = [8, 32], strides = [1, 1]} : vector<8x64xf32> to vector<8x32xf32>
    %c48_115 = arith.constant 48 : index
    %c32_116 = arith.constant 32 : index
    %274 = vector.load %arg12[%c48_115, %c32_116] : memref<64x64xf32, #tpu.memory_space<vmem>>, vector<8x32xf32>
    tpu.vector_store %arg12[%c48_115, %c32_116], %273 {strides = array<i32>} : memref<64x64xf32, #tpu.memory_space<vmem>>, vector<8x32xf32>,
    %c16_117 = arith.constant 16 : index
    %c0_118 = arith.constant 0 : index
    %275 = vector.load %arg11[%c16_117, %c0_118] : memref<64x256xf32, #tpu.memory_space<vmem>>, vector<8x256xf32>
    %c40_119 = arith.constant 40 : index
    %c0_120 = arith.constant 0 : index
    %276 = vector.load %arg11[%c40_119, %c0_120] : memref<64x256xf32, #tpu.memory_space<vmem>>, vector<8x256xf32>
    %277 = arith.select %4, %275, %276 : vector<8x256xi1>, vector<8x256xf32>
    %cst_121 = arith.constant dense<0.000000e+00> : vector<8x256xf32>
    %278 = tpu.matmul %270, %222, %cst_121 {dimension_numbers = #tpu.dot_dimension_numbers<[1], [0], [0], [1], [0, 0, 1, 1], [], []>} : vector<8x64xf32>, vector<64x256xf32>, vector<8x256xf32> -> vector<8x256xf32>
    %279 = arith.addf %277, %278 : vector<8x256xf32>
    %280 = vector.extract_strided_slice %279 {offsets = [0, 0], sizes = [8, 192], strides = [1, 1]} : vector<8x256xf32> to vector<8x192xf32>
    %281 = arith.negf %280 : vector<8x192xf32>
    %282 = math.exp %281 : vector<8x192xf32>
    %cst_122 = arith.constant 1.000000e+00 : f32
    %283 = vector.broadcast %cst_122 : f32 to vector<8x192xf32>
    %284 = arith.addf %283, %282 : vector<8x192xf32>
    %285 = arith.divf %283, %284 : vector<8x192xf32>
    %286 = vector.extract_strided_slice %279 {offsets = [0, 192], sizes = [8, 64], strides = [1, 1]} : vector<8x256xf32> to vector<8x64xf32>
    %287 = math.tanh %286 : vector<8x64xf32>
    %288 = vector.extract_strided_slice %285 {offsets = [0, 0], sizes = [8, 64], strides = [1, 1]} : vector<8x192xf32> to vector<8x64xf32>
    %289 = vector.extract_strided_slice %285 {offsets = [0, 64], sizes = [8, 64], strides = [1, 1]} : vector<8x192xf32> to vector<8x64xf32>
    %290 = vector.extract_strided_slice %285 {offsets = [0, 128], sizes = [8, 64], strides = [1, 1]} : vector<8x192xf32> to vector<8x64xf32>
    %291 = arith.mulf %289, %268 : vector<8x64xf32>
    %292 = arith.mulf %288, %287 : vector<8x64xf32>
    %293 = arith.addf %291, %292 : vector<8x64xf32>
    %294 = math.tanh %293 : vector<8x64xf32>
    %295 = arith.mulf %290, %294 : vector<8x64xf32>
    %296 = vector.extract_strided_slice %295 {offsets = [0, 0], sizes = [8, 32], strides = [1, 1]} : vector<8x64xf32> to vector<8x32xf32>
    %c16_123 = arith.constant 16 : index
    %c0_124 = arith.constant 0 : index
    %297 = vector.load %arg12[%c16_123, %c0_124] : memref<64x64xf32, #tpu.memory_space<vmem>>, vector<8x32xf32>
    tpu.vector_store %arg12[%c16_123, %c0_124], %296 {strides = array<i32>} : memref<64x64xf32, #tpu.memory_space<vmem>>, vector<8x32xf32>,
    %298 = vector.extract_strided_slice %295 {offsets = [0, 32], sizes = [8, 32], strides = [1, 1]} : vector<8x64xf32> to vector<8x32xf32>
    %c40_125 = arith.constant 40 : index
    %c32_126 = arith.constant 32 : index
    %299 = vector.load %arg12[%c40_125, %c32_126] : memref<64x64xf32, #tpu.memory_space<vmem>>, vector<8x32xf32>
    tpu.vector_store %arg12[%c40_125, %c32_126], %298 {strides = array<i32>} : memref<64x64xf32, #tpu.memory_space<vmem>>, vector<8x32xf32>,
    %c24_127 = arith.constant 24 : index
    %c0_128 = arith.constant 0 : index
    %300 = vector.load %arg11[%c24_127, %c0_128] : memref<64x256xf32, #tpu.memory_space<vmem>>, vector<8x256xf32>
    %c32_129 = arith.constant 32 : index
    %c0_130 = arith.constant 0 : index
    %301 = vector.load %arg11[%c32_129, %c0_130] : memref<64x256xf32, #tpu.memory_space<vmem>>, vector<8x256xf32>
    %302 = arith.select %4, %300, %301 : vector<8x256xi1>, vector<8x256xf32>
    %cst_131 = arith.constant dense<0.000000e+00> : vector<8x256xf32>
    %303 = tpu.matmul %295, %222, %cst_131 {dimension_numbers = #tpu.dot_dimension_numbers<[1], [0], [0], [1], [0, 0, 1, 1], [], []>} : vector<8x64xf32>, vector<64x256xf32>, vector<8x256xf32> -> vector<8x256xf32>
    %304 = arith.addf %302, %303 : vector<8x256xf32>
    %305 = vector.extract_strided_slice %304 {offsets = [0, 0], sizes = [8, 192], strides = [1, 1]} : vector<8x256xf32> to vector<8x192xf32>
    %306 = arith.negf %305 : vector<8x192xf32>
    %307 = math.exp %306 : vector<8x192xf32>
    %cst_132 = arith.constant 1.000000e+00 : f32
    %308 = vector.broadcast %cst_132 : f32 to vector<8x192xf32>
    %309 = arith.addf %308, %307 : vector<8x192xf32>
    %310 = arith.divf %308, %309 : vector<8x192xf32>
    %311 = vector.extract_strided_slice %304 {offsets = [0, 192], sizes = [8, 64], strides = [1, 1]} : vector<8x256xf32> to vector<8x64xf32>
    %312 = math.tanh %311 : vector<8x64xf32>
    %313 = vector.extract_strided_slice %310 {offsets = [0, 0], sizes = [8, 64], strides = [1, 1]} : vector<8x192xf32> to vector<8x64xf32>
    %314 = vector.extract_strided_slice %310 {offsets = [0, 64], sizes = [8, 64], strides = [1, 1]} : vector<8x192xf32> to vector<8x64xf32>
    %315 = vector.extract_strided_slice %310 {offsets = [0, 128], sizes = [8, 64], strides = [1, 1]} : vector<8x192xf32> to vector<8x64xf32>
    %316 = arith.mulf %314, %293 : vector<8x64xf32>
    %317 = arith.mulf %313, %312 : vector<8x64xf32>
    %318 = arith.addf %316, %317 : vector<8x64xf32>
    %319 = math.tanh %318 : vector<8x64xf32>
    %320 = arith.mulf %315, %319 : vector<8x64xf32>
    %321 = vector.extract_strided_slice %320 {offsets = [0, 0], sizes = [8, 32], strides = [1, 1]} : vector<8x64xf32> to vector<8x32xf32>
    %c24_133 = arith.constant 24 : index
    %c0_134 = arith.constant 0 : index
    %322 = vector.load %arg12[%c24_133, %c0_134] : memref<64x64xf32, #tpu.memory_space<vmem>>, vector<8x32xf32>
    tpu.vector_store %arg12[%c24_133, %c0_134], %321 {strides = array<i32>} : memref<64x64xf32, #tpu.memory_space<vmem>>, vector<8x32xf32>,
    %323 = vector.extract_strided_slice %320 {offsets = [0, 32], sizes = [8, 32], strides = [1, 1]} : vector<8x64xf32> to vector<8x32xf32>
    %c32_135 = arith.constant 32 : index
    %c32_136 = arith.constant 32 : index
    %324 = vector.load %arg12[%c32_135, %c32_136] : memref<64x64xf32, #tpu.memory_space<vmem>>, vector<8x32xf32>
    tpu.vector_store %arg12[%c32_135, %c32_136], %323 {strides = array<i32>} : memref<64x64xf32, #tpu.memory_space<vmem>>, vector<8x32xf32>,
    %c32_137 = arith.constant 32 : index
    %c0_138 = arith.constant 0 : index
    %325 = vector.load %arg11[%c32_137, %c0_138] : memref<64x256xf32, #tpu.memory_space<vmem>>, vector<8x256xf32>
    %c24_139 = arith.constant 24 : index
    %c0_140 = arith.constant 0 : index
    %326 = vector.load %arg11[%c24_139, %c0_140] : memref<64x256xf32, #tpu.memory_space<vmem>>, vector<8x256xf32>
    %327 = arith.select %4, %325, %326 : vector<8x256xi1>, vector<8x256xf32>
    %cst_141 = arith.constant dense<0.000000e+00> : vector<8x256xf32>
    %328 = tpu.matmul %320, %222, %cst_141 {dimension_numbers = #tpu.dot_dimension_numbers<[1], [0], [0], [1], [0, 0, 1, 1], [], []>} : vector<8x64xf32>, vector<64x256xf32>, vector<8x256xf32> -> vector<8x256xf32>
    %329 = arith.addf %327, %328 : vector<8x256xf32>
    %330 = vector.extract_strided_slice %329 {offsets = [0, 0], sizes = [8, 192], strides = [1, 1]} : vector<8x256xf32> to vector<8x192xf32>
    %331 = arith.negf %330 : vector<8x192xf32>
    %332 = math.exp %331 : vector<8x192xf32>
    %cst_142 = arith.constant 1.000000e+00 : f32
    %333 = vector.broadcast %cst_142 : f32 to vector<8x192xf32>
    %334 = arith.addf %333, %332 : vector<8x192xf32>
    %335 = arith.divf %333, %334 : vector<8x192xf32>
    %336 = vector.extract_strided_slice %329 {offsets = [0, 192], sizes = [8, 64], strides = [1, 1]} : vector<8x256xf32> to vector<8x64xf32>
    %337 = math.tanh %336 : vector<8x64xf32>
    %338 = vector.extract_strided_slice %335 {offsets = [0, 0], sizes = [8, 64], strides = [1, 1]} : vector<8x192xf32> to vector<8x64xf32>
    %339 = vector.extract_strided_slice %335 {offsets = [0, 64], sizes = [8, 64], strides = [1, 1]} : vector<8x192xf32> to vector<8x64xf32>
    %340 = vector.extract_strided_slice %335 {offsets = [0, 128], sizes = [8, 64], strides = [1, 1]} : vector<8x192xf32> to vector<8x64xf32>
    %341 = arith.mulf %339, %318 : vector<8x64xf32>
    %342 = arith.mulf %338, %337 : vector<8x64xf32>
    %343 = arith.addf %341, %342 : vector<8x64xf32>
    %344 = math.tanh %343 : vector<8x64xf32>
    %345 = arith.mulf %340, %344 : vector<8x64xf32>
    %346 = vector.extract_strided_slice %345 {offsets = [0, 0], sizes = [8, 32], strides = [1, 1]} : vector<8x64xf32> to vector<8x32xf32>
    %c32_143 = arith.constant 32 : index
    %c0_144 = arith.constant 0 : index
    %347 = vector.load %arg12[%c32_143, %c0_144] : memref<64x64xf32, #tpu.memory_space<vmem>>, vector<8x32xf32>
    tpu.vector_store %arg12[%c32_143, %c0_144], %346 {strides = array<i32>} : memref<64x64xf32, #tpu.memory_space<vmem>>, vector<8x32xf32>,
    %348 = vector.extract_strided_slice %345 {offsets = [0, 32], sizes = [8, 32], strides = [1, 1]} : vector<8x64xf32> to vector<8x32xf32>
    %c24_145 = arith.constant 24 : index
    %c32_146 = arith.constant 32 : index
    %349 = vector.load %arg12[%c24_145, %c32_146] : memref<64x64xf32, #tpu.memory_space<vmem>>, vector<8x32xf32>
    tpu.vector_store %arg12[%c24_145, %c32_146], %348 {strides = array<i32>} : memref<64x64xf32, #tpu.memory_space<vmem>>, vector<8x32xf32>,
    %c40_147 = arith.constant 40 : index
    %c0_148 = arith.constant 0 : index
    %350 = vector.load %arg11[%c40_147, %c0_148] : memref<64x256xf32, #tpu.memory_space<vmem>>, vector<8x256xf32>
    %c16_149 = arith.constant 16 : index
    %c0_150 = arith.constant 0 : index
    %351 = vector.load %arg11[%c16_149, %c0_150] : memref<64x256xf32, #tpu.memory_space<vmem>>, vector<8x256xf32>
    %352 = arith.select %4, %350, %351 : vector<8x256xi1>, vector<8x256xf32>
    %cst_151 = arith.constant dense<0.000000e+00> : vector<8x256xf32>
    %353 = tpu.matmul %345, %222, %cst_151 {dimension_numbers = #tpu.dot_dimension_numbers<[1], [0], [0], [1], [0, 0, 1, 1], [], []>} : vector<8x64xf32>, vector<64x256xf32>, vector<8x256xf32> -> vector<8x256xf32>
    %354 = arith.addf %352, %353 : vector<8x256xf32>
    %355 = vector.extract_strided_slice %354 {offsets = [0, 0], sizes = [8, 192], strides = [1, 1]} : vector<8x256xf32> to vector<8x192xf32>
    %356 = arith.negf %355 : vector<8x192xf32>
    %357 = math.exp %356 : vector<8x192xf32>
    %cst_152 = arith.constant 1.000000e+00 : f32
    %358 = vector.broadcast %cst_152 : f32 to vector<8x192xf32>
    %359 = arith.addf %358, %357 : vector<8x192xf32>
    %360 = arith.divf %358, %359 : vector<8x192xf32>
    %361 = vector.extract_strided_slice %354 {offsets = [0, 192], sizes = [8, 64], strides = [1, 1]} : vector<8x256xf32> to vector<8x64xf32>
    %362 = math.tanh %361 : vector<8x64xf32>
    %363 = vector.extract_strided_slice %360 {offsets = [0, 0], sizes = [8, 64], strides = [1, 1]} : vector<8x192xf32> to vector<8x64xf32>
    %364 = vector.extract_strided_slice %360 {offsets = [0, 64], sizes = [8, 64], strides = [1, 1]} : vector<8x192xf32> to vector<8x64xf32>
    %365 = vector.extract_strided_slice %360 {offsets = [0, 128], sizes = [8, 64], strides = [1, 1]} : vector<8x192xf32> to vector<8x64xf32>
    %366 = arith.mulf %364, %343 : vector<8x64xf32>
    %367 = arith.mulf %363, %362 : vector<8x64xf32>
    %368 = arith.addf %366, %367 : vector<8x64xf32>
    %369 = math.tanh %368 : vector<8x64xf32>
    %370 = arith.mulf %365, %369 : vector<8x64xf32>
    %371 = vector.extract_strided_slice %370 {offsets = [0, 0], sizes = [8, 32], strides = [1, 1]} : vector<8x64xf32> to vector<8x32xf32>
    %c40_153 = arith.constant 40 : index
    %c0_154 = arith.constant 0 : index
    %372 = vector.load %arg12[%c40_153, %c0_154] : memref<64x64xf32, #tpu.memory_space<vmem>>, vector<8x32xf32>
    tpu.vector_store %arg12[%c40_153, %c0_154], %371 {strides = array<i32>} : memref<64x64xf32, #tpu.memory_space<vmem>>, vector<8x32xf32>,
    %373 = vector.extract_strided_slice %370 {offsets = [0, 32], sizes = [8, 32], strides = [1, 1]} : vector<8x64xf32> to vector<8x32xf32>
    %c16_155 = arith.constant 16 : index
    %c32_156 = arith.constant 32 : index
    %374 = vector.load %arg12[%c16_155, %c32_156] : memref<64x64xf32, #tpu.memory_space<vmem>>, vector<8x32xf32>
    tpu.vector_store %arg12[%c16_155, %c32_156], %373 {strides = array<i32>} : memref<64x64xf32, #tpu.memory_space<vmem>>, vector<8x32xf32>,
    %c48_157 = arith.constant 48 : index
    %c0_158 = arith.constant 0 : index
    %375 = vector.load %arg11[%c48_157, %c0_158] : memref<64x256xf32, #tpu.memory_space<vmem>>, vector<8x256xf32>
    %c8_159 = arith.constant 8 : index
    %c0_160 = arith.constant 0 : index
    %376 = vector.load %arg11[%c8_159, %c0_160] : memref<64x256xf32, #tpu.memory_space<vmem>>, vector<8x256xf32>
    %377 = arith.select %4, %375, %376 : vector<8x256xi1>, vector<8x256xf32>
    %cst_161 = arith.constant dense<0.000000e+00> : vector<8x256xf32>
    %378 = tpu.matmul %370, %222, %cst_161 {dimension_numbers = #tpu.dot_dimension_numbers<[1], [0], [0], [1], [0, 0, 1, 1], [], []>} : vector<8x64xf32>, vector<64x256xf32>, vector<8x256xf32> -> vector<8x256xf32>
    %379 = arith.addf %377, %378 : vector<8x256xf32>
    %380 = vector.extract_strided_slice %379 {offsets = [0, 0], sizes = [8, 192], strides = [1, 1]} : vector<8x256xf32> to vector<8x192xf32>
    %381 = arith.negf %380 : vector<8x192xf32>
    %382 = math.exp %381 : vector<8x192xf32>
    %cst_162 = arith.constant 1.000000e+00 : f32
    %383 = vector.broadcast %cst_162 : f32 to vector<8x192xf32>
    %384 = arith.addf %383, %382 : vector<8x192xf32>
    %385 = arith.divf %383, %384 : vector<8x192xf32>
    %386 = vector.extract_strided_slice %379 {offsets = [0, 192], sizes = [8, 64], strides = [1, 1]} : vector<8x256xf32> to vector<8x64xf32>
    %387 = math.tanh %386 : vector<8x64xf32>
    %388 = vector.extract_strided_slice %385 {offsets = [0, 0], sizes = [8, 64], strides = [1, 1]} : vector<8x192xf32> to vector<8x64xf32>
    %389 = vector.extract_strided_slice %385 {offsets = [0, 64], sizes = [8, 64], strides = [1, 1]} : vector<8x192xf32> to vector<8x64xf32>
    %390 = vector.extract_strided_slice %385 {offsets = [0, 128], sizes = [8, 64], strides = [1, 1]} : vector<8x192xf32> to vector<8x64xf32>
    %391 = arith.mulf %389, %368 : vector<8x64xf32>
    %392 = arith.mulf %388, %387 : vector<8x64xf32>
    %393 = arith.addf %391, %392 : vector<8x64xf32>
    %394 = math.tanh %393 : vector<8x64xf32>
    %395 = arith.mulf %390, %394 : vector<8x64xf32>
    %396 = vector.extract_strided_slice %395 {offsets = [0, 0], sizes = [8, 32], strides = [1, 1]} : vector<8x64xf32> to vector<8x32xf32>
    %c48_163 = arith.constant 48 : index
    %c0_164 = arith.constant 0 : index
    %397 = vector.load %arg12[%c48_163, %c0_164] : memref<64x64xf32, #tpu.memory_space<vmem>>, vector<8x32xf32>
    tpu.vector_store %arg12[%c48_163, %c0_164], %396 {strides = array<i32>} : memref<64x64xf32, #tpu.memory_space<vmem>>, vector<8x32xf32>,
    %398 = vector.extract_strided_slice %395 {offsets = [0, 32], sizes = [8, 32], strides = [1, 1]} : vector<8x64xf32> to vector<8x32xf32>
    %c8_165 = arith.constant 8 : index
    %c32_166 = arith.constant 32 : index
    %399 = vector.load %arg12[%c8_165, %c32_166] : memref<64x64xf32, #tpu.memory_space<vmem>>, vector<8x32xf32>
    tpu.vector_store %arg12[%c8_165, %c32_166], %398 {strides = array<i32>} : memref<64x64xf32, #tpu.memory_space<vmem>>, vector<8x32xf32>,
    %c56_167 = arith.constant 56 : index
    %c0_168 = arith.constant 0 : index
    %400 = vector.load %arg11[%c56_167, %c0_168] : memref<64x256xf32, #tpu.memory_space<vmem>>, vector<8x256xf32>
    %c0_169 = arith.constant 0 : index
    %c0_170 = arith.constant 0 : index
    %401 = vector.load %arg11[%c0_169, %c0_170] : memref<64x256xf32, #tpu.memory_space<vmem>>, vector<8x256xf32>
    %402 = arith.select %4, %400, %401 : vector<8x256xi1>, vector<8x256xf32>
    %cst_171 = arith.constant dense<0.000000e+00> : vector<8x256xf32>
    %403 = tpu.matmul %395, %222, %cst_171 {dimension_numbers = #tpu.dot_dimension_numbers<[1], [0], [0], [1], [0, 0, 1, 1], [], []>} : vector<8x64xf32>, vector<64x256xf32>, vector<8x256xf32> -> vector<8x256xf32>
    %404 = arith.addf %402, %403 : vector<8x256xf32>
    %405 = vector.extract_strided_slice %404 {offsets = [0, 0], sizes = [8, 192], strides = [1, 1]} : vector<8x256xf32> to vector<8x192xf32>
    %406 = arith.negf %405 : vector<8x192xf32>
    %407 = math.exp %406 : vector<8x192xf32>
    %cst_172 = arith.constant 1.000000e+00 : f32
    %408 = vector.broadcast %cst_172 : f32 to vector<8x192xf32>
    %409 = arith.addf %408, %407 : vector<8x192xf32>
    %410 = arith.divf %408, %409 : vector<8x192xf32>
    %411 = vector.extract_strided_slice %404 {offsets = [0, 192], sizes = [8, 64], strides = [1, 1]} : vector<8x256xf32> to vector<8x64xf32>
    %412 = math.tanh %411 : vector<8x64xf32>
    %413 = vector.extract_strided_slice %410 {offsets = [0, 0], sizes = [8, 64], strides = [1, 1]} : vector<8x192xf32> to vector<8x64xf32>
    %414 = vector.extract_strided_slice %410 {offsets = [0, 64], sizes = [8, 64], strides = [1, 1]} : vector<8x192xf32> to vector<8x64xf32>
    %415 = vector.extract_strided_slice %410 {offsets = [0, 128], sizes = [8, 64], strides = [1, 1]} : vector<8x192xf32> to vector<8x64xf32>
    %416 = arith.mulf %414, %393 : vector<8x64xf32>
    %417 = arith.mulf %413, %412 : vector<8x64xf32>
    %418 = arith.addf %416, %417 : vector<8x64xf32>
    %419 = math.tanh %418 : vector<8x64xf32>
    %420 = arith.mulf %415, %419 : vector<8x64xf32>
    %421 = vector.extract_strided_slice %420 {offsets = [0, 0], sizes = [8, 32], strides = [1, 1]} : vector<8x64xf32> to vector<8x32xf32>
    %c56_173 = arith.constant 56 : index
    %c0_174 = arith.constant 0 : index
    %422 = vector.load %arg12[%c56_173, %c0_174] : memref<64x64xf32, #tpu.memory_space<vmem>>, vector<8x32xf32>
    tpu.vector_store %arg12[%c56_173, %c0_174], %421 {strides = array<i32>} : memref<64x64xf32, #tpu.memory_space<vmem>>, vector<8x32xf32>,
    %423 = vector.extract_strided_slice %420 {offsets = [0, 32], sizes = [8, 32], strides = [1, 1]} : vector<8x64xf32> to vector<8x32xf32>
    %c0_175 = arith.constant 0 : index
    %c32_176 = arith.constant 32 : index
    %424 = vector.load %arg12[%c0_175, %c32_176] : memref<64x64xf32, #tpu.memory_space<vmem>>, vector<8x32xf32>
    tpu.vector_store %arg12[%c0_175, %c32_176], %423 {strides = array<i32>} : memref<64x64xf32, #tpu.memory_space<vmem>>, vector<8x32xf32>,
    %c0_177 = arith.constant 0 : index
    %c0_178 = arith.constant 0 : index
    %425 = vector.load %arg12[%c0_177, %c0_178] : memref<64x64xf32, #tpu.memory_space<vmem>>, vector<64x64xf32>
    %c0_179 = arith.constant 0 : index
    %c0_180 = arith.constant 0 : index
    %426 = vector.load %arg7[%c0_179, %c0_180] : memref<64x256xf32, #tpu.memory_space<vmem>>, vector<64x256xf32>
    %cst_181 = arith.constant dense<0.000000e+00> : vector<64x256xf32>
    %427 = tpu.matmul %425, %426, %cst_181 {dimension_numbers = #tpu.dot_dimension_numbers<[1], [0], [0], [1], [0, 0, 1, 1], [], []>} : vector<64x64xf32>, vector<64x256xf32>, vector<64x256xf32> -> vector<64x256xf32>
    %c0_182 = arith.constant 0 : index
    %c0_183 = arith.constant 0 : index
    %428 = vector.load %arg9[%c0_182, %c0_183] : memref<1x256xf32, #tpu.memory_space<vmem>>, vector<1x256xf32>
    %429 = vector.broadcast %428 : vector<1x256xf32> to vector<64x256xf32>
    %430 = arith.addf %427, %429 : vector<64x256xf32>
    %c0_184 = arith.constant 0 : index
    %c0_185 = arith.constant 0 : index
    %431 = vector.load %arg11[%c0_184, %c0_185] : memref<64x256xf32, #tpu.memory_space<vmem>>, vector<64x256xf32>
    tpu.vector_store %arg11[%c0_184, %c0_185], %430 {strides = array<i32>} : memref<64x256xf32, #tpu.memory_space<vmem>>, vector<64x256xf32>,
    %c0_186 = arith.constant 0 : index
    %c0_187 = arith.constant 0 : index
    %432 = vector.load %arg8[%c0_186, %c0_187] : memref<64x256xf32, #tpu.memory_space<vmem>>, vector<64x256xf32>
    %cst_188 = arith.constant 0.000000e+00 : f32
    %433 = vector.broadcast %cst_188 : f32 to vector<8x64xf32>
    %cst_189 = arith.constant 0.000000e+00 : f32
    %434 = vector.broadcast %cst_189 : f32 to vector<8x64xf32>
    %c0_190 = arith.constant 0 : index
    %c0_191 = arith.constant 0 : index
    %435 = vector.load %arg11[%c0_190, %c0_191] : memref<64x256xf32, #tpu.memory_space<vmem>>, vector<8x256xf32>
    %c56_192 = arith.constant 56 : index
    %c0_193 = arith.constant 0 : index
    %436 = vector.load %arg11[%c56_192, %c0_193] : memref<64x256xf32, #tpu.memory_space<vmem>>, vector<8x256xf32>
    %437 = arith.select %4, %435, %436 : vector<8x256xi1>, vector<8x256xf32>
    %cst_194 = arith.constant dense<0.000000e+00> : vector<8x256xf32>
    %438 = tpu.matmul %433, %432, %cst_194 {dimension_numbers = #tpu.dot_dimension_numbers<[1], [0], [0], [1], [0, 0, 1, 1], [], []>} : vector<8x64xf32>, vector<64x256xf32>, vector<8x256xf32> -> vector<8x256xf32>
    %439 = arith.addf %437, %438 : vector<8x256xf32>
    %440 = vector.extract_strided_slice %439 {offsets = [0, 0], sizes = [8, 192], strides = [1, 1]} : vector<8x256xf32> to vector<8x192xf32>
    %441 = arith.negf %440 : vector<8x192xf32>
    %442 = math.exp %441 : vector<8x192xf32>
    %cst_195 = arith.constant 1.000000e+00 : f32
    %443 = vector.broadcast %cst_195 : f32 to vector<8x192xf32>
    %444 = arith.addf %443, %442 : vector<8x192xf32>
    %445 = arith.divf %443, %444 : vector<8x192xf32>
    %446 = vector.extract_strided_slice %439 {offsets = [0, 192], sizes = [8, 64], strides = [1, 1]} : vector<8x256xf32> to vector<8x64xf32>
    %447 = math.tanh %446 : vector<8x64xf32>
    %448 = vector.extract_strided_slice %445 {offsets = [0, 0], sizes = [8, 64], strides = [1, 1]} : vector<8x192xf32> to vector<8x64xf32>
    %449 = vector.extract_strided_slice %445 {offsets = [0, 64], sizes = [8, 64], strides = [1, 1]} : vector<8x192xf32> to vector<8x64xf32>
    %450 = vector.extract_strided_slice %445 {offsets = [0, 128], sizes = [8, 64], strides = [1, 1]} : vector<8x192xf32> to vector<8x64xf32>
    %451 = arith.mulf %449, %434 : vector<8x64xf32>
    %452 = arith.mulf %448, %447 : vector<8x64xf32>
    %453 = arith.addf %451, %452 : vector<8x64xf32>
    %454 = math.tanh %453 : vector<8x64xf32>
    %455 = arith.mulf %450, %454 : vector<8x64xf32>
    %456 = vector.extract_strided_slice %455 {offsets = [0, 32], sizes = [8, 32], strides = [1, 1]} : vector<8x64xf32> to vector<8x32xf32>
    %c0_196 = arith.constant 0 : index
    %c32_197 = arith.constant 32 : index
    %457 = vector.load %arg10[%c0_196, %c32_197] : memref<8x64xf32, #tpu.memory_space<vmem>>, vector<8x32xf32>
    tpu.vector_store %arg10[%c0_196, %c32_197], %456 {strides = array<i32>} : memref<8x64xf32, #tpu.memory_space<vmem>>, vector<8x32xf32>,
    %c8_198 = arith.constant 8 : index
    %c0_199 = arith.constant 0 : index
    %458 = vector.load %arg11[%c8_198, %c0_199] : memref<64x256xf32, #tpu.memory_space<vmem>>, vector<8x256xf32>
    %c48_200 = arith.constant 48 : index
    %c0_201 = arith.constant 0 : index
    %459 = vector.load %arg11[%c48_200, %c0_201] : memref<64x256xf32, #tpu.memory_space<vmem>>, vector<8x256xf32>
    %460 = arith.select %4, %458, %459 : vector<8x256xi1>, vector<8x256xf32>
    %cst_202 = arith.constant dense<0.000000e+00> : vector<8x256xf32>
    %461 = tpu.matmul %455, %432, %cst_202 {dimension_numbers = #tpu.dot_dimension_numbers<[1], [0], [0], [1], [0, 0, 1, 1], [], []>} : vector<8x64xf32>, vector<64x256xf32>, vector<8x256xf32> -> vector<8x256xf32>
    %462 = arith.addf %460, %461 : vector<8x256xf32>
    %463 = vector.extract_strided_slice %462 {offsets = [0, 0], sizes = [8, 192], strides = [1, 1]} : vector<8x256xf32> to vector<8x192xf32>
    %464 = arith.negf %463 : vector<8x192xf32>
    %465 = math.exp %464 : vector<8x192xf32>
    %cst_203 = arith.constant 1.000000e+00 : f32
    %466 = vector.broadcast %cst_203 : f32 to vector<8x192xf32>
    %467 = arith.addf %466, %465 : vector<8x192xf32>
    %468 = arith.divf %466, %467 : vector<8x192xf32>
    %469 = vector.extract_strided_slice %462 {offsets = [0, 192], sizes = [8, 64], strides = [1, 1]} : vector<8x256xf32> to vector<8x64xf32>
    %470 = math.tanh %469 : vector<8x64xf32>
    %471 = vector.extract_strided_slice %468 {offsets = [0, 0], sizes = [8, 64], strides = [1, 1]} : vector<8x192xf32> to vector<8x64xf32>
    %472 = vector.extract_strided_slice %468 {offsets = [0, 64], sizes = [8, 64], strides = [1, 1]} : vector<8x192xf32> to vector<8x64xf32>
    %473 = vector.extract_strided_slice %468 {offsets = [0, 128], sizes = [8, 64], strides = [1, 1]} : vector<8x192xf32> to vector<8x64xf32>
    %474 = arith.mulf %472, %453 : vector<8x64xf32>
    %475 = arith.mulf %471, %470 : vector<8x64xf32>
    %476 = arith.addf %474, %475 : vector<8x64xf32>
    %477 = math.tanh %476 : vector<8x64xf32>
    %478 = arith.mulf %473, %477 : vector<8x64xf32>
    %c16_204 = arith.constant 16 : index
    %c0_205 = arith.constant 0 : index
    %479 = vector.load %arg11[%c16_204, %c0_205] : memref<64x256xf32, #tpu.memory_space<vmem>>, vector<8x256xf32>
    %c40_206 = arith.constant 40 : index
    %c0_207 = arith.constant 0 : index
    %480 = vector.load %arg11[%c40_206, %c0_207] : memref<64x256xf32, #tpu.memory_space<vmem>>, vector<8x256xf32>
    %481 = arith.select %4, %479, %480 : vector<8x256xi1>, vector<8x256xf32>
    %cst_208 = arith.constant dense<0.000000e+00> : vector<8x256xf32>
    %482 = tpu.matmul %478, %432, %cst_208 {dimension_numbers = #tpu.dot_dimension_numbers<[1], [0], [0], [1], [0, 0, 1, 1], [], []>} : vector<8x64xf32>, vector<64x256xf32>, vector<8x256xf32> -> vector<8x256xf32>
    %483 = arith.addf %481, %482 : vector<8x256xf32>
    %484 = vector.extract_strided_slice %483 {offsets = [0, 0], sizes = [8, 192], strides = [1, 1]} : vector<8x256xf32> to vector<8x192xf32>
    %485 = arith.negf %484 : vector<8x192xf32>
    %486 = math.exp %485 : vector<8x192xf32>
    %cst_209 = arith.constant 1.000000e+00 : f32
    %487 = vector.broadcast %cst_209 : f32 to vector<8x192xf32>
    %488 = arith.addf %487, %486 : vector<8x192xf32>
    %489 = arith.divf %487, %488 : vector<8x192xf32>
    %490 = vector.extract_strided_slice %483 {offsets = [0, 192], sizes = [8, 64], strides = [1, 1]} : vector<8x256xf32> to vector<8x64xf32>
    %491 = math.tanh %490 : vector<8x64xf32>
    %492 = vector.extract_strided_slice %489 {offsets = [0, 0], sizes = [8, 64], strides = [1, 1]} : vector<8x192xf32> to vector<8x64xf32>
    %493 = vector.extract_strided_slice %489 {offsets = [0, 64], sizes = [8, 64], strides = [1, 1]} : vector<8x192xf32> to vector<8x64xf32>
    %494 = vector.extract_strided_slice %489 {offsets = [0, 128], sizes = [8, 64], strides = [1, 1]} : vector<8x192xf32> to vector<8x64xf32>
    %495 = arith.mulf %493, %476 : vector<8x64xf32>
    %496 = arith.mulf %492, %491 : vector<8x64xf32>
    %497 = arith.addf %495, %496 : vector<8x64xf32>
    %498 = math.tanh %497 : vector<8x64xf32>
    %499 = arith.mulf %494, %498 : vector<8x64xf32>
    %c24_210 = arith.constant 24 : index
    %c0_211 = arith.constant 0 : index
    %500 = vector.load %arg11[%c24_210, %c0_211] : memref<64x256xf32, #tpu.memory_space<vmem>>, vector<8x256xf32>
    %c32_212 = arith.constant 32 : index
    %c0_213 = arith.constant 0 : index
    %501 = vector.load %arg11[%c32_212, %c0_213] : memref<64x256xf32, #tpu.memory_space<vmem>>, vector<8x256xf32>
    %502 = arith.select %4, %500, %501 : vector<8x256xi1>, vector<8x256xf32>
    %cst_214 = arith.constant dense<0.000000e+00> : vector<8x256xf32>
    %503 = tpu.matmul %499, %432, %cst_214 {dimension_numbers = #tpu.dot_dimension_numbers<[1], [0], [0], [1], [0, 0, 1, 1], [], []>} : vector<8x64xf32>, vector<64x256xf32>, vector<8x256xf32> -> vector<8x256xf32>
    %504 = arith.addf %502, %503 : vector<8x256xf32>
    %505 = vector.extract_strided_slice %504 {offsets = [0, 0], sizes = [8, 192], strides = [1, 1]} : vector<8x256xf32> to vector<8x192xf32>
    %506 = arith.negf %505 : vector<8x192xf32>
    %507 = math.exp %506 : vector<8x192xf32>
    %cst_215 = arith.constant 1.000000e+00 : f32
    %508 = vector.broadcast %cst_215 : f32 to vector<8x192xf32>
    %509 = arith.addf %508, %507 : vector<8x192xf32>
    %510 = arith.divf %508, %509 : vector<8x192xf32>
    %511 = vector.extract_strided_slice %504 {offsets = [0, 192], sizes = [8, 64], strides = [1, 1]} : vector<8x256xf32> to vector<8x64xf32>
    %512 = math.tanh %511 : vector<8x64xf32>
    %513 = vector.extract_strided_slice %510 {offsets = [0, 0], sizes = [8, 64], strides = [1, 1]} : vector<8x192xf32> to vector<8x64xf32>
    %514 = vector.extract_strided_slice %510 {offsets = [0, 64], sizes = [8, 64], strides = [1, 1]} : vector<8x192xf32> to vector<8x64xf32>
    %515 = vector.extract_strided_slice %510 {offsets = [0, 128], sizes = [8, 64], strides = [1, 1]} : vector<8x192xf32> to vector<8x64xf32>
    %516 = arith.mulf %514, %497 : vector<8x64xf32>
    %517 = arith.mulf %513, %512 : vector<8x64xf32>
    %518 = arith.addf %516, %517 : vector<8x64xf32>
    %519 = math.tanh %518 : vector<8x64xf32>
    %520 = arith.mulf %515, %519 : vector<8x64xf32>
    %c32_216 = arith.constant 32 : index
    %c0_217 = arith.constant 0 : index
    %521 = vector.load %arg11[%c32_216, %c0_217] : memref<64x256xf32, #tpu.memory_space<vmem>>, vector<8x256xf32>
    %c24_218 = arith.constant 24 : index
    %c0_219 = arith.constant 0 : index
    %522 = vector.load %arg11[%c24_218, %c0_219] : memref<64x256xf32, #tpu.memory_space<vmem>>, vector<8x256xf32>
    %523 = arith.select %4, %521, %522 : vector<8x256xi1>, vector<8x256xf32>
    %cst_220 = arith.constant dense<0.000000e+00> : vector<8x256xf32>
    %524 = tpu.matmul %520, %432, %cst_220 {dimension_numbers = #tpu.dot_dimension_numbers<[1], [0], [0], [1], [0, 0, 1, 1], [], []>} : vector<8x64xf32>, vector<64x256xf32>, vector<8x256xf32> -> vector<8x256xf32>
    %525 = arith.addf %523, %524 : vector<8x256xf32>
    %526 = vector.extract_strided_slice %525 {offsets = [0, 0], sizes = [8, 192], strides = [1, 1]} : vector<8x256xf32> to vector<8x192xf32>
    %527 = arith.negf %526 : vector<8x192xf32>
    %528 = math.exp %527 : vector<8x192xf32>
    %cst_221 = arith.constant 1.000000e+00 : f32
    %529 = vector.broadcast %cst_221 : f32 to vector<8x192xf32>
    %530 = arith.addf %529, %528 : vector<8x192xf32>
    %531 = arith.divf %529, %530 : vector<8x192xf32>
    %532 = vector.extract_strided_slice %525 {offsets = [0, 192], sizes = [8, 64], strides = [1, 1]} : vector<8x256xf32> to vector<8x64xf32>
    %533 = math.tanh %532 : vector<8x64xf32>
    %534 = vector.extract_strided_slice %531 {offsets = [0, 0], sizes = [8, 64], strides = [1, 1]} : vector<8x192xf32> to vector<8x64xf32>
    %535 = vector.extract_strided_slice %531 {offsets = [0, 64], sizes = [8, 64], strides = [1, 1]} : vector<8x192xf32> to vector<8x64xf32>
    %536 = vector.extract_strided_slice %531 {offsets = [0, 128], sizes = [8, 64], strides = [1, 1]} : vector<8x192xf32> to vector<8x64xf32>
    %537 = arith.mulf %535, %518 : vector<8x64xf32>
    %538 = arith.mulf %534, %533 : vector<8x64xf32>
    %539 = arith.addf %537, %538 : vector<8x64xf32>
    %540 = math.tanh %539 : vector<8x64xf32>
    %541 = arith.mulf %536, %540 : vector<8x64xf32>
    %c40_222 = arith.constant 40 : index
    %c0_223 = arith.constant 0 : index
    %542 = vector.load %arg11[%c40_222, %c0_223] : memref<64x256xf32, #tpu.memory_space<vmem>>, vector<8x256xf32>
    %c16_224 = arith.constant 16 : index
    %c0_225 = arith.constant 0 : index
    %543 = vector.load %arg11[%c16_224, %c0_225] : memref<64x256xf32, #tpu.memory_space<vmem>>, vector<8x256xf32>
    %544 = arith.select %4, %542, %543 : vector<8x256xi1>, vector<8x256xf32>
    %cst_226 = arith.constant dense<0.000000e+00> : vector<8x256xf32>
    %545 = tpu.matmul %541, %432, %cst_226 {dimension_numbers = #tpu.dot_dimension_numbers<[1], [0], [0], [1], [0, 0, 1, 1], [], []>} : vector<8x64xf32>, vector<64x256xf32>, vector<8x256xf32> -> vector<8x256xf32>
    %546 = arith.addf %544, %545 : vector<8x256xf32>
    %547 = vector.extract_strided_slice %546 {offsets = [0, 0], sizes = [8, 192], strides = [1, 1]} : vector<8x256xf32> to vector<8x192xf32>
    %548 = arith.negf %547 : vector<8x192xf32>
    %549 = math.exp %548 : vector<8x192xf32>
    %cst_227 = arith.constant 1.000000e+00 : f32
    %550 = vector.broadcast %cst_227 : f32 to vector<8x192xf32>
    %551 = arith.addf %550, %549 : vector<8x192xf32>
    %552 = arith.divf %550, %551 : vector<8x192xf32>
    %553 = vector.extract_strided_slice %546 {offsets = [0, 192], sizes = [8, 64], strides = [1, 1]} : vector<8x256xf32> to vector<8x64xf32>
    %554 = math.tanh %553 : vector<8x64xf32>
    %555 = vector.extract_strided_slice %552 {offsets = [0, 0], sizes = [8, 64], strides = [1, 1]} : vector<8x192xf32> to vector<8x64xf32>
    %556 = vector.extract_strided_slice %552 {offsets = [0, 64], sizes = [8, 64], strides = [1, 1]} : vector<8x192xf32> to vector<8x64xf32>
    %557 = vector.extract_strided_slice %552 {offsets = [0, 128], sizes = [8, 64], strides = [1, 1]} : vector<8x192xf32> to vector<8x64xf32>
    %558 = arith.mulf %556, %539 : vector<8x64xf32>
    %559 = arith.mulf %555, %554 : vector<8x64xf32>
    %560 = arith.addf %558, %559 : vector<8x64xf32>
    %561 = math.tanh %560 : vector<8x64xf32>
    %562 = arith.mulf %557, %561 : vector<8x64xf32>
    %c48_228 = arith.constant 48 : index
    %c0_229 = arith.constant 0 : index
    %563 = vector.load %arg11[%c48_228, %c0_229] : memref<64x256xf32, #tpu.memory_space<vmem>>, vector<8x256xf32>
    %c8_230 = arith.constant 8 : index
    %c0_231 = arith.constant 0 : index
    %564 = vector.load %arg11[%c8_230, %c0_231] : memref<64x256xf32, #tpu.memory_space<vmem>>, vector<8x256xf32>
    %565 = arith.select %4, %563, %564 : vector<8x256xi1>, vector<8x256xf32>
    %cst_232 = arith.constant dense<0.000000e+00> : vector<8x256xf32>
    %566 = tpu.matmul %562, %432, %cst_232 {dimension_numbers = #tpu.dot_dimension_numbers<[1], [0], [0], [1], [0, 0, 1, 1], [], []>} : vector<8x64xf32>, vector<64x256xf32>, vector<8x256xf32> -> vector<8x256xf32>
    %567 = arith.addf %565, %566 : vector<8x256xf32>
    %568 = vector.extract_strided_slice %567 {offsets = [0, 0], sizes = [8, 192], strides = [1, 1]} : vector<8x256xf32> to vector<8x192xf32>
    %569 = arith.negf %568 : vector<8x192xf32>
    %570 = math.exp %569 : vector<8x192xf32>
    %cst_233 = arith.constant 1.000000e+00 : f32
    %571 = vector.broadcast %cst_233 : f32 to vector<8x192xf32>
    %572 = arith.addf %571, %570 : vector<8x192xf32>
    %573 = arith.divf %571, %572 : vector<8x192xf32>
    %574 = vector.extract_strided_slice %567 {offsets = [0, 192], sizes = [8, 64], strides = [1, 1]} : vector<8x256xf32> to vector<8x64xf32>
    %575 = math.tanh %574 : vector<8x64xf32>
    %576 = vector.extract_strided_slice %573 {offsets = [0, 0], sizes = [8, 64], strides = [1, 1]} : vector<8x192xf32> to vector<8x64xf32>
    %577 = vector.extract_strided_slice %573 {offsets = [0, 64], sizes = [8, 64], strides = [1, 1]} : vector<8x192xf32> to vector<8x64xf32>
    %578 = vector.extract_strided_slice %573 {offsets = [0, 128], sizes = [8, 64], strides = [1, 1]} : vector<8x192xf32> to vector<8x64xf32>
    %579 = arith.mulf %577, %560 : vector<8x64xf32>
    %580 = arith.mulf %576, %575 : vector<8x64xf32>
    %581 = arith.addf %579, %580 : vector<8x64xf32>
    %582 = math.tanh %581 : vector<8x64xf32>
    %583 = arith.mulf %578, %582 : vector<8x64xf32>
    %c56_234 = arith.constant 56 : index
    %c0_235 = arith.constant 0 : index
    %584 = vector.load %arg11[%c56_234, %c0_235] : memref<64x256xf32, #tpu.memory_space<vmem>>, vector<8x256xf32>
    %c0_236 = arith.constant 0 : index
    %c0_237 = arith.constant 0 : index
    %585 = vector.load %arg11[%c0_236, %c0_237] : memref<64x256xf32, #tpu.memory_space<vmem>>, vector<8x256xf32>
    %586 = arith.select %4, %584, %585 : vector<8x256xi1>, vector<8x256xf32>
    %cst_238 = arith.constant dense<0.000000e+00> : vector<8x256xf32>
    %587 = tpu.matmul %583, %432, %cst_238 {dimension_numbers = #tpu.dot_dimension_numbers<[1], [0], [0], [1], [0, 0, 1, 1], [], []>} : vector<8x64xf32>, vector<64x256xf32>, vector<8x256xf32> -> vector<8x256xf32>
    %588 = arith.addf %586, %587 : vector<8x256xf32>
    %589 = vector.extract_strided_slice %588 {offsets = [0, 0], sizes = [8, 192], strides = [1, 1]} : vector<8x256xf32> to vector<8x192xf32>
    %590 = arith.negf %589 : vector<8x192xf32>
    %591 = math.exp %590 : vector<8x192xf32>
    %cst_239 = arith.constant 1.000000e+00 : f32
    %592 = vector.broadcast %cst_239 : f32 to vector<8x192xf32>
    %593 = arith.addf %592, %591 : vector<8x192xf32>
    %594 = arith.divf %592, %593 : vector<8x192xf32>
    %595 = vector.extract_strided_slice %588 {offsets = [0, 192], sizes = [8, 64], strides = [1, 1]} : vector<8x256xf32> to vector<8x64xf32>
    %596 = math.tanh %595 : vector<8x64xf32>
    %597 = vector.extract_strided_slice %594 {offsets = [0, 0], sizes = [8, 64], strides = [1, 1]} : vector<8x192xf32> to vector<8x64xf32>
    %598 = vector.extract_strided_slice %594 {offsets = [0, 64], sizes = [8, 64], strides = [1, 1]} : vector<8x192xf32> to vector<8x64xf32>
    %599 = vector.extract_strided_slice %594 {offsets = [0, 128], sizes = [8, 64], strides = [1, 1]} : vector<8x192xf32> to vector<8x64xf32>
    %600 = arith.mulf %598, %581 : vector<8x64xf32>
    %601 = arith.mulf %597, %596 : vector<8x64xf32>
    %602 = arith.addf %600, %601 : vector<8x64xf32>
    %603 = math.tanh %602 : vector<8x64xf32>
    %604 = arith.mulf %599, %603 : vector<8x64xf32>
    %605 = vector.extract_strided_slice %604 {offsets = [0, 0], sizes = [8, 32], strides = [1, 1]} : vector<8x64xf32> to vector<8x32xf32>
    %c0_240 = arith.constant 0 : index
    %c0_241 = arith.constant 0 : index
    %606 = vector.load %arg10[%c0_240, %c0_241] : memref<8x64xf32, #tpu.memory_space<vmem>>, vector<8x32xf32>
    tpu.vector_store %arg10[%c0_240, %c0_241], %605 {strides = array<i32>} : memref<8x64xf32, #tpu.memory_space<vmem>>, vector<8x32xf32>,
    return
  }
}

</mosaic_0001>

<bundles_post_ra>
// kernel: tpu_custom_call.1
= control target key start
LH: loop header
LB: loop body
LE: loop exit
PB: predicated region body
PF: predicated region fallthrough
CT: control target
= control target key end

     0   :  { %15 = vsyncpa [#allocation5], 0  ;;  %s5359_s0 = inlined_call_operand.hbm [shape: f32[64,64], index: 0, kind: input, shape index: {}]   ;;  %s5360_s1 = inlined_call_operand.hbm [shape: f32[64,256], index: 1, kind: input, shape index: {}]   ;;  %s5361_s2 = inlined_call_operand.hbm [shape: f32[64,256], index: 2, kind: input, shape index: {}]   ;;  %s5362_s3 = inlined_call_operand.vmem [shape: f32[1,256], index: 3, kind: input, shape index: {}]   ;;  %s5363_s4 = inlined_call_operand.hbm [shape: f32[64,256], index: 4, kind: input, shape index: {}]   ;;  %s5364_s5 = inlined_call_operand.hbm [shape: f32[64,256], index: 5, kind: input, shape index: {}]   ;;  %s5365_s6 = inlined_call_operand.vmem [shape: f32[1,256], index: 6, kind: input, shape index: {}]   ;;  %s5366_s7 = inlined_call_operand.hbm [shape: f32[64,256], index: 7, kind: input, shape index: {}]   ;;  %s5367_s8 = inlined_call_operand.hbm [shape: f32[64,256], index: 8, kind: input, shape index: {}]   ;;  %s5368_s9 = inlined_call_operand.vmem [shape: f32[1,256], index: 9, kind: input, shape index: {}]   ;;  %s5369_s10 = inlined_call_operand.hbm [shape: f32[8,64], index: 10, kind: output, shape index: {}]  }
   0x1   :  { %16 = vsyncpa [#allocation8], 0 }
   0x2   :  { %17 = vsyncpa [#allocation11], 0 }
   0x3   :  { %18 = vsyncpa [#allocation14], 0 }
   0x4   :  { %19 = vsyncpa [#allocation6], 0  ;;  %s4043_s13 = smov [#allocation7]  }
   0x5   :  { %s37_s14 = sshll.u32 %s4043_s13, 4  ;;  %s38_s14 = int_to_ptr.vmem [resolvable:$true] %s37_s14 }
   0x6   :  { %s3881_s15 = scalar_lea.vmem %s38_s14, 2048  ;;  %p3886_p1 = scmp.lt.s32.totalorder %s38_s14, %s38_s14 }
   0x7   :  { %p3882_p0 = scmp.ne.s32.totalorder %s38_s14, %s3881_s15  ;;  %p3887_p2 = scmp.lt.s32.totalorder %s3881_s15, %s3881_s15 }
   0x9   :  { %p3888_p3 = por %p3887_p2, %p3886_p1 }
   0xb   :  { %p3889_p4 = pnand %p3888_p3, %p3882_p0 }
   0xd   :  { %3892 = shalt.err (!%p3889_p4)
}
   0xe   :  { %s4044_s16 = smov 256   ;;  %s4045_s17 = smov 16  }
   0xf   :  { %43 = dma.hbm_to_vmem [thread:$0]  %s5360_s1, 2048, %s38_s14, [#allocation8], %s4044_s16, %s4044_s16, %s4045_s17  }
  0x10   :  { %s4046_s20 = smov [#allocation10]   ;;  %s4047_s22 = smov [#allocation13]  }
  0x11   :  { %s63_s21 = sshll.u32 %s4046_s20, 4  ;;  %s89_s23 = sshll.u32 %s4047_s22, 4  ;;  %s64_s21 = int_to_ptr.vmem [resolvable:$true] %s63_s21  ;;  %s90_s23 = int_to_ptr.vmem [resolvable:$true] %s89_s23 }
  0x12   :  { %s3901_s24 = scalar_lea.vmem %s64_s21, 2048  ;;  %p3906_p6 = scmp.lt.s32.totalorder %s64_s21, %s64_s21 }
  0x13   :  { %p3902_p5 = scmp.ne.s32.totalorder %s64_s21, %s3901_s24  ;;  %p3907_p7 = scmp.lt.s32.totalorder %s3901_s24, %s3901_s24 }
  0x15   :  { %p3908_p8 = por %p3907_p7, %p3906_p6 }
  0x17   :  { %p3909_p9 = pnand %p3908_p8, %p3902_p5 }
  0x19   :  { %3912 = shalt.err (!%p3909_p9)
}
  0x1a   :  { %69 = dma.hbm_to_vmem [thread:$0]  %s5363_s4, 2048, %s64_s21, [#allocation11], %s4044_s16, %s4044_s16, %s4045_s17  }
  0x1b   :  { %s3921_s1 = scalar_lea.vmem %s90_s23, 2048  ;;  %p3926_p11 = scmp.lt.s32.totalorder %s90_s23, %s90_s23 }
  0x1c   :  { %p3922_p10 = scmp.ne.s32.totalorder %s90_s23, %s3921_s1  ;;  %p3927_p12 = scmp.lt.s32.totalorder %s3921_s1, %s3921_s1 }
  0x1e   :  { %p3928_p13 = por %p3927_p12, %p3926_p11 }
  0x20   :  { %p3929_p0 = pnand %p3928_p13, %p3922_p10 }
  0x22   :  { %3932 = shalt.err (!%p3929_p0)
}
  0x23   :  { %95 = dma.hbm_to_vmem [thread:$0]  %s5366_s7, 2048, %s90_s23, [#allocation14], %s4044_s16, %s4044_s16, %s4045_s17  }
  0x24   :  { %s4048_s29 = smov [#allocation4]  }
  0x25   :  { %s25_s30 = sshll.u32 %s4048_s29, 4  ;;  %s26_s30 = int_to_ptr.vmem [resolvable:$true] %s25_s30 }
  0x26   :  { %s3941_s11 = scalar_lea.vmem %s26_s30, 1024  ;;  %p3946_p2 = scmp.lt.s32.totalorder %s26_s30, %s26_s30 }
  0x27   :  { %p3942_p1 = scmp.ne.s32.totalorder %s26_s30, %s3941_s11  ;;  %p3947_p3 = scmp.lt.s32.totalorder %s3941_s11, %s3941_s11 }
  0x29   :  { %p3948_p4 = por %p3947_p3, %p3946_p2 }
  0x2b   :  { %p3949_p5 = pnand %p3948_p4, %p3942_p1 }
  0x2d   :  { %3952 = shalt.err (!%p3949_p5)
}
  0x2e   :  { %s4049_s4 = smov 128   ;;  %s4050_s12 = smov 8  }
  0x2f   :  { %31 = dma.hbm_to_vmem [thread:$0]  %s5359_s0, 1024, %s26_s30, [#allocation5], %s4049_s4, %s4049_s4, %s4050_s12  }
  0x30   :  { %s4051_s15 = smov [#allocation9]   ;;  %s4052_s19 = smov [#allocation12]  }
  0x31   :  { %s49_s18 = sshll.u32 %s4051_s15, 4  ;;  %s75_s7 = sshll.u32 %s4052_s19, 4  ;;  %s50_s18 = int_to_ptr.vmem [resolvable:$true] %s49_s18  ;;  %s76_s7 = int_to_ptr.vmem [resolvable:$true] %s75_s7 }
  0x32   :  { %s3961_s20 = scalar_lea.vmem %s50_s18, 2048  ;;  %p3966_p7 = scmp.lt.s32.totalorder %s50_s18, %s50_s18 }
  0x33   :  { %p3962_p6 = scmp.ne.s32.totalorder %s50_s18, %s3961_s20  ;;  %p3967_p8 = scmp.lt.s32.totalorder %s3961_s20, %s3961_s20 }
  0x35   :  { %p3968_p9 = por %p3967_p8, %p3966_p7 }
  0x37   :  { %p3969_p10 = pnand %p3968_p9, %p3962_p6 }
  0x39   :  { %3972 = shalt.err (!%p3969_p10)
}
  0x3a   :  { %55 = dma.hbm_to_vmem [thread:$0]  %s5361_s2, 2048, %s50_s18, [#allocation8], %s4044_s16, %s4044_s16, %s4045_s17  }
  0x3b   :  { %s3981_s0 = scalar_lea.vmem %s76_s7, 2048  ;;  %p3986_p12 = scmp.lt.s32.totalorder %s76_s7, %s76_s7 }
  0x3c   :  { %p3982_p11 = scmp.ne.s32.totalorder %s76_s7, %s3981_s0  ;;  %p3987_p13 = scmp.lt.s32.totalorder %s3981_s0, %s3981_s0 }
  0x3e   :  { %p3988_p0 = por %p3987_p13, %p3986_p12 }
  0x40   :  { %p3989_p1 = pnand %p3988_p0, %p3982_p11 }
  0x42   :  { %3992 = shalt.err (!%p3989_p1)
}
  0x43   :  { %81 = dma.hbm_to_vmem [thread:$0]  %s5364_s5, 2048, %s76_s7, [#allocation11], %s4044_s16, %s4044_s16, %s4045_s17  }
  0x44   :  { %s4053_s25 = smov [#allocation15]  }
  0x45   :  { %s101_s26 = sshll.u32 %s4053_s25, 4  ;;  %s102_s26 = int_to_ptr.vmem [resolvable:$true] %s101_s26 }
  0x46   :  { %s4001_s1 = scalar_lea.vmem %s102_s26, 2048  ;;  %p4006_p3 = scmp.lt.s32.totalorder %s102_s26, %s102_s26 }
  0x47   :  { %p4002_p2 = scmp.ne.s32.totalorder %s102_s26, %s4001_s1  ;;  %p4007_p4 = scmp.lt.s32.totalorder %s4001_s1, %s4001_s1 }
  0x49   :  { %p4008_p5 = por %p4007_p4, %p4006_p3 }
  0x4b   :  { %p4009_p6 = pnand %p4008_p5, %p4002_p2 }
  0x4d   :  { %4012 = shalt.err (!%p4009_p6)
}
  0x4e   :  { %107 = dma.hbm_to_vmem [thread:$0]  %s5367_s8, 2048, %s102_s26, [#allocation14], %s4044_s16, %s4044_s16, %s4045_s17  }
  0x4f   :  { %4033 = dma.done.wait [#allocation5], 1024  }
  0x50   :  { %4034 = vsyncadd [#allocation5], 4294966272 }
  0x51   :  { %4035 = dma.done.wait [#allocation8], 4096  }
  0x52   :  { %4036 = vsyncadd [#allocation8], 4294963200 }
  0x53   :  { %4037 = dma.done.wait [#allocation11], 4096  }
  0x54   :  { %4038 = vsyncadd [#allocation11], 4294963200 }
  0x55   :  { %4039 = dma.done.wait [#allocation14], 4096  }
  0x56   :  { %4040 = vsyncadd [#allocation14], 4294963200  ;;  %v4054_v0 = vmov 0.0   ;;  %v161_v1 = vld [vmem:[#allocation7 + $0x78] sm:$0xff]  ;;  %v160_v2 = vld [vmem:[#allocation7 + $0x70] sm:$0xff]  ;;  %vm174_vm0 = vcmask 523264   ;;  %v131_v41 = vlaneseq }
  0x57   :  { %263 = vmatprep.mubr.f32.mxu0 %v4054_v0  ;;  %417 = vmatprep.mubr.f32.mxu1 %v4054_v0  ;;  %v159_v3 = vld [vmem:[#allocation7 + $0x68] sm:$0xff]  ;;  %v158_v4 = vld [vmem:[#allocation7 + $0x60] sm:$0xff]  ;;  %v157_v5 = vld [vmem:[#allocation7 + $0x58] sm:$0xff]  ;;  %vm456_vm3 = vcmask 261120   ;;  %vm458_vm4 = vcmask 523520  }
  0x58   :  { %215 = vmatprep.subr.mxu0 %v161_v1  ;;  %v156_v6 = vld [vmem:[#allocation7 + $0x50] sm:$0xff]  ;;  %v155_v7 = vld [vmem:[#allocation7 + $0x48] sm:$0xff]  ;;  %v154_v8 = vld [vmem:[#allocation7 + $0x40] sm:$0xff]  ;;  %v165_v42 = vshrl.u32 %v131_v41, 7  ;;  %v132_v52 = vand.u32 127, %v131_v41 }
  0x59   :  { %216 = vmatpush1.msra.mxu0 %v160_v2  ;;  %v153_v9 = vld [vmem:[#allocation7 + $0x38] sm:$0xff]  ;;  %v152_v11 = vld [vmem:[#allocation7 + $0x30] sm:$0xff]  ;;  %v4158_v13 = vld [vmem:[#allocation9 + $0x68] sm:$0xff] }
  0x5a   :  { %217 = vmatprep.subr.mxu0 %v159_v3  ;;  %v4153_v10 = vld [vmem:[#allocation9 + $0x78] sm:$0xff]  ;;  %v4156_v12 = vld [vmem:[#allocation9 + $0x70] sm:$0xff]  ;;  %v151_v14 = vld [vmem:[#allocation7 + $0x28] sm:$0xff]  ;;  %v4253_v43 = vsub.s32 0, %v165_v42  ;;  %v4258_v46 = vsub.s32 1, %v165_v42  ;;  %v133_v57 = vadd.s32 128, %v132_v52 }
  0x5b   :  { %218 = vmatpush1.msra.mxu0 %v158_v4  ;;  %369 = vmatprep.subr.mxu1 %v4153_v10  ;;  %v4161_v15 = vld [vmem:[#allocation9 + $0x60] sm:$0xff]  ;;  %v4163_v16 = vld [vmem:[#allocation9 + $0x58] sm:$0xff]  ;;  %v4166_v18 = vld [vmem:[#allocation9 + $0x50] sm:$0xff]  ;;  %v134_v60 = vand.u32 63, %v132_v52 }
  0x5c   :  { %219 = vmatprep.subr.mxu0 %v157_v5  ;;  %370 = vmatpush1.msra.mxu1 %v4156_v12  ;;  %v150_v17 = vld [vmem:[#allocation7 + $0x20] sm:$0xff]  ;;  %v149_v19 = vld [vmem:[#allocation7 + $0x18] sm:$0xff]  ;;  %v4169_v20 = vld [vmem:[#allocation9 + $0x48] sm:$0xff]  ;;  %v135_v63 = vand.u32 63, %v133_v57 }
  0x5d   :  { %220 = vmatpush1.msra.mxu0 %v156_v6  ;;  %371 = vmatprep.subr.mxu1 %v4158_v13  ;;  %v148_v21 = vld [vmem:[#allocation7 + $0x10] sm:$0xff]  ;;  %v4172_v22 = vld [vmem:[#allocation9 + $0x40] sm:$0xff]  ;;  %v147_v23 = vld [vmem:[#allocation7 + $0x8] sm:$0xff]  ;;  %vm4274_vm1 = vcmp.lt.s32.totalorder %v134_v60, 32 }
  0x5e   :  { %221 = vmatprep.subr.mxu0 %v155_v7  ;;  %372 = vmatpush1.msra.mxu1 %v4161_v15  ;;  %v4175_v24 = vld [vmem:[#allocation9 + $0x38] sm:$0xff]  ;;  %v146_v25 = vld [vmem:[#allocation7] sm:$0xff]  ;;  %v4178_v26 = vld [vmem:[#allocation9 + $0x30] sm:$0xff]  ;;  %vm4280_vm2 = vcmp.lt.s32.totalorder %v135_v63, 32 }
  0x5f   :  { %222 = vmatpush1.msra.mxu0 %v154_v8  ;;  %373 = vmatprep.subr.mxu1 %v4163_v16  ;;  %v138_v27 = vld [vmem:[#allocation4] sm:$0xff]  ;;  %v4181_v28 = vld [vmem:[#allocation9 + $0x28] sm:$0xff]  ;;  %v4187_v30 = vld [vmem:[#allocation9 + $0x18] sm:$0xff] }
  0x60   :  { %223 = vmatprep.subr.mxu0 %v153_v9  ;;  %374 = vmatpush1.msra.mxu1 %v4166_v18  ;;  %v4184_v29 = vld [vmem:[#allocation9 + $0x20] sm:$0xff]  ;;  %v4191_v31 = vld [vmem:[#allocation9 + $0x10] sm:$0xff]  ;;  %v139_v32 = vld [vmem:[#allocation4 + $0x8] sm:$0xff] }
  0x61   :  { %224 = vmatpush1.msra.mxu0 %v152_v11  ;;  %375 = vmatprep.subr.mxu1 %v4169_v20  ;;  %v4195_v33 = vld [vmem:[#allocation9 + $0x8] sm:$0xff]  ;;  %v4198_v34 = vld [vmem:[#allocation9] sm:$0xff]  ;;  %v140_v35 = vld [vmem:[#allocation4 + $0x10] sm:$0xff] }
  0x62   :  { %225 = vmatprep.subr.mxu0 %v151_v14  ;;  %376 = vmatpush1.msra.mxu1 %v4172_v22  ;;  %v141_v36 = vld [vmem:[#allocation4 + $0x18] sm:$0xff]  ;;  %v142_v37 = vld [vmem:[#allocation4 + $0x20] sm:$0xff]  ;;  %v143_v38 = vld [vmem:[#allocation4 + $0x28] sm:$0xff] }
  0x63   :  { %226 = vmatpush1.msra.mxu0 %v150_v17  ;;  %377 = vmatprep.subr.mxu1 %v4175_v24  ;;  %v144_v39 = vld [vmem:[#allocation4 + $0x30] sm:$0xff]  ;;  %v145_v40 = vld [vmem:[#allocation4 + $0x38] sm:$0xff]  ;;  %v162_v44 = vld [vmem:[%s5362_s3] sm:$0x3]  ;;  %s4055_s3 = smov 64  }
  0x64   :  { %227 = vmatprep.subr.mxu0 %v149_v19  ;;  %378 = vmatpush1.msra.mxu1 %v4178_v26  ;;  %v167_v48 = vrot.slane %v162_v44, %v4253_v43  ;;  %v171_v50 = vrot.slane %v162_v44, %v4258_v46 }
  0x65   :  { %228 = vmatpush1.msra.mxu0 %v148_v21  ;;  %379 = vmatprep.subr.mxu1 %v4181_v28 }
  0x66   :  { %229 = vmatprep.subr.mxu0 %v147_v23  ;;  %380 = vmatpush1.msra.mxu1 %v4184_v29 }
  0x67   :  { %230 = vmatpush1.msra.mxu0 %v146_v25  ;;  %381 = vmatprep.subr.mxu1 %v4187_v30 }
  0x68   :  { %3478 = vmatmul.mubr.msk.f32.vlgmr.msra.gmra.mxu0 %vm174_vm0, %v138_v27  ;;  %599 = vmatprep.subr.mxu0 %v4153_v10 }
  0x69   :  { %269 = vmatprep.mubr.f32.mxu0 %v4054_v0  ;;  %382 = vmatpush1.msra.mxu1 %v4191_v31 }
  0x6a   :  { %600 = vmatpush1.msra.mxu0 %v4156_v12  ;;  %383 = vmatprep.subr.mxu1 %v4195_v33 }
  0x6b   :  { %384 = vmatpush1.msra.mxu1 %v4198_v34  ;;  %601 = vmatprep.subr.mxu0 %v4158_v13 }
  0x6c   :  { %3479 = vmatmul.mubr.msk.f32.gmra.mxu0 %vm174_vm0, %v139_v32  ;;  %418 = vmatmul.mubr.f32.vlgmr.msra.gmra.mxu1 %v4054_v0 }
  0x6d   :  { %275 = vmatprep.mubr.f32.mxu0 %v4054_v0  ;;  %485 = vmatprep.subr.mxu1 %v4153_v10 }
  0x6e   :  { %486 = vmatpush1.msra.mxu1 %v4156_v12  ;;  %533 = vmatprep.mubr.f32.mxu1 %v4054_v0 }
  0x6f   :  { %487 = vmatprep.subr.mxu1 %v4158_v13  ;;  %602 = vmatpush1.msra.mxu0 %v4161_v15 }
  0x70   :  { %3480 = vmatmul.mubr.msk.f32.gmra.mxu0 %vm174_vm0, %v140_v35  ;;  %488 = vmatpush1.msra.mxu1 %v4161_v15 }
  0x71   :  { %281 = vmatprep.mubr.f32.mxu0 %v4054_v0  ;;  %489 = vmatprep.subr.mxu1 %v4163_v16 }
  0x72   :  { %490 = vmatpush1.msra.mxu1 %v4166_v18  ;;  %603 = vmatprep.subr.mxu0 %v4163_v16 }
  0x73   :  { %491 = vmatprep.subr.mxu1 %v4169_v20  ;;  %604 = vmatpush1.msra.mxu0 %v4166_v18 }
  0x74   :  { %3481 = vmatmul.mubr.msk.f32.gmra.mxu0 %vm174_vm0, %v141_v36  ;;  %492 = vmatpush1.msra.mxu1 %v4172_v22 }
  0x75   :  { %287 = vmatprep.mubr.f32.mxu0 %v4054_v0  ;;  %493 = vmatprep.subr.mxu1 %v4175_v24 }
  0x76   :  { %494 = vmatpush1.msra.mxu1 %v4178_v26  ;;  %605 = vmatprep.subr.mxu0 %v4169_v20 }
  0x77   :  { %495 = vmatprep.subr.mxu1 %v4181_v28  ;;  %606 = vmatpush1.msra.mxu0 %v4172_v22 }
  0x78   :  { %3482 = vmatmul.mubr.msk.f32.gmra.mxu0 %vm174_vm0, %v142_v37  ;;  %496 = vmatpush1.msra.mxu1 %v4184_v29 }
  0x79   :  { %293 = vmatprep.mubr.f32.mxu0 %v4054_v0  ;;  %497 = vmatprep.subr.mxu1 %v4187_v30 }
  0x7a   :  { %498 = vmatpush1.msra.mxu1 %v4191_v31  ;;  %607 = vmatprep.subr.mxu0 %v4175_v24 }
  0x7b   :  { %499 = vmatprep.subr.mxu1 %v4195_v33  ;;  %608 = vmatpush1.msra.mxu0 %v4178_v26 }
  0x7c   :  { %3483 = vmatmul.mubr.msk.f32.gmra.mxu0 %vm174_vm0, %v143_v38  ;;  %500 = vmatpush1.msra.mxu1 %v4198_v34 }
  0x7d   :  { %299 = vmatprep.mubr.f32.mxu0 %v4054_v0  ;;  %713 = vmatprep.subr.mxu1 %v4153_v10 }
  0x7e   :  { %609 = vmatprep.subr.mxu0 %v4181_v28 }
  0x7f   :  { %610 = vmatpush1.msra.mxu0 %v4184_v29 }
  0x80   :  { %3484 = vmatmul.mubr.msk.f32.gmra.mxu0 %vm174_vm0, %v144_v39  ;;  %611 = vmatprep.subr.mxu0 %v4187_v30 }
  0x81   :  { %305 = vmatprep.mubr.f32.mxu0 %v4054_v0  ;;  %612 = vmatpush1.msra.mxu0 %v4191_v31 }
  0x82   :  { %613 = vmatprep.subr.mxu0 %v4195_v33 }
  0x83   :  { %614 = vmatpush1.msra.mxu0 %v4198_v34 }
  0x84   :  { %3485 = vmatmul.mubr.msk.f32.gmra.mxu0 %vm174_vm0, %v145_v40  ;;  %827 = vmatprep.subr.mxu0 %v4153_v10 }
  0x85   :  { %647 = vmatprep.mubr.f32.mxu0 %v4054_v0 }
 0x128   :  { %v265_v45 = vpop.f32.mrf.mxu0 }
 0x12a   :  { %v267_v47 = vpop.f32.mrf.mxu0 }
 0x12b   :  { %v4346_v60 = vadd.f32 %v267_v47, %v171_v50 }
 0x12c   :  { %v271_v49 = vpop.f32.mrf.mxu0 }
 0x12d   :  { %v4262_v51 = vadd.f32 %v271_v49, %v167_v48  ;;  %v4334_v49 = vadd.f32 %v265_v45, %v167_v48 }
 0x12e   :  { %v273_v53 = vpop.f32.mrf.mxu0 }
 0x12f   :  { %v4264_v54 = vadd.f32 %v273_v53, %v171_v50  ;;  %v419_v53 = vpop.f32.mrf.mxu1 }
 0x130   :  { %v277_v55 = vpop.f32.mrf.mxu0 }
 0x131   :  { %v4266_v56 = vadd.f32 %v277_v55, %v167_v48  ;;  %v421_v47 = vpop.f32.mrf.mxu1 }
 0x132   :  { %v279_v58 = vpop.f32.mrf.mxu0 }
 0x133   :  { %v4268_v59 = vadd.f32 %v279_v58, %v171_v50 }
 0x134   :  { %v283_v61 = vpop.f32.mrf.mxu0 }
 0x135   :  { %v4270_v62 = vadd.f32 %v283_v61, %v167_v48 }
 0x136   :  { %v285_v1 = vpop.f32.mrf.mxu0 }
 0x137   :  { %v4272_v2 = vadd.f32 %v285_v1, %v171_v50 }
 0x138   :  { %v289_v4 = vpop.f32.mrf.mxu0 }
 0x139   :  { %v4278_v5 = vadd.f32 %v289_v4, %v167_v48 }
 0x13a   :  { %v291_v7 = vpop.f32.mrf.mxu0 }
 0x13b   :  { %v4284_v8 = vadd.f32 %v291_v7, %v171_v50  ;;  %v692_v9 = vsel %vm4274_vm1, %v4270_v62, %v4278_v5  ;;  %v806_v11 = vsel %vm4274_vm1, %v4278_v5, %v4270_v62 }
 0x13c   :  { %v295_v14 = vpop.f32.mrf.mxu0 }
 0x13d   :  { %v4294_v17 = vadd.f32 %v295_v14, %v167_v48  ;;  %v693_v19 = vsel %vm4280_vm2, %v4272_v2, %v4284_v8  ;;  %v807_v21 = vsel %vm4280_vm2, %v4284_v8, %v4272_v2 }
 0x13e   :  { %v297_v23 = vpop.f32.mrf.mxu0 }
 0x13f   :  { %v4304_v25 = vadd.f32 %v297_v23, %v171_v50  ;;  %v578_v27 = vsel %vm4274_vm1, %v4266_v56, %v4294_v17  ;;  %v920_v32 = vsel %vm4274_vm1, %v4294_v17, %v4266_v56 }
 0x140   :  { %v301_v35 = vpop.f32.mrf.mxu0 }
 0x141   :  { %v4314_v36 = vadd.f32 %v301_v35, %v167_v48  ;;  %v579_v37 = vsel %vm4280_vm2, %v4268_v59, %v4304_v25  ;;  %v921_v38 = vsel %vm4280_vm2, %v4304_v25, %v4268_v59 }
 0x142   :  { %v303_v39 = vpop.f32.mrf.mxu0 }
 0x143   :  { %v4324_v40 = vadd.f32 %v303_v39, %v171_v50  ;;  %v464_v41 = vsel %vm4274_vm1, %v4262_v51, %v4314_v36  ;;  %v1034_v42 = vsel %vm4274_vm1, %v4314_v36, %v4262_v51 }
 0x144   :  { %v307_v44 = vpop.f32.mrf.mxu0 }
 0x145   :  { %v4336_v52 = vadd.f32 %v307_v44, %v167_v48  ;;  %v465_v55 = vsel %vm4280_vm2, %v4264_v54, %v4324_v40  ;;  %v1035_v57 = vsel %vm4280_vm2, %v4324_v40, %v4264_v54 }
 0x146   :  { %v309_v58 = vpop.f32.mrf.mxu0 }
 0x147   :  { %v348_v45 = vsel %vm4274_vm1, %v4334_v49, %v4336_v52  ;;  %v4352_v48 = vadd.f32 %v309_v58, %v171_v50 }
 0x148   :  { %v424_v63 = vadd.f32 %v419_v53, %v348_v45 }
 0x149   :  { %v349_v1 = vsel %vm4280_vm2, %v4346_v60, %v4352_v48  ;;  %v1149_v4 = vsel %vm4280_vm2, %v4352_v48, %v4346_v60  ;;  %v1279_v60 = vld [vmem:[#allocation10 + $0x68] sm:$0xff]  ;;  %v1278_v48 = vld [vmem:[#allocation10 + $0x60] sm:$0xff] }
 0x14a   :  { %v425_v7 = vadd.f32 %v421_v47, %v349_v1  ;;  %v3486_v14 = vmul.f32 -1.442695, %v424_v63 }
 0x14c   :  { %3585 = vtanh.f32 %v425_v7  ;;  %v3487_v47 = vmul.f32 -1.442695, %v425_v7 }
 0x14d   :  { %3587 = vpow2.f32 %v3486_v14 }
 0x159   :  { %v3586_v50 = vpop.eup %3585 }
 0x15a   :  { %441 = vrot.lane.b32.xlu0 %v3586_v50, %s4055_s3  ;;  %v3588_v23 = vpop.eup %3587 }
 0x15b   :  { %v432_v35 = vadd.f32 1.0, %v3588_v23 }
 0x15d   :  { %3589 = vrcp.f32 %v432_v35 }
 0x16a   :  { %v3590_v39 = vpop.eup %3589 }
 0x16b   :  { %v439_v58 = vmul.f32 0.0, %v3590_v39 }
 0x1cc   :  { %v442_v44 = vpop.permute.xlu0 %441 }
 0x1cd   :  { %v444_v53 = vmul.f32 %v3590_v39, %v442_v44 }
 0x1cf   :  { %446 = vrot.lane.b32.xlu0 %v444_v53, %s4055_s3 }
 0x241   :  { %v447_v45 = vpop.permute.xlu0 %446 }
 0x242   :  { %v449_v61 = vadd.f32 %v447_v45, %v439_v58 }
 0x244   :  { %3591 = vtanh.f32 %v449_v61 }
 0x245   :  { %3593 = vpow2.f32 %v3487_v47 }
 0x251   :  { %v3592_v1 = vpop.eup %3591 }
 0x252   :  { %452 = vrot.lane.b32.xlu1 %v3592_v1, %s4055_s3  ;;  %v3594_v50 = vpop.eup %3593 }
 0x253   :  { %v433_v63 = vadd.f32 1.0, %v3594_v50 }
 0x255   :  { %3595 = vrcp.f32 %v433_v63 }
 0x262   :  { %v3596_v14 = vpop.eup %3595 }
 0x2c4   :  { %v453_v23 = vpop.permute.xlu1 %452 }
 0x2c5   :  { %v455_v35 = vmul.f32 %v3596_v14, %v453_v23 }
 0x2c7   :  { %457 = vst.msk [vmem:[#allocation3] sm:$0xff] %vm456_vm3, %v455_v35  ;;  %3488 = vmatmul.mubr.msk.f32.vlgmr.msra.gmra.mxu1 %vm174_vm0, %v455_v35 }
 0x2c8   :  { %459 = vst.msk [vmem:[#allocation3 + $0x38] sm:$0xff] %vm458_vm4, %v455_v35  ;;  %714 = vmatpush1.msra.mxu1 %v4156_v12  ;;  %761 = vmatprep.mubr.f32.mxu1 %v4054_v0 }
 0x2c9   :  { %715 = vmatprep.subr.mxu1 %v4158_v13 }
 0x2ca   :  { %716 = vmatpush1.msra.mxu1 %v4161_v15 }
 0x2cb   :  { %717 = vmatprep.subr.mxu1 %v4163_v16 }
 0x2cc   :  { %718 = vmatpush1.msra.mxu1 %v4166_v18 }
 0x2cd   :  { %719 = vmatprep.subr.mxu1 %v4169_v20 }
 0x2ce   :  { %720 = vmatpush1.msra.mxu1 %v4172_v22 }
 0x2cf   :  { %721 = vmatprep.subr.mxu1 %v4175_v24 }
 0x2d0   :  { %722 = vmatpush1.msra.mxu1 %v4178_v26 }
 0x2d1   :  { %723 = vmatprep.subr.mxu1 %v4181_v28 }
 0x2d2   :  { %724 = vmatpush1.msra.mxu1 %v4184_v29 }
 0x2d3   :  { %725 = vmatprep.subr.mxu1 %v4187_v30 }
 0x2d4   :  { %726 = vmatpush1.msra.mxu1 %v4191_v31 }
 0x2d5   :  { %727 = vmatprep.subr.mxu1 %v4195_v33 }
 0x2d6   :  { %728 = vmatpush1.msra.mxu1 %v4198_v34 }
 0x2d7   :  { %941 = vmatprep.subr.mxu1 %v4153_v10 }
 0x387   :  { %v535_v7 = vpop.f32.mrf.mxu1 }
 0x388   :  { %v540_v39 = vadd.f32 %v535_v7, %v464_v41 }
 0x389   :  { %v537_v44 = vpop.f32.mrf.mxu1 }
 0x38a   :  { %v541_v53 = vadd.f32 %v537_v44, %v465_v55  ;;  %v3489_v45 = vmul.f32 -1.442695, %v540_v39 }
 0x38c   :  { %3597 = vtanh.f32 %v541_v53  ;;  %v3490_v55 = vmul.f32 -1.442695, %v541_v53 }
 0x38d   :  { %3599 = vpow2.f32 %v3489_v45 }
 0x399   :  { %v3598_v58 = vpop.eup %3597 }
 0x39a   :  { %557 = vrot.lane.b32.xlu1 %v3598_v58, %s4055_s3  ;;  %v3600_v1 = vpop.eup %3599 }
 0x39b   :  { %v548_v47 = vadd.f32 1.0, %v3600_v1 }
 0x39d   :  { %3601 = vrcp.f32 %v548_v47 }
 0x3aa   :  { %v3602_v50 = vpop.eup %3601 }
 0x3ab   :  { %v555_v41 = vmul.f32 %v3602_v50, %v449_v61 }
 0x40c   :  { %v558_v63 = vpop.permute.xlu1 %557 }
 0x40d   :  { %v560_v14 = vmul.f32 %v3602_v50, %v558_v63 }
 0x40f   :  { %562 = vrot.lane.b32.xlu0 %v560_v14, %s4055_s3 }
 0x481   :  { %v563_v23 = vpop.permute.xlu0 %562 }
 0x482   :  { %v565_v35 = vadd.f32 %v563_v23, %v555_v41 }
 0x484   :  { %3603 = vtanh.f32 %v565_v35 }
 0x485   :  { %3605 = vpow2.f32 %v3490_v55 }
 0x491   :  { %v3604_v7 = vpop.eup %3603 }
 0x492   :  { %568 = vrot.lane.b32.xlu1 %v3604_v7, %s4055_s3  ;;  %v3606_v44 = vpop.eup %3605 }
 0x493   :  { %v549_v39 = vadd.f32 1.0, %v3606_v44 }
 0x495   :  { %3607 = vrcp.f32 %v549_v39 }
 0x4a2   :  { %v3608_v58 = vpop.eup %3607 }
 0x504   :  { %v569_v45 = vpop.permute.xlu1 %568 }
 0x505   :  { %v571_v1 = vmul.f32 %v3608_v58, %v569_v45 }
 0x507   :  { %572 = vst.msk [vmem:[#allocation3 + $0x8] sm:$0xff] %vm456_vm3, %v571_v1  ;;  %3491 = vmatmul.mubr.msk.f32.vlgmr.msra.gmra.mxu0 %vm174_vm0, %v571_v1 }
 0x508   :  { %573 = vst.msk [vmem:[#allocation3 + $0x30] sm:$0xff] %vm458_vm4, %v571_v1  ;;  %828 = vmatpush1.msra.mxu0 %v4156_v12  ;;  %875 = vmatprep.mubr.f32.mxu0 %v4054_v0 }
 0x509   :  { %829 = vmatprep.subr.mxu0 %v4158_v13 }
 0x50a   :  { %830 = vmatpush1.msra.mxu0 %v4161_v15 }
 0x50b   :  { %831 = vmatprep.subr.mxu0 %v4163_v16 }
 0x50c   :  { %832 = vmatpush1.msra.mxu0 %v4166_v18 }
 0x50d   :  { %833 = vmatprep.subr.mxu0 %v4169_v20 }
 0x50e   :  { %834 = vmatpush1.msra.mxu0 %v4172_v22 }
 0x50f   :  { %835 = vmatprep.subr.mxu0 %v4175_v24 }
 0x510   :  { %836 = vmatpush1.msra.mxu0 %v4178_v26 }
 0x511   :  { %837 = vmatprep.subr.mxu0 %v4181_v28 }
 0x512   :  { %838 = vmatpush1.msra.mxu0 %v4184_v29 }
 0x513   :  { %839 = vmatprep.subr.mxu0 %v4187_v30 }
 0x514   :  { %840 = vmatpush1.msra.mxu0 %v4191_v31 }
 0x515   :  { %841 = vmatprep.subr.mxu0 %v4195_v33 }
 0x516   :  { %842 = vmatpush1.msra.mxu0 %v4198_v34 }
 0x517   :  { %1055 = vmatprep.subr.mxu0 %v4153_v10 }
 0x5c7   :  { %v649_v61 = vpop.f32.mrf.mxu0 }
 0x5c8   :  { %v654_v53 = vadd.f32 %v649_v61, %v578_v27 }
 0x5c9   :  { %v651_v47 = vpop.f32.mrf.mxu0 }
 0x5ca   :  { %v655_v50 = vadd.f32 %v651_v47, %v579_v37  ;;  %v3492_v14 = vmul.f32 -1.442695, %v654_v53 }
 0x5cc   :  { %3609 = vtanh.f32 %v655_v50  ;;  %v3493_v37 = vmul.f32 -1.442695, %v655_v50 }
 0x5cd   :  { %3611 = vpow2.f32 %v3492_v14 }
 0x5d9   :  { %v3610_v63 = vpop.eup %3609 }
 0x5da   :  { %671 = vrot.lane.b32.xlu0 %v3610_v63, %s4055_s3  ;;  %v3612_v41 = vpop.eup %3611 }
 0x5db   :  { %v662_v23 = vadd.f32 1.0, %v3612_v41 }
 0x5dd   :  { %3613 = vrcp.f32 %v662_v23 }
 0x5ea   :  { %v3614_v7 = vpop.eup %3613 }
 0x5eb   :  { %v669_v27 = vmul.f32 %v3614_v7, %v565_v35 }
 0x64c   :  { %v672_v55 = vpop.permute.xlu0 %671 }
 0x64d   :  { %v674_v44 = vmul.f32 %v3614_v7, %v672_v55 }
 0x64f   :  { %676 = vrot.lane.b32.xlu1 %v674_v44, %s4055_s3 }
 0x6c1   :  { %v677_v39 = vpop.permute.xlu1 %676 }
 0x6c2   :  { %v679_v58 = vadd.f32 %v677_v39, %v669_v27 }
 0x6c4   :  { %3615 = vtanh.f32 %v679_v58 }
 0x6c5   :  { %3617 = vpow2.f32 %v3493_v37 }
 0x6d1   :  { %v3616_v45 = vpop.eup %3615 }
 0x6d2   :  { %682 = vrot.lane.b32.xlu0 %v3616_v45, %s4055_s3  ;;  %v3618_v1 = vpop.eup %3617 }
 0x6d3   :  { %v663_v61 = vadd.f32 1.0, %v3618_v1 }
 0x6d5   :  { %3619 = vrcp.f32 %v663_v61 }
 0x6e2   :  { %v3620_v53 = vpop.eup %3619 }
 0x744   :  { %v683_v47 = vpop.permute.xlu0 %682 }
 0x745   :  { %v685_v63 = vmul.f32 %v3620_v53, %v683_v47 }
 0x747   :  { %686 = vst.msk [vmem:[#allocation3 + $0x10] sm:$0xff] %vm456_vm3, %v685_v63  ;;  %3494 = vmatmul.mubr.msk.f32.vlgmr.msra.gmra.mxu1 %vm174_vm0, %v685_v63 }
 0x748   :  { %687 = vst.msk [vmem:[#allocation3 + $0x28] sm:$0xff] %vm458_vm4, %v685_v63  ;;  %942 = vmatpush1.msra.mxu1 %v4156_v12  ;;  %989 = vmatprep.mubr.f32.mxu1 %v4054_v0 }
 0x749   :  { %943 = vmatprep.subr.mxu1 %v4158_v13 }
 0x74a   :  { %944 = vmatpush1.msra.mxu1 %v4161_v15 }
 0x74b   :  { %945 = vmatprep.subr.mxu1 %v4163_v16 }
 0x74c   :  { %946 = vmatpush1.msra.mxu1 %v4166_v18 }
 0x74d   :  { %947 = vmatprep.subr.mxu1 %v4169_v20 }
 0x74e   :  { %948 = vmatpush1.msra.mxu1 %v4172_v22 }
 0x74f   :  { %949 = vmatprep.subr.mxu1 %v4175_v24 }
 0x750   :  { %950 = vmatpush1.msra.mxu1 %v4178_v26 }
 0x751   :  { %951 = vmatprep.subr.mxu1 %v4181_v28 }
 0x752   :  { %952 = vmatpush1.msra.mxu1 %v4184_v29 }
 0x753   :  { %953 = vmatprep.subr.mxu1 %v4187_v30 }
 0x754   :  { %954 = vmatpush1.msra.mxu1 %v4191_v31 }
 0x755   :  { %955 = vmatprep.subr.mxu1 %v4195_v33 }
 0x756   :  { %956 = vmatpush1.msra.mxu1 %v4198_v34 }
 0x757   :  { %1169 = vmatprep.subr.mxu1 %v4153_v10 }
 0x807   :  { %v763_v35 = vpop.f32.mrf.mxu1 }
 0x808   :  { %v768_v50 = vadd.f32 %v763_v35, %v692_v9 }
 0x809   :  { %v765_v14 = vpop.f32.mrf.mxu1 }
 0x80a   :  { %v769_v41 = vadd.f32 %v765_v14, %v693_v19  ;;  %v3495_v7 = vmul.f32 -1.442695, %v768_v50 }
 0x80c   :  { %3621 = vtanh.f32 %v769_v41  ;;  %v3496_v19 = vmul.f32 -1.442695, %v769_v41 }
 0x80d   :  { %3623 = vpow2.f32 %v3495_v7 }
 0x819   :  { %v3622_v23 = vpop.eup %3621 }
 0x81a   :  { %785 = vrot.lane.b32.xlu1 %v3622_v23, %s4055_s3  ;;  %v3624_v10 = vpop.eup %3623 }
 0x81b   :  { %v776_v55 = vadd.f32 1.0, %v3624_v10 }
 0x81d   :  { %3625 = vrcp.f32 %v776_v55 }
 0x82a   :  { %v3626_v44 = vpop.eup %3625 }
 0x82b   :  { %v783_v9 = vmul.f32 %v3626_v44, %v679_v58 }
 0x88c   :  { %v786_v27 = vpop.permute.xlu1 %785 }
 0x88d   :  { %v788_v39 = vmul.f32 %v3626_v44, %v786_v27 }
 0x88f   :  { %790 = vrot.lane.b32.xlu0 %v788_v39, %s4055_s3 }
 0x901   :  { %v791_v45 = vpop.permute.xlu0 %790 }
 0x902   :  { %v793_v37 = vadd.f32 %v791_v45, %v783_v9 }
 0x904   :  { %3627 = vtanh.f32 %v793_v37 }
 0x905   :  { %3629 = vpow2.f32 %v3496_v19 }
 0x911   :  { %v3628_v1 = vpop.eup %3627 }
 0x912   :  { %796 = vrot.lane.b32.xlu1 %v3628_v1, %s4055_s3  ;;  %v3630_v61 = vpop.eup %3629 }
 0x913   :  { %v777_v53 = vadd.f32 1.0, %v3630_v61 }
 0x915   :  { %3631 = vrcp.f32 %v777_v53 }
 0x922   :  { %v3632_v47 = vpop.eup %3631 }
 0x984   :  { %v797_v63 = vpop.permute.xlu1 %796 }
 0x985   :  { %v799_v35 = vmul.f32 %v3632_v47, %v797_v63 }
 0x987   :  { %800 = vst.msk [vmem:[#allocation3 + $0x18] sm:$0xff] %vm456_vm3, %v799_v35  ;;  %3497 = vmatmul.mubr.msk.f32.vlgmr.msra.gmra.mxu0 %vm174_vm0, %v799_v35 }
 0x988   :  { %801 = vst.msk [vmem:[#allocation3 + $0x20] sm:$0xff] %vm458_vm4, %v799_v35  ;;  %1056 = vmatpush1.msra.mxu0 %v4156_v12  ;;  %1103 = vmatprep.mubr.f32.mxu0 %v4054_v0 }
 0x989   :  { %1057 = vmatprep.subr.mxu0 %v4158_v13 }
 0x98a   :  { %1058 = vmatpush1.msra.mxu0 %v4161_v15 }
 0x98b   :  { %1059 = vmatprep.subr.mxu0 %v4163_v16 }
 0x98c   :  { %1060 = vmatpush1.msra.mxu0 %v4166_v18 }
 0x98d   :  { %1061 = vmatprep.subr.mxu0 %v4169_v20 }
 0x98e   :  { %1062 = vmatpush1.msra.mxu0 %v4172_v22 }
 0x98f   :  { %1063 = vmatprep.subr.mxu0 %v4175_v24 }
 0x990   :  { %1064 = vmatpush1.msra.mxu0 %v4178_v26 }
 0x991   :  { %1065 = vmatprep.subr.mxu0 %v4181_v28 }
 0x992   :  { %1066 = vmatpush1.msra.mxu0 %v4184_v29 }
 0x993   :  { %1067 = vmatprep.subr.mxu0 %v4187_v30 }
 0x994   :  { %1068 = vmatpush1.msra.mxu0 %v4191_v31 }
 0x995   :  { %1069 = vmatprep.subr.mxu0 %v4195_v33 }
 0x996   :  { %1070 = vmatpush1.msra.mxu0 %v4198_v34 }
 0xa47   :  { %v877_v58 = vpop.f32.mrf.mxu0 }
 0xa48   :  { %v882_v50 = vadd.f32 %v877_v58, %v806_v11 }
 0xa49   :  { %v879_v14 = vpop.f32.mrf.mxu0 }
 0xa4a   :  { %v883_v41 = vadd.f32 %v879_v14, %v807_v21  ;;  %v3498_v7 = vmul.f32 -1.442695, %v882_v50 }
 0xa4c   :  { %3633 = vtanh.f32 %v883_v41  ;;  %v3499_v8 = vmul.f32 -1.442695, %v883_v41 }
 0xa4d   :  { %3635 = vpow2.f32 %v3498_v7 }
 0xa59   :  { %v3634_v23 = vpop.eup %3633 }
 0xa5a   :  { %899 = vrot.lane.b32.xlu0 %v3634_v23, %s4055_s3  ;;  %v3636_v10 = vpop.eup %3635 }
 0xa5b   :  { %v890_v55 = vadd.f32 1.0, %v3636_v10 }
 0xa5d   :  { %3637 = vrcp.f32 %v890_v55 }
 0xa6a   :  { %v3638_v44 = vpop.eup %3637 }
 0xa6b   :  { %v897_v5 = vmul.f32 %v3638_v44, %v793_v37 }
 0xacc   :  { %v900_v27 = vpop.permute.xlu0 %899 }
 0xacd   :  { %v902_v62 = vmul.f32 %v3638_v44, %v900_v27 }
 0xacf   :  { %904 = vrot.lane.b32.xlu1 %v902_v62, %s4055_s3  ;;  %v5374_v62 = vsel %vm4274_vm1, %v4336_v52, %v4334_v49 }
 0xb41   :  { %v905_v11 = vpop.permute.xlu1 %904 }
 0xb42   :  { %v907_v39 = vadd.f32 %v905_v11, %v897_v5 }
 0xb44   :  { %3639 = vtanh.f32 %v907_v39 }
 0xb45   :  { %3641 = vpow2.f32 %v3499_v8 }
 0xb51   :  { %v3640_v2 = vpop.eup %3639 }
 0xb52   :  { %910 = vrot.lane.b32.xlu0 %v3640_v2, %s4055_s3  ;;  %v3642_v21 = vpop.eup %3641 }
 0xb53   :  { %v891_v9 = vadd.f32 1.0, %v3642_v21 }
 0xb55   :  { %3643 = vrcp.f32 %v891_v9 }
 0xb62   :  { %v3644_v45 = vpop.eup %3643 }
 0xbc4   :  { %v911_v1 = vpop.permute.xlu0 %910 }
 0xbc5   :  { %v913_v19 = vmul.f32 %v3644_v45, %v911_v1  ;;  %v1281_v1 = vld [vmem:[#allocation10 + $0x78] sm:$0xff] }
 0xbc6   :  { %1334 = vmatprep.subr.mxu0 %v1281_v1 }
 0xbc7   :  { %914 = vst.msk [vmem:[#allocation3 + $0x20] sm:$0xff] %vm456_vm3, %v913_v19  ;;  %3500 = vmatmul.mubr.msk.f32.vlgmr.msra.gmra.mxu1 %vm174_vm0, %v913_v19 }
 0xbc8   :  { %915 = vst.msk [vmem:[#allocation3 + $0x18] sm:$0xff] %vm458_vm4, %v913_v19  ;;  %1170 = vmatpush1.msra.mxu1 %v4156_v12  ;;  %1217 = vmatprep.mubr.f32.mxu1 %v4054_v0  ;;  %v1280_v19 = vld [vmem:[#allocation10 + $0x70] sm:$0xff] }
 0xbc9   :  { %1171 = vmatprep.subr.mxu1 %v4158_v13 }
 0xbca   :  { %1172 = vmatpush1.msra.mxu1 %v4161_v15 }
 0xbcb   :  { %1173 = vmatprep.subr.mxu1 %v4163_v16 }
 0xbcc   :  { %1174 = vmatpush1.msra.mxu1 %v4166_v18 }
 0xbcd   :  { %1175 = vmatprep.subr.mxu1 %v4169_v20 }
 0xbce   :  { %1176 = vmatpush1.msra.mxu1 %v4172_v22 }
 0xbcf   :  { %1177 = vmatprep.subr.mxu1 %v4175_v24 }
 0xbd0   :  { %1178 = vmatpush1.msra.mxu1 %v4178_v26 }
 0xbd1   :  { %1179 = vmatprep.subr.mxu1 %v4181_v28 }
 0xbd2   :  { %1180 = vmatpush1.msra.mxu1 %v4184_v29 }
 0xbd3   :  { %1181 = vmatprep.subr.mxu1 %v4187_v30 }
 0xbd4   :  { %1182 = vmatpush1.msra.mxu1 %v4191_v31 }
 0xbd5   :  { %1183 = vmatprep.subr.mxu1 %v4195_v33 }
 0xbd6   :  { %1184 = vmatpush1.msra.mxu1 %v4198_v34 }
 0xc87   :  { %v991_v12 = vpop.f32.mrf.mxu1 }
 0xc88   :  { %v996_v13 = vadd.f32 %v991_v12, %v920_v32  ;;  %v1276_v12 = vld [vmem:[#allocation10 + $0x50] sm:$0xff] }
 0xc89   :  { %v993_v15 = vpop.f32.mrf.mxu1 }
 0xc8a   :  { %v997_v16 = vadd.f32 %v993_v15, %v921_v38  ;;  %v3501_v20 = vmul.f32 -1.442695, %v996_v13 }
 0xc8c   :  { %3645 = vtanh.f32 %v997_v16  ;;  %v3502_v56 = vmul.f32 -1.442695, %v997_v16 }
 0xc8d   :  { %3647 = vpow2.f32 %v3501_v20  ;;  %v1274_v20 = vld [vmem:[#allocation10 + $0x40] sm:$0xff] }
 0xc99   :  { %v3646_v18 = vpop.eup %3645 }
 0xc9a   :  { %1013 = vrot.lane.b32.xlu1 %v3646_v18, %s4055_s3  ;;  %v3648_v22 = vpop.eup %3647  ;;  %v1275_v18 = vld [vmem:[#allocation10 + $0x48] sm:$0xff] }
 0xc9b   :  { %v1004_v24 = vadd.f32 1.0, %v3648_v22  ;;  %v1273_v22 = vld [vmem:[#allocation10 + $0x38] sm:$0xff] }
 0xc9d   :  { %3649 = vrcp.f32 %v1004_v24  ;;  %v1272_v24 = vld [vmem:[#allocation10 + $0x30] sm:$0xff] }
 0xcaa   :  { %v3650_v26 = vpop.eup %3649 }
 0xcab   :  { %v1011_v30 = vmul.f32 %v3650_v26, %v907_v39 }
 0xd0c   :  { %v1014_v28 = vpop.permute.xlu1 %1013 }
 0xd0d   :  { %v1016_v29 = vmul.f32 %v3650_v26, %v1014_v28  ;;  %v1271_v26 = vld [vmem:[#allocation10 + $0x28] sm:$0xff]  ;;  %v1270_v28 = vld [vmem:[#allocation10 + $0x20] sm:$0xff] }
 0xd0f   :  { %1018 = vrot.lane.b32.xlu0 %v1016_v29, %s4055_s3  ;;  %v1269_v29 = vld [vmem:[#allocation10 + $0x18] sm:$0xff] }
 0xd81   :  { %v1019_v31 = vpop.permute.xlu0 %1018 }
 0xd82   :  { %v1021_v33 = vadd.f32 %v1019_v31, %v1011_v30  ;;  %v1268_v30 = vld [vmem:[#allocation10 + $0x10] sm:$0xff]  ;;  %v1267_v31 = vld [vmem:[#allocation10 + $0x8] sm:$0xff] }
 0xd84   :  { %3651 = vtanh.f32 %v1021_v33 }
 0xd85   :  { %3653 = vpow2.f32 %v3502_v56  ;;  %v4569_v56 = vld [vmem:[#allocation12 + $0x78] sm:$0xff] }
 0xd86   :  { %1485 = vmatprep.subr.mxu1 %v4569_v56 }
 0xd91   :  { %v3652_v34 = vpop.eup %3651 }
 0xd92   :  { %1024 = vrot.lane.b32.xlu1 %v3652_v34, %s4055_s3  ;;  %v3654_v59 = vpop.eup %3653 }
 0xd93   :  { %v1005_v17 = vadd.f32 1.0, %v3654_v59  ;;  %v4571_v59 = vld [vmem:[#allocation12 + $0x70] sm:$0xff] }
 0xd95   :  { %3655 = vrcp.f32 %v1005_v17  ;;  %v4574_v17 = vld [vmem:[#allocation12 + $0x68] sm:$0xff] }
 0xda2   :  { %v3656_v25 = vpop.eup %3655 }
 0xe04   :  { %v1025_v32 = vpop.permute.xlu1 %1024 }
 0xe05   :  { %v1027_v38 = vmul.f32 %v3656_v25, %v1025_v32  ;;  %v4579_v25 = vld [vmem:[#allocation12 + $0x60] sm:$0xff]  ;;  %v4582_v32 = vld [vmem:[#allocation12 + $0x58] sm:$0xff] }
 0xe07   :  { %1028 = vst.msk [vmem:[#allocation3 + $0x28] sm:$0xff] %vm456_vm3, %v1027_v38  ;;  %3503 = vmatmul.mubr.msk.f32.vlgmr.msra.gmra.mxu0 %vm174_vm0, %v1027_v38 }
 0xe08   :  { %1029 = vst.msk [vmem:[#allocation3 + $0x10] sm:$0xff] %vm458_vm4, %v1027_v38  ;;  %1382 = vmatprep.mubr.f32.mxu0 %v4054_v0  ;;  %1335 = vmatpush1.msra.mxu0 %v1280_v19  ;;  %v4584_v38 = vld [vmem:[#allocation12 + $0x50] sm:$0xff] }
 0xe09   :  { %1336 = vmatprep.subr.mxu0 %v1279_v60 }
 0xe0a   :  { %1337 = vmatpush1.msra.mxu0 %v1278_v48 }
 0xec7   :  { %v1105_v37 = vpop.f32.mrf.mxu0 }
 0xec8   :  { %v1110_v61 = vadd.f32 %v1105_v37, %v1034_v42  ;;  %v4587_v37 = vld [vmem:[#allocation12 + $0x48] sm:$0xff] }
 0xec9   :  { %v1107_v53 = vpop.f32.mrf.mxu0 }
 0xeca   :  { %v1111_v47 = vadd.f32 %v1107_v53, %v1035_v57  ;;  %v3504_v35 = vmul.f32 -1.442695, %v1110_v61  ;;  %v4591_v61 = vld [vmem:[#allocation12 + $0x40] sm:$0xff]  ;;  %v4594_v53 = vld [vmem:[#allocation12 + $0x38] sm:$0xff] }
 0xecc   :  { %3657 = vtanh.f32 %v1111_v47  ;;  %v3505_v40 = vmul.f32 -1.442695, %v1111_v47  ;;  %v4596_v47 = vld [vmem:[#allocation12 + $0x30] sm:$0xff] }
 0xecd   :  { %3659 = vpow2.f32 %v3504_v35  ;;  %v4603_v35 = vld [vmem:[#allocation12 + $0x20] sm:$0xff] }
 0xed9   :  { %v3658_v63 = vpop.eup %3657 }
 0xeda   :  { %1127 = vrot.lane.b32.xlu0 %v3658_v63, %s4055_s3  ;;  %v3660_v58 = vpop.eup %3659  ;;  %v4599_v63 = vld [vmem:[#allocation12 + $0x28] sm:$0xff] }
 0xedb   :  { %v1118_v50 = vadd.f32 1.0, %v3660_v58  ;;  %v4606_v58 = vld [vmem:[#allocation12 + $0x18] sm:$0xff] }
 0xedd   :  { %3661 = vrcp.f32 %v1118_v50  ;;  %v4608_v50 = vld [vmem:[#allocation12 + $0x10] sm:$0xff] }
 0xeea   :  { %v3662_v14 = vpop.eup %3661 }
 0xeeb   :  { %v1125_v36 = vmul.f32 %v3662_v14, %v1021_v33  ;;  %v1266_v33 = vld [vmem:[#allocation10] sm:$0xff] }
 0xf4c   :  { %v1128_v41 = vpop.permute.xlu0 %1127 }
 0xf4d   :  { %v1130_v51 = vmul.f32 %v3662_v14, %v1128_v41  ;;  %v4611_v14 = vld [vmem:[#allocation12 + $0x8] sm:$0xff]  ;;  %v4615_v41 = vld [vmem:[#allocation12] sm:$0xff] }
 0xf4f   :  { %1132 = vrot.lane.b32.xlu1 %v1130_v51, %s4055_s3 }
 0xfc1   :  { %v1133_v42 = vpop.permute.xlu1 %1132 }
 0xfc2   :  { %v1135_v23 = vadd.f32 %v1133_v42, %v1125_v36 }
 0xfc4   :  { %3663 = vtanh.f32 %v1135_v23 }
 0xfc5   :  { %3665 = vpow2.f32 %v3505_v40 }
 0xfd1   :  { %v3664_v54 = vpop.eup %3663 }
 0xfd2   :  { %1138 = vrot.lane.b32.xlu0 %v3664_v54, %s4055_s3  ;;  %v3666_v57 = vpop.eup %3665 }
 0xfd3   :  { %v1119_v7 = vadd.f32 1.0, %v3666_v57 }
 0xfd5   :  { %3667 = vrcp.f32 %v1119_v7 }
 0xfe2   :  { %v3668_v10 = vpop.eup %3667 }
0x1044   :  { %v1139_v55 = vpop.permute.xlu0 %1138 }
0x1045   :  { %v1141_v44 = vmul.f32 %v3668_v10, %v1139_v55  ;;  %v1260_v10 = vld [vmem:[#allocation3 + $0x10] sm:$0xff]  ;;  %v1261_v55 = vld [vmem:[#allocation3 + $0x18] sm:$0xff] }
0x1047   :  { %1142 = vst.msk [vmem:[#allocation3 + $0x30] sm:$0xff] %vm456_vm3, %v1141_v44  ;;  %3506 = vmatmul.mubr.msk.f32.vlgmr.msra.gmra.mxu1 %vm174_vm0, %v1141_v44 }
0x1048   :  { %1143 = vst.msk [vmem:[#allocation3 + $0x8] sm:$0xff] %vm458_vm4, %v1141_v44  ;;  %1533 = vmatprep.mubr.f32.mxu1 %v4054_v0  ;;  %1486 = vmatpush1.msra.mxu1 %v4571_v59  ;;  %v1262_v44 = vld [vmem:[#allocation3 + $0x20] sm:$0xff] }
0x1049   :  { %1487 = vmatprep.subr.mxu1 %v4574_v17 }
0x104a   :  { %1488 = vmatpush1.msra.mxu1 %v4579_v25 }
0x104b   :  { %1489 = vmatprep.subr.mxu1 %v4582_v32 }
0x104c   :  { %1490 = vmatpush1.msra.mxu1 %v4584_v38 }
0x104d   :  { %1491 = vmatprep.subr.mxu1 %v4587_v37 }
0x104e   :  { %1492 = vmatpush1.msra.mxu1 %v4591_v61 }
0x104f   :  { %1493 = vmatprep.subr.mxu1 %v4594_v53  ;;  %v1259_v7 = vld [vmem:[#allocation3 + $0x8] sm:$0xff] }
0x1050   :  { %1494 = vmatpush1.msra.mxu1 %v4596_v47 }
0x1051   :  { %1495 = vmatprep.subr.mxu1 %v4599_v63 }
0x1052   :  { %1496 = vmatpush1.msra.mxu1 %v4603_v35 }
0x1053   :  { %1497 = vmatprep.subr.mxu1 %v4606_v58 }
0x1054   :  { %1498 = vmatpush1.msra.mxu1 %v4608_v50 }
0x1055   :  { %1499 = vmatprep.subr.mxu1 %v4611_v14 }
0x1056   :  { %1500 = vmatpush1.msra.mxu1 %v4615_v41 }
0x1057   :  { %1534 = vmatmul.mubr.f32.vlgmr.msra.gmra.mxu1 %v4054_v0  ;;  %1599 = vmatprep.subr.mxu1 %v4569_v56 }
0x1058   :  { %1600 = vmatpush1.msra.mxu1 %v4571_v59  ;;  %1647 = vmatprep.mubr.f32.mxu1 %v4054_v0 }
0x1059   :  { %1601 = vmatprep.subr.mxu1 %v4574_v17 }
0x105a   :  { %1602 = vmatpush1.msra.mxu1 %v4579_v25 }
0x105b   :  { %1603 = vmatprep.subr.mxu1 %v4582_v32 }
0x105c   :  { %1604 = vmatpush1.msra.mxu1 %v4584_v38 }
0x105d   :  { %1605 = vmatprep.subr.mxu1 %v4587_v37 }
0x105e   :  { %1606 = vmatpush1.msra.mxu1 %v4591_v61 }
0x105f   :  { %1607 = vmatprep.subr.mxu1 %v4594_v53 }
0x1060   :  { %1608 = vmatpush1.msra.mxu1 %v4596_v47 }
0x1061   :  { %1609 = vmatprep.subr.mxu1 %v4599_v63 }
0x1062   :  { %1610 = vmatpush1.msra.mxu1 %v4603_v35 }
0x1063   :  { %1611 = vmatprep.subr.mxu1 %v4606_v58 }
0x1064   :  { %1612 = vmatpush1.msra.mxu1 %v4608_v50 }
0x1065   :  { %1613 = vmatprep.subr.mxu1 %v4611_v14 }
0x1066   :  { %1614 = vmatpush1.msra.mxu1 %v4615_v41 }
0x1067   :  { %1827 = vmatprep.subr.mxu1 %v4569_v56 }
0x1107   :  { %v1219_v27 = vpop.f32.mrf.mxu1 }
0x1108   :  { %v1224_v5 = vadd.f32 %v1219_v27, %v5374_v62  ;;  %v1263_v27 = vld [vmem:[#allocation3 + $0x28] sm:$0xff]  ;;  %v1264_v62 = vld [vmem:[#allocation3 + $0x30] sm:$0xff] }
0x1109   :  { %v1221_v11 = vpop.f32.mrf.mxu1 }
0x110a   :  { %v4563_v39 = vadd.f32 %v1221_v11, %v1149_v4  ;;  %v3507_v8 = vmul.f32 -1.442695, %v1224_v5  ;;  %v1277_v4 = vld [vmem:[#allocation10 + $0x58] sm:$0xff]  ;;  %v1282_v11 = vld [vmem:[%s5365_s6] sm:$0x3] }
0x110b   :  { %1338 = vmatprep.subr.mxu0 %v1277_v4 }
0x110c   :  { %3669 = vtanh.f32 %v4563_v39  ;;  %1339 = vmatpush1.msra.mxu0 %v1276_v12  ;;  %v3508_v51 = vmul.f32 -1.442695, %v4563_v39 }
0x110d   :  { %3671 = vpow2.f32 %v3507_v8  ;;  %1340 = vmatprep.subr.mxu0 %v1275_v18  ;;  %v1287_v8 = vrot.slane %v1282_v11, %v4253_v43 }
0x110e   :  { %1341 = vmatpush1.msra.mxu0 %v1274_v20 }
0x110f   :  { %1342 = vmatprep.subr.mxu0 %v1273_v22 }
0x1110   :  { %1343 = vmatpush1.msra.mxu0 %v1272_v24 }
0x1111   :  { %1344 = vmatprep.subr.mxu0 %v1271_v26 }
0x1112   :  { %1345 = vmatpush1.msra.mxu0 %v1270_v28 }
0x1113   :  { %1346 = vmatprep.subr.mxu0 %v1269_v29 }
0x1114   :  { %1347 = vmatpush1.msra.mxu0 %v1268_v30 }
0x1115   :  { %1348 = vmatprep.subr.mxu0 %v1267_v31 }
0x1116   :  { %1349 = vmatpush1.msra.mxu0 %v1266_v33 }
0x1117   :  { %1713 = vmatprep.subr.mxu0 %v4569_v56 }
0x1119   :  { %v3670_v2 = vpop.eup %3669 }
0x111a   :  { %1241 = vrot.lane.b32.xlu1 %v3670_v2, %s4055_s3  ;;  %v3672_v21 = vpop.eup %3671 }
0x111b   :  { %v1232_v9 = vadd.f32 1.0, %v3672_v21 }
0x111d   :  { %3673 = vrcp.f32 %v1232_v9  ;;  %v1291_v9 = vrot.slane %v1282_v11, %v4258_v46 }
0x112a   :  { %v3674_v49 = vpop.eup %3673 }
0x112b   :  { %v1239_v13 = vmul.f32 %v3674_v49, %v1135_v23 }
0x118c   :  { %v1242_v52 = vpop.permute.xlu1 %1241 }
0x118d   :  { %v1244_v45 = vmul.f32 %v3674_v49, %v1242_v52 }
0x118f   :  { %1246 = vrot.lane.b32.xlu0 %v1244_v45, %s4055_s3 }
0x1201   :  { %v1247_v15 = vpop.permute.xlu0 %1246 }
0x1202   :  { %v1249_v16 = vadd.f32 %v1247_v15, %v1239_v13 }
0x1204   :  { %3675 = vtanh.f32 %v1249_v16 }
0x1205   :  { %3677 = vpow2.f32 %v3508_v51 }
0x1211   :  { %v3676_v34 = vpop.eup %3675 }
0x1212   :  { %1252 = vrot.lane.b32.xlu1 %v3676_v34, %s4055_s3  ;;  %v3678_v36 = vpop.eup %3677 }
0x1213   :  { %v1233_v42 = vadd.f32 1.0, %v3678_v36 }
0x1215   :  { %3679 = vrcp.f32 %v1233_v42 }
0x1222   :  { %v3680_v23 = vpop.eup %3679 }
0x1284   :  { %v1253_v54 = vpop.permute.xlu1 %1252 }
0x1285   :  { %v1255_v40 = vmul.f32 %v3680_v23, %v1253_v54 }
0x1287   :  { %1256 = vst.msk [vmem:[#allocation3 + $0x38] sm:$0xff] %vm456_vm3, %v1255_v40 }
0x1288   :  { %1257 = vst.msk [vmem:[#allocation3] sm:$0xff] %vm458_vm4, %v1255_v40 }
0x128e   :  { %v1265_v5 = vld [vmem:[#allocation3 + $0x38] sm:$0xff] }
0x128f   :  { %v1258_v57 = vld [vmem:[#allocation3] sm:$0xff] }
0x1290   :  { %3509 = vmatmul.mubr.msk.f32.vlgmr.msra.gmra.mxu0 %vm174_vm0, %v1258_v57 }
0x1291   :  { %1388 = vmatprep.mubr.f32.mxu0 %v4054_v0  ;;  %1714 = vmatpush1.msra.mxu0 %v4571_v59 }
0x1292   :  { %1715 = vmatprep.subr.mxu0 %v4574_v17 }
0x1293   :  { %1716 = vmatpush1.msra.mxu0 %v4579_v25 }
0x1294   :  { %3510 = vmatmul.mubr.msk.f32.gmra.mxu0 %vm174_vm0, %v1259_v7  ;;  %1717 = vmatprep.subr.mxu0 %v4582_v32 }
0x1295   :  { %1394 = vmatprep.mubr.f32.mxu0 %v4054_v0  ;;  %1718 = vmatpush1.msra.mxu0 %v4584_v38 }
0x1296   :  { %1719 = vmatprep.subr.mxu0 %v4587_v37 }
0x1297   :  { %1720 = vmatpush1.msra.mxu0 %v4591_v61 }
0x1298   :  { %3511 = vmatmul.mubr.msk.f32.gmra.mxu0 %vm174_vm0, %v1260_v10  ;;  %1721 = vmatprep.subr.mxu0 %v4594_v53 }
0x1299   :  { %1400 = vmatprep.mubr.f32.mxu0 %v4054_v0  ;;  %1722 = vmatpush1.msra.mxu0 %v4596_v47 }
0x129a   :  { %1723 = vmatprep.subr.mxu0 %v4599_v63 }
0x129b   :  { %1724 = vmatpush1.msra.mxu0 %v4603_v35 }
0x129c   :  { %3512 = vmatmul.mubr.msk.f32.gmra.mxu0 %vm174_vm0, %v1261_v55  ;;  %1725 = vmatprep.subr.mxu0 %v4606_v58 }
0x129d   :  { %1406 = vmatprep.mubr.f32.mxu0 %v4054_v0  ;;  %1726 = vmatpush1.msra.mxu0 %v4608_v50 }
0x129e   :  { %1727 = vmatprep.subr.mxu0 %v4611_v14 }
0x129f   :  { %1728 = vmatpush1.msra.mxu0 %v4615_v41 }
0x12a0   :  { %3513 = vmatmul.mubr.msk.f32.gmra.mxu0 %vm174_vm0, %v1262_v44  ;;  %1941 = vmatprep.subr.mxu0 %v4569_v56 }
0x12a1   :  { %1412 = vmatprep.mubr.f32.mxu0 %v4054_v0 }
0x12a4   :  { %3514 = vmatmul.mubr.msk.f32.gmra.mxu0 %vm174_vm0, %v1263_v27 }
0x12a5   :  { %1418 = vmatprep.mubr.f32.mxu0 %v4054_v0 }
0x12a8   :  { %3515 = vmatmul.mubr.msk.f32.gmra.mxu0 %vm174_vm0, %v1264_v62 }
0x12a9   :  { %1424 = vmatprep.mubr.f32.mxu0 %v4054_v0 }
0x12ac   :  { %3516 = vmatmul.mubr.msk.f32.gmra.mxu0 %vm174_vm0, %v1265_v5  ;;  %v1535_v5 = vpop.f32.mrf.mxu1 }
0x12ad   :  { %1761 = vmatprep.mubr.f32.mxu0 %v4054_v0 }
0x1350   :  { %v1384_v39 = vpop.f32.mrf.mxu0 }
0x1351   :  { %v4741_v27 = vadd.f32 %v1384_v39, %v1287_v8 }
0x1352   :  { %v1386_v2 = vpop.f32.mrf.mxu0 }
0x1354   :  { %v1390_v21 = vpop.f32.mrf.mxu0 }
0x1355   :  { %v4677_v49 = vadd.f32 %v1390_v21, %v1287_v8 }
0x1356   :  { %v1392_v52 = vpop.f32.mrf.mxu0 }
0x1357   :  { %v4679_v45 = vadd.f32 %v1392_v52, %v1291_v9 }
0x1358   :  { %v1396_v1 = vpop.f32.mrf.mxu0 }
0x1359   :  { %v4681_v19 = vadd.f32 %v1396_v1, %v1287_v8  ;;  %v4753_v1 = vadd.f32 %v1386_v2, %v1291_v9 }
0x135a   :  { %v1398_v60 = vpop.f32.mrf.mxu0 }
0x135b   :  { %v4683_v48 = vadd.f32 %v1398_v60, %v1291_v9 }
0x135c   :  { %v1402_v4 = vpop.f32.mrf.mxu0 }
0x135d   :  { %v4685_v12 = vadd.f32 %v1402_v4, %v1287_v8 }
0x135e   :  { %v1404_v13 = vpop.f32.mrf.mxu0 }
0x135f   :  { %v4687_v15 = vadd.f32 %v1404_v13, %v1291_v9  ;;  %v1537_v13 = vpop.f32.mrf.mxu1 }
0x1360   :  { %v1408_v16 = vpop.f32.mrf.mxu0 }
0x1361   :  { %v4689_v18 = vadd.f32 %v1408_v16, %v1287_v8 }
0x1362   :  { %v1410_v20 = vpop.f32.mrf.mxu0 }
0x1363   :  { %v4691_v22 = vadd.f32 %v1410_v20, %v1291_v9  ;;  %v1806_v24 = vsel %vm4274_vm1, %v4685_v12, %v4689_v18  ;;  %v1920_v26 = vsel %vm4274_vm1, %v4689_v18, %v4685_v12 }
0x1364   :  { %v1414_v28 = vpop.f32.mrf.mxu0 }
0x1365   :  { %v4701_v29 = vadd.f32 %v1414_v28, %v1287_v8  ;;  %v1807_v30 = vsel %vm4280_vm2, %v4687_v15, %v4691_v22  ;;  %v1921_v31 = vsel %vm4280_vm2, %v4691_v22, %v4687_v15 }
0x1366   :  { %v1416_v33 = vpop.f32.mrf.mxu0 }
0x1367   :  { %v4711_v34 = vadd.f32 %v1416_v33, %v1291_v9  ;;  %v1692_v51 = vsel %vm4274_vm1, %v4681_v19, %v4701_v29  ;;  %v2034_v36 = vsel %vm4274_vm1, %v4701_v29, %v4681_v19 }
0x1368   :  { %v1420_v42 = vpop.f32.mrf.mxu0 }
0x1369   :  { %v4721_v23 = vadd.f32 %v1420_v42, %v1287_v8  ;;  %v1693_v54 = vsel %vm4280_vm2, %v4683_v48, %v4711_v34  ;;  %v2035_v40 = vsel %vm4280_vm2, %v4711_v34, %v4683_v48 }
0x136a   :  { %v1422_v57 = vpop.f32.mrf.mxu0 }
0x136b   :  { %v4731_v7 = vadd.f32 %v1422_v57, %v1291_v9  ;;  %v1578_v10 = vsel %vm4274_vm1, %v4677_v49, %v4721_v23 }
0x136c   :  { %v1426_v44 = vpop.f32.mrf.mxu0 }
0x136d   :  { %v4743_v62 = vadd.f32 %v1426_v44, %v1287_v8  ;;  %v1579_v11 = vsel %vm4280_vm2, %v4679_v45, %v4731_v7 }
0x136e   :  { %v1428_v52 = vpop.f32.mrf.mxu0 }
0x136f   :  { %v1467_v39 = vsel %vm4274_vm1, %v4741_v27, %v4743_v62  ;;  %v4759_v8 = vadd.f32 %v1428_v52, %v1291_v9 }
0x1370   :  { %v1540_v20 = vadd.f32 %v1535_v5, %v1467_v39 }
0x1371   :  { %v1468_v4 = vsel %vm4280_vm2, %v4753_v1, %v4759_v8  ;;  %v2263_v2 = vsel %vm4280_vm2, %v4759_v8, %v4753_v1  ;;  %v2393_v1 = vld [vmem:[#allocation13 + $0x68] sm:$0xff]  ;;  %v2392_v8 = vld [vmem:[#allocation13 + $0x60] sm:$0xff] }
0x1372   :  { %v1541_v16 = vadd.f32 %v1537_v13, %v1468_v4  ;;  %v3517_v28 = vmul.f32 -1.442695, %v1540_v20 }
0x1374   :  { %3681 = vtanh.f32 %v1541_v16  ;;  %v3518_v13 = vmul.f32 -1.442695, %v1541_v16 }
0x1375   :  { %3683 = vpow2.f32 %v3517_v28 }
0x1381   :  { %v3682_v9 = vpop.eup %3681 }
0x1382   :  { %1557 = vrot.lane.b32.xlu0 %v3682_v9, %s4055_s3  ;;  %v3684_v33 = vpop.eup %3683 }
0x1383   :  { %v1548_v42 = vadd.f32 1.0, %v3684_v33 }
0x1385   :  { %3685 = vrcp.f32 %v1548_v42 }
0x1392   :  { %v3686_v57 = vpop.eup %3685 }
0x1393   :  { %v1555_v60 = vmul.f32 0.0, %v3686_v57 }
0x13f4   :  { %v1558_v44 = vpop.permute.xlu0 %1557 }
0x13f5   :  { %v1560_v52 = vmul.f32 %v3686_v57, %v1558_v44 }
0x13f7   :  { %1562 = vrot.lane.b32.xlu1 %v1560_v52, %s4055_s3 }
0x1469   :  { %v1563_v21 = vpop.permute.xlu1 %1562 }
0x146a   :  { %v1565_v55 = vadd.f32 %v1563_v21, %v1555_v60 }
0x146c   :  { %3687 = vtanh.f32 %v1565_v55 }
0x146d   :  { %3689 = vpow2.f32 %v3518_v13 }
0x1479   :  { %v3688_v4 = vpop.eup %3687 }
0x147a   :  { %1568 = vrot.lane.b32.xlu0 %v3688_v4, %s4055_s3  ;;  %v3690_v5 = vpop.eup %3689 }
0x147b   :  { %v1549_v39 = vadd.f32 1.0, %v3690_v5 }
0x147d   :  { %3691 = vrcp.f32 %v1549_v39 }
0x148a   :  { %v3692_v9 = vpop.eup %3691 }
0x14ec   :  { %v1569_v20 = vpop.permute.xlu0 %1568 }
0x14ed   :  { %v1571_v28 = vmul.f32 %v3692_v9, %v1569_v20 }
0x14ef   :  { %1572 = vst.msk [vmem:[#allocation3] sm:$0xff] %vm456_vm3, %v1571_v28  ;;  %3519 = vmatmul.mubr.msk.f32.vlgmr.msra.gmra.mxu1 %vm174_vm0, %v1571_v28 }
0x14f0   :  { %1573 = vst.msk [vmem:[#allocation3 + $0x38] sm:$0xff] %vm458_vm4, %v1571_v28  ;;  %1828 = vmatpush1.msra.mxu1 %v4571_v59  ;;  %1875 = vmatprep.mubr.f32.mxu1 %v4054_v0 }
0x14f1   :  { %1829 = vmatprep.subr.mxu1 %v4574_v17 }
0x14f2   :  { %1830 = vmatpush1.msra.mxu1 %v4579_v25 }
0x14f3   :  { %1831 = vmatprep.subr.mxu1 %v4582_v32 }
0x14f4   :  { %1832 = vmatpush1.msra.mxu1 %v4584_v38 }
0x14f5   :  { %1833 = vmatprep.subr.mxu1 %v4587_v37 }
0x14f6   :  { %1834 = vmatpush1.msra.mxu1 %v4591_v61 }
0x14f7   :  { %1835 = vmatprep.subr.mxu1 %v4594_v53 }
0x14f8   :  { %1836 = vmatpush1.msra.mxu1 %v4596_v47 }
0x14f9   :  { %1837 = vmatprep.subr.mxu1 %v4599_v63 }
0x14fa   :  { %1838 = vmatpush1.msra.mxu1 %v4603_v35 }
0x14fb   :  { %1839 = vmatprep.subr.mxu1 %v4606_v58 }
0x14fc   :  { %1840 = vmatpush1.msra.mxu1 %v4608_v50 }
0x14fd   :  { %1841 = vmatprep.subr.mxu1 %v4611_v14 }
0x14fe   :  { %1842 = vmatpush1.msra.mxu1 %v4615_v41 }
0x14ff   :  { %2055 = vmatprep.subr.mxu1 %v4569_v56 }
0x15af   :  { %v1649_v21 = vpop.f32.mrf.mxu1 }
0x15b0   :  { %v1654_v60 = vadd.f32 %v1649_v21, %v1578_v10 }
0x15b1   :  { %v1651_v16 = vpop.f32.mrf.mxu1 }
0x15b2   :  { %v1655_v33 = vadd.f32 %v1651_v16, %v1579_v11  ;;  %v3520_v57 = vmul.f32 -1.442695, %v1654_v60 }
0x15b4   :  { %3693 = vtanh.f32 %v1655_v33  ;;  %v3521_v11 = vmul.f32 -1.442695, %v1655_v33 }
0x15b5   :  { %3695 = vpow2.f32 %v3520_v57 }
0x15c1   :  { %v3694_v42 = vpop.eup %3693 }
0x15c2   :  { %1671 = vrot.lane.b32.xlu1 %v3694_v42, %s4055_s3  ;;  %v3696_v44 = vpop.eup %3695 }
0x15c3   :  { %v1662_v52 = vadd.f32 1.0, %v3696_v44 }
0x15c5   :  { %3697 = vrcp.f32 %v1662_v52 }
0x15d2   :  { %v3698_v4 = vpop.eup %3697 }
0x15d3   :  { %v1669_v39 = vmul.f32 %v3698_v4, %v1565_v55 }
0x1634   :  { %v1672_v13 = vpop.permute.xlu1 %1671 }
0x1635   :  { %v1674_v5 = vmul.f32 %v3698_v4, %v1672_v13 }
0x1637   :  { %1676 = vrot.lane.b32.xlu0 %v1674_v5, %s4055_s3 }
0x16a9   :  { %v1677_v9 = vpop.permute.xlu0 %1676 }
0x16aa   :  { %v1679_v20 = vadd.f32 %v1677_v9, %v1669_v39 }
0x16ac   :  { %3699 = vtanh.f32 %v1679_v20 }
0x16ad   :  { %3701 = vpow2.f32 %v3521_v11 }
0x16b9   :  { %v3700_v10 = vpop.eup %3699 }
0x16ba   :  { %1682 = vrot.lane.b32.xlu1 %v3700_v10, %s4055_s3  ;;  %v3702_v28 = vpop.eup %3701 }
0x16bb   :  { %v1663_v21 = vadd.f32 1.0, %v3702_v28 }
0x16bd   :  { %3703 = vrcp.f32 %v1663_v21 }
0x16ca   :  { %v3704_v60 = vpop.eup %3703 }
0x172c   :  { %v1683_v16 = vpop.permute.xlu1 %1682 }
0x172d   :  { %v1685_v42 = vmul.f32 %v3704_v60, %v1683_v16 }
0x172f   :  { %1686 = vst.msk [vmem:[#allocation3 + $0x8] sm:$0xff] %vm456_vm3, %v1685_v42  ;;  %3522 = vmatmul.mubr.msk.f32.vlgmr.msra.gmra.mxu0 %vm174_vm0, %v1685_v42 }
0x1730   :  { %1687 = vst.msk [vmem:[#allocation3 + $0x30] sm:$0xff] %vm458_vm4, %v1685_v42  ;;  %1942 = vmatpush1.msra.mxu0 %v4571_v59  ;;  %1989 = vmatprep.mubr.f32.mxu0 %v4054_v0 }
0x1731   :  { %1943 = vmatprep.subr.mxu0 %v4574_v17 }
0x1732   :  { %1944 = vmatpush1.msra.mxu0 %v4579_v25 }
0x1733   :  { %1945 = vmatprep.subr.mxu0 %v4582_v32 }
0x1734   :  { %1946 = vmatpush1.msra.mxu0 %v4584_v38 }
0x1735   :  { %1947 = vmatprep.subr.mxu0 %v4587_v37 }
0x1736   :  { %1948 = vmatpush1.msra.mxu0 %v4591_v61 }
0x1737   :  { %1949 = vmatprep.subr.mxu0 %v4594_v53 }
0x1738   :  { %1950 = vmatpush1.msra.mxu0 %v4596_v47 }
0x1739   :  { %1951 = vmatprep.subr.mxu0 %v4599_v63 }
0x173a   :  { %1952 = vmatpush1.msra.mxu0 %v4603_v35 }
0x173b   :  { %1953 = vmatprep.subr.mxu0 %v4606_v58 }
0x173c   :  { %1954 = vmatpush1.msra.mxu0 %v4608_v50 }
0x173d   :  { %1955 = vmatprep.subr.mxu0 %v4611_v14 }
0x173e   :  { %1956 = vmatpush1.msra.mxu0 %v4615_v41 }
0x173f   :  { %2169 = vmatprep.subr.mxu0 %v4569_v56 }
0x17ef   :  { %v1763_v55 = vpop.f32.mrf.mxu0 }
0x17f0   :  { %v1768_v33 = vadd.f32 %v1763_v55, %v1692_v51 }
0x17f1   :  { %v1765_v57 = vpop.f32.mrf.mxu0 }
0x17f2   :  { %v1769_v44 = vadd.f32 %v1765_v57, %v1693_v54  ;;  %v3523_v4 = vmul.f32 -1.442695, %v1768_v33 }
0x17f4   :  { %3705 = vtanh.f32 %v1769_v44  ;;  %v3524_v54 = vmul.f32 -1.442695, %v1769_v44 }
0x17f5   :  { %3707 = vpow2.f32 %v3523_v4 }
0x1801   :  { %v3706_v52 = vpop.eup %3705 }
0x1802   :  { %1785 = vrot.lane.b32.xlu0 %v3706_v52, %s4055_s3  ;;  %v3708_v13 = vpop.eup %3707 }
0x1803   :  { %v1776_v5 = vadd.f32 1.0, %v3708_v13 }
0x1805   :  { %3709 = vrcp.f32 %v1776_v5 }
0x1812   :  { %v3710_v39 = vpop.eup %3709 }
0x1813   :  { %v1783_v51 = vmul.f32 %v3710_v39, %v1679_v20 }
0x1874   :  { %v1786_v9 = vpop.permute.xlu0 %1785 }
0x1875   :  { %v1788_v10 = vmul.f32 %v3710_v39, %v1786_v9 }
0x1877   :  { %1790 = vrot.lane.b32.xlu1 %v1788_v10, %s4055_s3 }
0x18e9   :  { %v1791_v11 = vpop.permute.xlu1 %1790 }
0x18ea   :  { %v1793_v28 = vadd.f32 %v1791_v11, %v1783_v51 }
0x18ec   :  { %3711 = vtanh.f32 %v1793_v28 }
0x18ed   :  { %3713 = vpow2.f32 %v3524_v54 }
0x18f9   :  { %v3712_v21 = vpop.eup %3711 }
0x18fa   :  { %1796 = vrot.lane.b32.xlu0 %v3712_v21, %s4055_s3  ;;  %v3714_v60 = vpop.eup %3713 }
0x18fb   :  { %v1777_v16 = vadd.f32 1.0, %v3714_v60 }
0x18fd   :  { %3715 = vrcp.f32 %v1777_v16 }
0x190a   :  { %v3716_v42 = vpop.eup %3715 }
0x196c   :  { %v1797_v55 = vpop.permute.xlu0 %1796 }
0x196d   :  { %v1799_v33 = vmul.f32 %v3716_v42, %v1797_v55 }
0x196f   :  { %1800 = vst.msk [vmem:[#allocation3 + $0x10] sm:$0xff] %vm456_vm3, %v1799_v33  ;;  %3525 = vmatmul.mubr.msk.f32.vlgmr.msra.gmra.mxu1 %vm174_vm0, %v1799_v33 }
0x1970   :  { %1801 = vst.msk [vmem:[#allocation3 + $0x28] sm:$0xff] %vm458_vm4, %v1799_v33  ;;  %2056 = vmatpush1.msra.mxu1 %v4571_v59  ;;  %2103 = vmatprep.mubr.f32.mxu1 %v4054_v0 }
0x1971   :  { %2057 = vmatprep.subr.mxu1 %v4574_v17 }
0x1972   :  { %2058 = vmatpush1.msra.mxu1 %v4579_v25 }
0x1973   :  { %2059 = vmatprep.subr.mxu1 %v4582_v32 }
0x1974   :  { %2060 = vmatpush1.msra.mxu1 %v4584_v38 }
0x1975   :  { %2061 = vmatprep.subr.mxu1 %v4587_v37 }
0x1976   :  { %2062 = vmatpush1.msra.mxu1 %v4591_v61 }
0x1977   :  { %2063 = vmatprep.subr.mxu1 %v4594_v53 }
0x1978   :  { %2064 = vmatpush1.msra.mxu1 %v4596_v47 }
0x1979   :  { %2065 = vmatprep.subr.mxu1 %v4599_v63 }
0x197a   :  { %2066 = vmatpush1.msra.mxu1 %v4603_v35 }
0x197b   :  { %2067 = vmatprep.subr.mxu1 %v4606_v58 }
0x197c   :  { %2068 = vmatpush1.msra.mxu1 %v4608_v50 }
0x197d   :  { %2069 = vmatprep.subr.mxu1 %v4611_v14 }
0x197e   :  { %2070 = vmatpush1.msra.mxu1 %v4615_v41 }
0x197f   :  { %2283 = vmatprep.subr.mxu1 %v4569_v56 }
0x1a2f   :  { %v1877_v20 = vpop.f32.mrf.mxu1 }
0x1a30   :  { %v1882_v57 = vadd.f32 %v1877_v20, %v1806_v24 }
0x1a31   :  { %v1879_v44 = vpop.f32.mrf.mxu1 }
0x1a32   :  { %v1883_v52 = vadd.f32 %v1879_v44, %v1807_v30  ;;  %v3526_v13 = vmul.f32 -1.442695, %v1882_v57 }
0x1a34   :  { %3717 = vtanh.f32 %v1883_v52  ;;  %v3527_v30 = vmul.f32 -1.442695, %v1883_v52 }
0x1a35   :  { %3719 = vpow2.f32 %v3526_v13 }
0x1a41   :  { %v3718_v4 = vpop.eup %3717 }
0x1a42   :  { %1899 = vrot.lane.b32.xlu1 %v3718_v4, %s4055_s3  ;;  %v3720_v56 = vpop.eup %3719 }
0x1a43   :  { %v1890_v5 = vadd.f32 1.0, %v3720_v56 }
0x1a45   :  { %3721 = vrcp.f32 %v1890_v5 }
0x1a52   :  { %v3722_v39 = vpop.eup %3721 }
0x1a53   :  { %v1897_v24 = vmul.f32 %v3722_v39, %v1793_v28 }
0x1ab4   :  { %v1900_v9 = vpop.permute.xlu1 %1899 }
0x1ab5   :  { %v1902_v10 = vmul.f32 %v3722_v39, %v1900_v9 }
0x1ab7   :  { %1904 = vrot.lane.b32.xlu0 %v1902_v10, %s4055_s3 }
0x1b29   :  { %v1905_v51 = vpop.permute.xlu0 %1904 }
0x1b2a   :  { %v1907_v11 = vadd.f32 %v1905_v51, %v1897_v24 }
0x1b2c   :  { %3723 = vtanh.f32 %v1907_v11 }
0x1b2d   :  { %3725 = vpow2.f32 %v3527_v30 }
0x1b39   :  { %v3724_v21 = vpop.eup %3723 }
0x1b3a   :  { %1910 = vrot.lane.b32.xlu1 %v3724_v21, %s4055_s3  ;;  %v3726_v54 = vpop.eup %3725  ;;  %v5375_v21 = vsel %vm4274_vm1, %v4721_v23, %v4677_v49 }
0x1b3b   :  { %v1891_v60 = vadd.f32 1.0, %v3726_v54 }
0x1b3d   :  { %3727 = vrcp.f32 %v1891_v60  ;;  %v5376_v60 = vsel %vm4280_vm2, %v4731_v7, %v4679_v45 }
0x1b4a   :  { %v3728_v16 = vpop.eup %3727 }
0x1bac   :  { %v1911_v42 = vpop.permute.xlu1 %1910 }
0x1bad   :  { %v1913_v55 = vmul.f32 %v3728_v16, %v1911_v42 }
0x1baf   :  { %1914 = vst.msk [vmem:[#allocation3 + $0x18] sm:$0xff] %vm456_vm3, %v1913_v55  ;;  %3528 = vmatmul.mubr.msk.f32.vlgmr.msra.gmra.mxu0 %vm174_vm0, %v1913_v55 }
0x1bb0   :  { %1915 = vst.msk [vmem:[#allocation3 + $0x20] sm:$0xff] %vm458_vm4, %v1913_v55  ;;  %2170 = vmatpush1.msra.mxu0 %v4571_v59  ;;  %2217 = vmatprep.mubr.f32.mxu0 %v4054_v0 }
0x1bb1   :  { %2171 = vmatprep.subr.mxu0 %v4574_v17 }
0x1bb2   :  { %2172 = vmatpush1.msra.mxu0 %v4579_v25 }
0x1bb3   :  { %2173 = vmatprep.subr.mxu0 %v4582_v32 }
0x1bb4   :  { %2174 = vmatpush1.msra.mxu0 %v4584_v38 }
0x1bb5   :  { %2175 = vmatprep.subr.mxu0 %v4587_v37 }
0x1bb6   :  { %2176 = vmatpush1.msra.mxu0 %v4591_v61 }
0x1bb7   :  { %2177 = vmatprep.subr.mxu0 %v4594_v53 }
0x1bb8   :  { %2178 = vmatpush1.msra.mxu0 %v4596_v47 }
0x1bb9   :  { %2179 = vmatprep.subr.mxu0 %v4599_v63 }
0x1bba   :  { %2180 = vmatpush1.msra.mxu0 %v4603_v35 }
0x1bbb   :  { %2181 = vmatprep.subr.mxu0 %v4606_v58 }
0x1bbc   :  { %2182 = vmatpush1.msra.mxu0 %v4608_v50 }
0x1bbd   :  { %2183 = vmatprep.subr.mxu0 %v4611_v14 }
0x1bbe   :  { %2184 = vmatpush1.msra.mxu0 %v4615_v41 }
0x1c6f   :  { %v1991_v28 = vpop.f32.mrf.mxu0 }
0x1c70   :  { %v1996_v33 = vadd.f32 %v1991_v28, %v1920_v26 }
0x1c71   :  { %v1993_v20 = vpop.f32.mrf.mxu0 }
0x1c72   :  { %v1997_v57 = vadd.f32 %v1993_v20, %v1921_v31  ;;  %v3529_v52 = vmul.f32 -1.442695, %v1996_v33 }
0x1c74   :  { %3729 = vtanh.f32 %v1997_v57  ;;  %v3530_v22 = vmul.f32 -1.442695, %v1997_v57 }
0x1c75   :  { %3731 = vpow2.f32 %v3529_v52 }
0x1c81   :  { %v3730_v44 = vpop.eup %3729 }
0x1c82   :  { %2013 = vrot.lane.b32.xlu0 %v3730_v44, %s4055_s3  ;;  %v3732_v4 = vpop.eup %3731 }
0x1c83   :  { %v2004_v13 = vadd.f32 1.0, %v3732_v4 }
0x1c85   :  { %3733 = vrcp.f32 %v2004_v13 }
0x1c92   :  { %v3734_v56 = vpop.eup %3733 }
0x1c93   :  { %v2011_v18 = vmul.f32 %v3734_v56, %v1907_v11 }
0x1cf4   :  { %v2014_v5 = vpop.permute.xlu0 %2013 }
0x1cf5   :  { %v2016_v12 = vmul.f32 %v3734_v56, %v2014_v5 }
0x1cf7   :  { %2018 = vrot.lane.b32.xlu1 %v2016_v12, %s4055_s3 }
0x1d69   :  { %v2019_v26 = vpop.permute.xlu1 %2018 }
0x1d6a   :  { %v2021_v39 = vadd.f32 %v2019_v26, %v2011_v18  ;;  %v5377_v26 = vsel %vm4274_vm1, %v4743_v62, %v4741_v27 }
0x1d6c   :  { %3735 = vtanh.f32 %v2021_v39 }
0x1d6d   :  { %3737 = vpow2.f32 %v3530_v22 }
0x1d79   :  { %v3736_v15 = vpop.eup %3735 }
0x1d7a   :  { %2024 = vrot.lane.b32.xlu0 %v3736_v15, %s4055_s3  ;;  %v3738_v31 = vpop.eup %3737 }
0x1d7b   :  { %v2005_v9 = vadd.f32 1.0, %v3738_v31 }
0x1d7d   :  { %3739 = vrcp.f32 %v2005_v9 }
0x1d8a   :  { %v3740_v10 = vpop.eup %3739 }
0x1dec   :  { %v2025_v24 = vpop.permute.xlu0 %2024 }
0x1ded   :  { %v2027_v51 = vmul.f32 %v3740_v10, %v2025_v24 }
0x1def   :  { %2028 = vst.msk [vmem:[#allocation3 + $0x20] sm:$0xff] %vm456_vm3, %v2027_v51  ;;  %3531 = vmatmul.mubr.msk.f32.vlgmr.msra.gmra.mxu1 %vm174_vm0, %v2027_v51 }
0x1df0   :  { %2029 = vst.msk [vmem:[#allocation3 + $0x18] sm:$0xff] %vm458_vm4, %v2027_v51  ;;  %2284 = vmatpush1.msra.mxu1 %v4571_v59  ;;  %2331 = vmatprep.mubr.f32.mxu1 %v4054_v0 }
0x1df1   :  { %2285 = vmatprep.subr.mxu1 %v4574_v17 }
0x1df2   :  { %2286 = vmatpush1.msra.mxu1 %v4579_v25 }
0x1df3   :  { %2287 = vmatprep.subr.mxu1 %v4582_v32 }
0x1df4   :  { %2288 = vmatpush1.msra.mxu1 %v4584_v38 }
0x1df5   :  { %2289 = vmatprep.subr.mxu1 %v4587_v37 }
0x1df6   :  { %2290 = vmatpush1.msra.mxu1 %v4591_v61 }
0x1df7   :  { %2291 = vmatprep.subr.mxu1 %v4594_v53 }
0x1df8   :  { %2292 = vmatpush1.msra.mxu1 %v4596_v47 }
0x1df9   :  { %2293 = vmatprep.subr.mxu1 %v4599_v63 }
0x1dfa   :  { %2294 = vmatpush1.msra.mxu1 %v4603_v35 }
0x1dfb   :  { %2295 = vmatprep.subr.mxu1 %v4606_v58 }
0x1dfc   :  { %2296 = vmatpush1.msra.mxu1 %v4608_v50 }
0x1dfd   :  { %2297 = vmatprep.subr.mxu1 %v4611_v14 }
0x1dfe   :  { %2298 = vmatpush1.msra.mxu1 %v4615_v41 }
0x1eaf   :  { %v2105_v59 = vpop.f32.mrf.mxu1 }
0x1eb0   :  { %v2110_v17 = vadd.f32 %v2105_v59, %v2034_v36  ;;  %v2395_v59 = vld [vmem:[#allocation13 + $0x78] sm:$0xff] }
0x1eb1   :  { %v2107_v25 = vpop.f32.mrf.mxu1  ;;  %2448 = vmatprep.subr.mxu0 %v2395_v59 }
0x1eb2   :  { %v2111_v32 = vadd.f32 %v2107_v25, %v2035_v40  ;;  %v3532_v37 = vmul.f32 -1.442695, %v2110_v17  ;;  %v2394_v17 = vld [vmem:[#allocation13 + $0x70] sm:$0xff] }
0x1eb3   :  { %v2390_v25 = vld [vmem:[#allocation13 + $0x50] sm:$0xff] }
0x1eb4   :  { %3741 = vtanh.f32 %v2111_v32  ;;  %v3533_v19 = vmul.f32 -1.442695, %v2111_v32 }
0x1eb5   :  { %3743 = vpow2.f32 %v3532_v37 }
0x1ec1   :  { %v3742_v38 = vpop.eup %3741 }
0x1ec2   :  { %2127 = vrot.lane.b32.xlu1 %v3742_v38, %s4055_s3  ;;  %v3744_v61 = vpop.eup %3743 }
0x1ec3   :  { %v2118_v53 = vadd.f32 1.0, %v3744_v61  ;;  %v2389_v61 = vld [vmem:[#allocation13 + $0x48] sm:$0xff] }
0x1ec5   :  { %3745 = vrcp.f32 %v2118_v53  ;;  %v2388_v53 = vld [vmem:[#allocation13 + $0x40] sm:$0xff] }
0x1ed2   :  { %v3746_v47 = vpop.eup %3745 }
0x1ed3   :  { %v2125_v58 = vmul.f32 %v3746_v47, %v2021_v39 }
0x1f34   :  { %v2128_v63 = vpop.permute.xlu1 %2127 }
0x1f35   :  { %v2130_v35 = vmul.f32 %v3746_v47, %v2128_v63  ;;  %v2387_v47 = vld [vmem:[#allocation13 + $0x38] sm:$0xff]  ;;  %v2386_v63 = vld [vmem:[#allocation13 + $0x30] sm:$0xff] }
0x1f37   :  { %2132 = vrot.lane.b32.xlu0 %v2130_v35, %s4055_s3  ;;  %v2385_v35 = vld [vmem:[#allocation13 + $0x28] sm:$0xff] }
0x1fa9   :  { %v2133_v50 = vpop.permute.xlu0 %2132 }
0x1faa   :  { %v2135_v14 = vadd.f32 %v2133_v50, %v2125_v58  ;;  %v2384_v58 = vld [vmem:[#allocation13 + $0x20] sm:$0xff]  ;;  %v2383_v50 = vld [vmem:[#allocation13 + $0x18] sm:$0xff] }
0x1fac   :  { %3747 = vtanh.f32 %v2135_v14 }
0x1fad   :  { %3749 = vpow2.f32 %v3533_v19  ;;  %v2380_v19 = vld [vmem:[#allocation13] sm:$0xff] }
0x1fb9   :  { %v3748_v41 = vpop.eup %3747 }
0x1fba   :  { %2138 = vrot.lane.b32.xlu1 %v3748_v41, %s4055_s3  ;;  %v3750_v48 = vpop.eup %3749  ;;  %v2381_v41 = vld [vmem:[#allocation13 + $0x8] sm:$0xff] }
0x1fbb   :  { %v2119_v29 = vadd.f32 1.0, %v3750_v48 }
0x1fbd   :  { %3751 = vrcp.f32 %v2119_v29  ;;  %v4971_v29 = vld [vmem:[#allocation15 + $0x78] sm:$0xff] }
0x1fbe   :  { %2599 = vmatprep.subr.mxu1 %v4971_v29 }
0x1fca   :  { %v3752_v34 = vpop.eup %3751 }
0x202c   :  { %v2139_v36 = vpop.permute.xlu1 %2138 }
0x202d   :  { %v2141_v40 = vmul.f32 %v3752_v34, %v2139_v36  ;;  %v4973_v34 = vld [vmem:[#allocation15 + $0x70] sm:$0xff]  ;;  %v4976_v36 = vld [vmem:[#allocation15 + $0x68] sm:$0xff] }
0x202f   :  { %2142 = vst.msk [vmem:[#allocation3 + $0x28] sm:$0xff] %vm456_vm3, %v2141_v40  ;;  %3534 = vmatmul.mubr.msk.f32.vlgmr.msra.gmra.mxu0 %vm174_vm0, %v2141_v40 }
0x2030   :  { %2143 = vst.msk [vmem:[#allocation3 + $0x10] sm:$0xff] %vm458_vm4, %v2141_v40  ;;  %2496 = vmatprep.mubr.f32.mxu0 %v4054_v0  ;;  %2449 = vmatpush1.msra.mxu0 %v2394_v17  ;;  %v4981_v40 = vld [vmem:[#allocation15 + $0x60] sm:$0xff] }
0x2031   :  { %2450 = vmatprep.subr.mxu0 %v2393_v1 }
0x2032   :  { %2451 = vmatpush1.msra.mxu0 %v2392_v8 }
0x20ef   :  { %v2219_v11 = vpop.f32.mrf.mxu0 }
0x20f0   :  { %v2224_v30 = vadd.f32 %v2219_v11, %v5375_v21  ;;  %v4984_v11 = vld [vmem:[#allocation15 + $0x58] sm:$0xff]  ;;  %v4986_v21 = vld [vmem:[#allocation15 + $0x50] sm:$0xff] }
0x20f1   :  { %v2221_v54 = vpop.f32.mrf.mxu0 }
0x20f2   :  { %v2225_v16 = vadd.f32 %v2221_v54, %v5376_v60  ;;  %v3535_v55 = vmul.f32 -1.442695, %v2224_v30  ;;  %v4989_v30 = vld [vmem:[#allocation15 + $0x48] sm:$0xff]  ;;  %v4993_v54 = vld [vmem:[#allocation15 + $0x40] sm:$0xff]  ;;  %v4996_v60 = vld [vmem:[#allocation15 + $0x38] sm:$0xff] }
0x20f4   :  { %3753 = vtanh.f32 %v2225_v16  ;;  %v3536_v7 = vmul.f32 -1.442695, %v2225_v16  ;;  %v4998_v16 = vld [vmem:[#allocation15 + $0x30] sm:$0xff] }
0x20f5   :  { %3755 = vpow2.f32 %v3535_v55  ;;  %v5005_v55 = vld [vmem:[#allocation15 + $0x20] sm:$0xff] }
0x2101   :  { %v3754_v42 = vpop.eup %3753 }
0x2102   :  { %2241 = vrot.lane.b32.xlu0 %v3754_v42, %s4055_s3  ;;  %v3756_v28 = vpop.eup %3755  ;;  %v5001_v42 = vld [vmem:[#allocation15 + $0x28] sm:$0xff] }
0x2103   :  { %v2232_v33 = vadd.f32 1.0, %v3756_v28  ;;  %v5008_v28 = vld [vmem:[#allocation15 + $0x18] sm:$0xff] }
0x2105   :  { %3757 = vrcp.f32 %v2232_v33  ;;  %v5010_v33 = vld [vmem:[#allocation15 + $0x10] sm:$0xff] }
0x2112   :  { %v3758_v20 = vpop.eup %3757 }
0x2113   :  { %v2239_v23 = vmul.f32 %v3758_v20, %v2135_v14  ;;  %v2382_v14 = vld [vmem:[#allocation13 + $0x10] sm:$0xff] }
0x2174   :  { %v2242_v57 = vpop.permute.xlu0 %2241 }
0x2175   :  { %v2244_v49 = vmul.f32 %v3758_v20, %v2242_v57  ;;  %v5013_v20 = vld [vmem:[#allocation15 + $0x8] sm:$0xff]  ;;  %v5017_v57 = vld [vmem:[#allocation15] sm:$0xff] }
0x2177   :  { %2246 = vrot.lane.b32.xlu1 %v2244_v49, %s4055_s3 }
0x21e9   :  { %v2247_v44 = vpop.permute.xlu1 %2246 }
0x21ea   :  { %v2249_v52 = vadd.f32 %v2247_v44, %v2239_v23 }
0x21ec   :  { %3759 = vtanh.f32 %v2249_v52 }
0x21ed   :  { %3761 = vpow2.f32 %v3536_v7 }
0x21f9   :  { %v3760_v45 = vpop.eup %3759 }
0x21fa   :  { %2252 = vrot.lane.b32.xlu0 %v3760_v45, %s4055_s3  ;;  %v3762_v4 = vpop.eup %3761 }
0x21fb   :  { %v2233_v13 = vadd.f32 1.0, %v3762_v4 }
0x21fd   :  { %3763 = vrcp.f32 %v2233_v13 }
0x220a   :  { %v3764_v56 = vpop.eup %3763 }
0x226c   :  { %v2253_v5 = vpop.permute.xlu0 %2252 }
0x226d   :  { %v2255_v12 = vmul.f32 %v3764_v56, %v2253_v5  ;;  %v2374_v56 = vld [vmem:[#allocation3 + $0x10] sm:$0xff]  ;;  %v2375_v5 = vld [vmem:[#allocation3 + $0x18] sm:$0xff] }
0x226f   :  { %2256 = vst.msk [vmem:[#allocation3 + $0x30] sm:$0xff] %vm456_vm3, %v2255_v12  ;;  %3537 = vmatmul.mubr.msk.f32.vlgmr.msra.gmra.mxu1 %vm174_vm0, %v2255_v12 }
0x2270   :  { %2257 = vst.msk [vmem:[#allocation3 + $0x8] sm:$0xff] %vm458_vm4, %v2255_v12  ;;  %2647 = vmatprep.mubr.f32.mxu1 %v4054_v0  ;;  %2600 = vmatpush1.msra.mxu1 %v4973_v34  ;;  %v2376_v12 = vld [vmem:[#allocation3 + $0x20] sm:$0xff] }
0x2271   :  { %2601 = vmatprep.subr.mxu1 %v4976_v36 }
0x2272   :  { %2602 = vmatpush1.msra.mxu1 %v4981_v40 }
0x2273   :  { %2603 = vmatprep.subr.mxu1 %v4984_v11 }
0x2274   :  { %2604 = vmatpush1.msra.mxu1 %v4986_v21 }
0x2275   :  { %2605 = vmatprep.subr.mxu1 %v4989_v30 }
0x2276   :  { %2606 = vmatpush1.msra.mxu1 %v4993_v54 }
0x2277   :  { %2607 = vmatprep.subr.mxu1 %v4996_v60  ;;  %v2373_v13 = vld [vmem:[#allocation3 + $0x8] sm:$0xff] }
0x2278   :  { %2608 = vmatpush1.msra.mxu1 %v4998_v16 }
0x2279   :  { %2609 = vmatprep.subr.mxu1 %v5001_v42 }
0x227a   :  { %2610 = vmatpush1.msra.mxu1 %v5005_v55 }
0x227b   :  { %2611 = vmatprep.subr.mxu1 %v5008_v28 }
0x227c   :  { %2612 = vmatpush1.msra.mxu1 %v5010_v33 }
0x227d   :  { %2613 = vmatprep.subr.mxu1 %v5013_v20 }
0x227e   :  { %2614 = vmatpush1.msra.mxu1 %v5017_v57 }
0x227f   :  { %2648 = vmatmul.mubr.f32.vlgmr.msra.gmra.mxu1 %v4054_v0  ;;  %2712 = vmatprep.subr.mxu1 %v4971_v29 }
0x2280   :  { %2713 = vmatpush1.msra.mxu1 %v4973_v34  ;;  %2760 = vmatprep.mubr.f32.mxu1 %v4054_v0 }
0x2281   :  { %2714 = vmatprep.subr.mxu1 %v4976_v36 }
0x2282   :  { %2715 = vmatpush1.msra.mxu1 %v4981_v40 }
0x2283   :  { %2716 = vmatprep.subr.mxu1 %v4984_v11 }
0x2284   :  { %2717 = vmatpush1.msra.mxu1 %v4986_v21 }
0x2285   :  { %2718 = vmatprep.subr.mxu1 %v4989_v30 }
0x2286   :  { %2719 = vmatpush1.msra.mxu1 %v4993_v54 }
0x2287   :  { %2720 = vmatprep.subr.mxu1 %v4996_v60 }
0x2288   :  { %2721 = vmatpush1.msra.mxu1 %v4998_v16 }
0x2289   :  { %2722 = vmatprep.subr.mxu1 %v5001_v42 }
0x228a   :  { %2723 = vmatpush1.msra.mxu1 %v5005_v55 }
0x228b   :  { %2724 = vmatprep.subr.mxu1 %v5008_v28 }
0x228c   :  { %2725 = vmatpush1.msra.mxu1 %v5010_v33 }
0x228d   :  { %2726 = vmatprep.subr.mxu1 %v5013_v20 }
0x228e   :  { %2727 = vmatpush1.msra.mxu1 %v5017_v57 }
0x228f   :  { %2936 = vmatprep.subr.mxu1 %v4971_v29 }
0x232f   :  { %v2333_v18 = vpop.f32.mrf.mxu1 }
0x2330   :  { %v2338_v39 = vadd.f32 %v2333_v18, %v5377_v26  ;;  %v2377_v18 = vld [vmem:[#allocation3 + $0x28] sm:$0xff]  ;;  %v2378_v26 = vld [vmem:[#allocation3 + $0x30] sm:$0xff] }
0x2331   :  { %v2335_v15 = vpop.f32.mrf.mxu1 }
0x2332   :  { %v4965_v22 = vadd.f32 %v2335_v15, %v2263_v2  ;;  %v3538_v9 = vmul.f32 -1.442695, %v2338_v39  ;;  %v2391_v2 = vld [vmem:[#allocation13 + $0x58] sm:$0xff]  ;;  %v2396_v15 = vld [vmem:[%s5368_s9] sm:$0x3]  ;;  %s4056_s9 = smov [#allocation16]  }
0x2333   :  { %2452 = vmatprep.subr.mxu0 %v2391_v2  ;;  %s3466_s29 = sshll.u32 %s4056_s9, 4  ;;  %s3467_s29 = int_to_ptr.vmem [resolvable:$true] %s3466_s29 }
0x2334   :  { %3765 = vtanh.f32 %v4965_v22  ;;  %2453 = vmatpush1.msra.mxu0 %v2390_v25  ;;  %v3539_v49 = vmul.f32 -1.442695, %v4965_v22  ;;  %s4013_s30 = scalar_lea.vmem %s3467_s29, 128  ;;  %p4018_p8 = scmp.lt.s32.totalorder %s3467_s29, %s3467_s29 }
0x2335   :  { %3767 = vpow2.f32 %v3538_v9  ;;  %2454 = vmatprep.subr.mxu0 %v2389_v61  ;;  %v2401_v9 = vrot.slane %v2396_v15, %v4253_v43  ;;  %p4014_p7 = scmp.ne.s32.totalorder %s3467_s29, %s4013_s30  ;;  %p4019_p9 = scmp.lt.s32.totalorder %s4013_s30, %s4013_s30 }
0x2336   :  { %2455 = vmatpush1.msra.mxu0 %v2388_v53 }
0x2337   :  { %2456 = vmatprep.subr.mxu0 %v2387_v47  ;;  %p4020_p10 = por %p4019_p9, %p4018_p8 }
0x2338   :  { %2457 = vmatpush1.msra.mxu0 %v2386_v63 }
0x2339   :  { %2458 = vmatprep.subr.mxu0 %v2385_v35  ;;  %p4021_p11 = pnand %p4020_p10, %p4014_p7 }
0x233a   :  { %2459 = vmatpush1.msra.mxu0 %v2384_v58 }
0x233b   :  { %2460 = vmatprep.subr.mxu0 %v2383_v50 }
0x233c   :  { %2461 = vmatpush1.msra.mxu0 %v2382_v14 }
0x233d   :  { %2462 = vmatprep.subr.mxu0 %v2381_v41 }
0x233e   :  { %2463 = vmatpush1.msra.mxu0 %v2380_v19 }
0x233f   :  { %2824 = vmatprep.subr.mxu0 %v4971_v29 }
0x2341   :  { %v3766_v31 = vpop.eup %3765 }
0x2342   :  { %2355 = vrot.lane.b32.xlu1 %v3766_v31, %s4055_s3  ;;  %v3768_v10 = vpop.eup %3767 }
0x2343   :  { %v2346_v24 = vadd.f32 1.0, %v3768_v10 }
0x2345   :  { %3769 = vrcp.f32 %v2346_v24  ;;  %v2405_v24 = vrot.slane %v2396_v15, %v4258_v46 }
0x2352   :  { %v3770_v27 = vpop.eup %3769 }
0x2353   :  { %v2353_v32 = vmul.f32 %v3770_v27, %v2249_v52 }
0x23b4   :  { %v2356_v62 = vpop.permute.xlu1 %2355 }
0x23b5   :  { %v2358_v51 = vmul.f32 %v3770_v27, %v2356_v62 }
0x23b7   :  { %2360 = vrot.lane.b32.xlu0 %v2358_v51, %s4055_s3 }
0x2429   :  { %v2361_v38 = vpop.permute.xlu0 %2360 }
0x242a   :  { %v2363_v37 = vadd.f32 %v2361_v38, %v2353_v32 }
0x242c   :  { %3771 = vtanh.f32 %v2363_v37 }
0x242d   :  { %3773 = vpow2.f32 %v3539_v49 }
0x2439   :  { %v3772_v48 = vpop.eup %3771 }
0x243a   :  { %2366 = vrot.lane.b32.xlu1 %v3772_v48, %s4055_s3  ;;  %v3774_v23 = vpop.eup %3773 }
0x243b   :  { %v2347_v44 = vadd.f32 1.0, %v3774_v23 }
0x243d   :  { %3775 = vrcp.f32 %v2347_v44 }
0x244a   :  { %v3776_v52 = vpop.eup %3775 }
0x24ac   :  { %v2367_v45 = vpop.permute.xlu1 %2366 }
0x24ad   :  { %v2369_v7 = vmul.f32 %v3776_v52, %v2367_v45 }
0x24af   :  { %2370 = vst.msk [vmem:[#allocation3 + $0x38] sm:$0xff] %vm456_vm3, %v2369_v7 }
0x24b0   :  { %2371 = vst.msk [vmem:[#allocation3] sm:$0xff] %vm458_vm4, %v2369_v7 }
0x24b6   :  { %v2379_v39 = vld [vmem:[#allocation3 + $0x38] sm:$0xff] }
0x24b7   :  { %v2372_v4 = vld [vmem:[#allocation3] sm:$0xff] }
0x24b8   :  { %3540 = vmatmul.mubr.msk.f32.vlgmr.msra.gmra.mxu0 %vm174_vm0, %v2372_v4 }
0x24b9   :  { %2502 = vmatprep.mubr.f32.mxu0 %v4054_v0  ;;  %2825 = vmatpush1.msra.mxu0 %v4973_v34 }
0x24ba   :  { %2826 = vmatprep.subr.mxu0 %v4976_v36 }
0x24bb   :  { %2827 = vmatpush1.msra.mxu0 %v4981_v40 }
0x24bc   :  { %3541 = vmatmul.mubr.msk.f32.gmra.mxu0 %vm174_vm0, %v2373_v13  ;;  %2828 = vmatprep.subr.mxu0 %v4984_v11 }
0x24bd   :  { %2508 = vmatprep.mubr.f32.mxu0 %v4054_v0  ;;  %2829 = vmatpush1.msra.mxu0 %v4986_v21 }
0x24be   :  { %2830 = vmatprep.subr.mxu0 %v4989_v30 }
0x24bf   :  { %2831 = vmatpush1.msra.mxu0 %v4993_v54 }
0x24c0   :  { %3542 = vmatmul.mubr.msk.f32.gmra.mxu0 %vm174_vm0, %v2374_v56  ;;  %2832 = vmatprep.subr.mxu0 %v4996_v60 }
0x24c1   :  { %2514 = vmatprep.mubr.f32.mxu0 %v4054_v0  ;;  %2833 = vmatpush1.msra.mxu0 %v4998_v16 }
0x24c2   :  { %2834 = vmatprep.subr.mxu0 %v5001_v42 }
0x24c3   :  { %2835 = vmatpush1.msra.mxu0 %v5005_v55 }
0x24c4   :  { %3543 = vmatmul.mubr.msk.f32.gmra.mxu0 %vm174_vm0, %v2375_v5  ;;  %2836 = vmatprep.subr.mxu0 %v5008_v28 }
0x24c5   :  { %2520 = vmatprep.mubr.f32.mxu0 %v4054_v0  ;;  %2837 = vmatpush1.msra.mxu0 %v5010_v33 }
0x24c6   :  { %2838 = vmatprep.subr.mxu0 %v5013_v20 }
0x24c7   :  { %2839 = vmatpush1.msra.mxu0 %v5017_v57 }
0x24c8   :  { %3544 = vmatmul.mubr.msk.f32.gmra.mxu0 %vm174_vm0, %v2376_v12  ;;  %3044 = vmatprep.subr.mxu0 %v4971_v29 }
0x24c9   :  { %2526 = vmatprep.mubr.f32.mxu0 %v4054_v0 }
0x24cc   :  { %3545 = vmatmul.mubr.msk.f32.gmra.mxu0 %vm174_vm0, %v2377_v18  ;;  %v2649_v18 = vpop.f32.mrf.mxu1 }
0x24cd   :  { %2532 = vmatprep.mubr.f32.mxu0 %v4054_v0 }
0x24d0   :  { %3546 = vmatmul.mubr.msk.f32.gmra.mxu0 %vm174_vm0, %v2378_v26 }
0x24d1   :  { %2538 = vmatprep.mubr.f32.mxu0 %v4054_v0 }
0x24d4   :  { %3547 = vmatmul.mubr.msk.f32.gmra.mxu0 %vm174_vm0, %v2379_v39 }
0x24d5   :  { %2872 = vmatprep.mubr.f32.mxu0 %v4054_v0 }
0x2578   :  { %v2498_v22 = vpop.f32.mrf.mxu0 }
0x2579   :  { %v5143_v5 = vadd.f32 %v2498_v22, %v2401_v9 }
0x257a   :  { %v2500_v31 = vpop.f32.mrf.mxu0 }
0x257c   :  { %v2504_v10 = vpop.f32.mrf.mxu0 }
0x257d   :  { %v5079_v27 = vadd.f32 %v2504_v10, %v2401_v9  ;;  %v5155_v10 = vadd.f32 %v2500_v31, %v2405_v24 }
0x257e   :  { %v2506_v62 = vpop.f32.mrf.mxu0 }
0x257f   :  { %v5081_v51 = vadd.f32 %v2506_v62, %v2405_v24 }
0x2580   :  { %v2510_v59 = vpop.f32.mrf.mxu0 }
0x2581   :  { %v5083_v17 = vadd.f32 %v2510_v59, %v2401_v9 }
0x2582   :  { %v2512_v1 = vpop.f32.mrf.mxu0 }
0x2583   :  { %v5085_v8 = vadd.f32 %v2512_v1, %v2405_v24  ;;  %v2651_v1 = vpop.f32.mrf.mxu1 }
0x2584   :  { %v2516_v2 = vpop.f32.mrf.mxu0 }
0x2585   :  { %v5087_v25 = vadd.f32 %v2516_v2, %v2401_v9 }
0x2586   :  { %v2518_v32 = vpop.f32.mrf.mxu0 }
0x2587   :  { %v5089_v38 = vadd.f32 %v2518_v32, %v2405_v24 }
0x2588   :  { %v2522_v43 = vpop.f32.mrf.mxu0 }
0x2589   :  { %v5091_v37 = vadd.f32 %v2522_v43, %v2401_v9 }
0x258a   :  { %v2524_v46 = vpop.f32.mrf.mxu0 }
0x258b   :  { %v5093_v61 = vadd.f32 %v2524_v46, %v2405_v24  ;;  %v2915_v53 = vsel %vm4274_vm1, %v5087_v25, %v5091_v37  ;;  %v3023_v47 = vsel %vm4274_vm1, %v5091_v37, %v5087_v25 }
0x258c   :  { %v2528_v63 = vpop.f32.mrf.mxu0 }
0x258d   :  { %v5103_v35 = vadd.f32 %v2528_v63, %v2401_v9  ;;  %v2916_v58 = vsel %vm4280_vm2, %v5089_v38, %v5093_v61  ;;  %v3024_v50 = vsel %vm4280_vm2, %v5093_v61, %v5089_v38 }
0x258e   :  { %v2530_v14 = vpop.f32.mrf.mxu0 }
0x258f   :  { %v5113_v41 = vadd.f32 %v2530_v14, %v2405_v24  ;;  %v2803_v19 = vsel %vm4274_vm1, %v5083_v17, %v5103_v35  ;;  %v3131_v48 = vsel %vm4274_vm1, %v5103_v35, %v5083_v17 }
0x2590   :  { %v2534_v49 = vpop.f32.mrf.mxu0 }
0x2591   :  { %v5123_v23 = vadd.f32 %v2534_v49, %v2401_v9  ;;  %v2804_v44 = vsel %vm4280_vm2, %v5085_v8, %v5113_v41  ;;  %v3132_v52 = vsel %vm4280_vm2, %v5113_v41, %v5085_v8 }
0x2592   :  { %v2536_v45 = vpop.f32.mrf.mxu0 }
0x2593   :  { %v5133_v7 = vadd.f32 %v2536_v45, %v2405_v24  ;;  %v2691_v4 = vsel %vm4274_vm1, %v5079_v27, %v5123_v23  ;;  %v3239_v13 = vsel %vm4274_vm1, %v5123_v23, %v5079_v27 }
0x2594   :  { %v2540_v56 = vpop.f32.mrf.mxu0 }
0x2595   :  { %v5145_v12 = vadd.f32 %v2540_v56, %v2401_v9  ;;  %v2692_v26 = vsel %vm4280_vm2, %v5081_v51, %v5133_v7  ;;  %v3240_v39 = vsel %vm4280_vm2, %v5133_v7, %v5081_v51 }
0x2596   :  { %v2542_v15 = vpop.f32.mrf.mxu0 }
0x2597   :  { %v2581_v22 = vsel %vm4274_vm1, %v5143_v5, %v5145_v12  ;;  %v5161_v9 = vadd.f32 %v2542_v15, %v2405_v24 }
0x2598   :  { %v2654_v32 = vadd.f32 %v2649_v18, %v2581_v22 }
0x2599   :  { %v2582_v59 = vsel %vm4280_vm2, %v5155_v10, %v5161_v9  ;;  %v3352_v31 = vsel %vm4280_vm2, %v5161_v9, %v5155_v10 }
0x259a   :  { %v2655_v2 = vadd.f32 %v2651_v1, %v2582_v59  ;;  %v3548_v43 = vmul.f32 -1.442695, %v2654_v32 }
0x259c   :  { %3777 = vtanh.f32 %v2655_v2  ;;  %v3549_v1 = vmul.f32 -1.442695, %v2655_v2 }
0x259d   :  { %3779 = vpow2.f32 %v3548_v43 }
0x25a9   :  { %v3778_v24 = vpop.eup %3777 }
0x25aa   :  { %2671 = vrot.lane.b32.xlu0 %v3778_v24, %s4055_s3  ;;  %v3780_v46 = vpop.eup %3779 }
0x25ab   :  { %v2662_v63 = vadd.f32 1.0, %v3780_v46 }
0x25ad   :  { %3781 = vrcp.f32 %v2662_v63 }
0x25ba   :  { %v3782_v14 = vpop.eup %3781 }
0x25bb   :  { %v2669_v56 = vmul.f32 0.0, %v3782_v14 }
0x261c   :  { %v2672_v49 = vpop.permute.xlu0 %2671 }
0x261d   :  { %v2674_v45 = vmul.f32 %v3782_v14, %v2672_v49 }
0x261f   :  { %2676 = vrot.lane.b32.xlu1 %v2674_v45, %s4055_s3 }
0x2691   :  { %v2677_v15 = vpop.permute.xlu1 %2676 }
0x2692   :  { %v2679_v62 = vadd.f32 %v2677_v15, %v2669_v56 }
0x2694   :  { %3783 = vtanh.f32 %v2679_v62 }
0x2695   :  { %3785 = vpow2.f32 %v3549_v1 }
0x26a1   :  { %v3784_v59 = vpop.eup %3783 }
0x26a2   :  { %2682 = vrot.lane.b32.xlu0 %v3784_v59, %s4055_s3  ;;  %v3786_v18 = vpop.eup %3785 }
0x26a3   :  { %v2663_v22 = vadd.f32 1.0, %v3786_v18 }
0x26a5   :  { %3787 = vrcp.f32 %v2663_v22 }
0x26b2   :  { %v3788_v24 = vpop.eup %3787 }
0x2714   :  { %v2683_v32 = vpop.permute.xlu0 %2682 }
0x2715   :  { %v2685_v43 = vmul.f32 %v3788_v24, %v2683_v32 }
0x2717   :  { %2686 = vst.msk [vmem:[#allocation16] sm:$0xff] %vm458_vm4, %v2685_v43  ;;  %3550 = vmatmul.mubr.msk.f32.vlgmr.msra.gmra.mxu1 %vm174_vm0, %v2685_v43 }
0x2718   :  { %2937 = vmatpush1.msra.mxu1 %v4973_v34  ;;  %2984 = vmatprep.mubr.f32.mxu1 %v4054_v0 }
0x2719   :  { %2938 = vmatprep.subr.mxu1 %v4976_v36 }
0x271a   :  { %2939 = vmatpush1.msra.mxu1 %v4981_v40 }
0x271b   :  { %2940 = vmatprep.subr.mxu1 %v4984_v11 }
0x271c   :  { %2941 = vmatpush1.msra.mxu1 %v4986_v21 }
0x271d   :  { %2942 = vmatprep.subr.mxu1 %v4989_v30 }
0x271e   :  { %2943 = vmatpush1.msra.mxu1 %v4993_v54 }
0x271f   :  { %2944 = vmatprep.subr.mxu1 %v4996_v60 }
0x2720   :  { %2945 = vmatpush1.msra.mxu1 %v4998_v16 }
0x2721   :  { %2946 = vmatprep.subr.mxu1 %v5001_v42 }
0x2722   :  { %2947 = vmatpush1.msra.mxu1 %v5005_v55 }
0x2723   :  { %2948 = vmatprep.subr.mxu1 %v5008_v28 }
0x2724   :  { %2949 = vmatpush1.msra.mxu1 %v5010_v33 }
0x2725   :  { %2950 = vmatprep.subr.mxu1 %v5013_v20 }
0x2726   :  { %2951 = vmatpush1.msra.mxu1 %v5017_v57 }
0x2727   :  { %3152 = vmatprep.subr.mxu1 %v4971_v29 }
0x27d7   :  { %v2762_v2 = vpop.f32.mrf.mxu1 }
0x27d8   :  { %v2767_v46 = vadd.f32 %v2762_v2, %v2691_v4 }
0x27d9   :  { %v2764_v63 = vpop.f32.mrf.mxu1 }
0x27da   :  { %v2768_v14 = vadd.f32 %v2764_v63, %v2692_v26  ;;  %v3551_v45 = vmul.f32 -1.442695, %v2767_v46 }
0x27dc   :  { %3789 = vtanh.f32 %v2768_v14  ;;  %v3552_v26 = vmul.f32 -1.442695, %v2768_v14 }
0x27dd   :  { %3791 = vpow2.f32 %v3551_v45 }
0x27e9   :  { %v3790_v49 = vpop.eup %3789 }
0x27ea   :  { %2784 = vrot.lane.b32.xlu1 %v3790_v49, %s4055_s3  ;;  %v3792_v56 = vpop.eup %3791 }
0x27eb   :  { %v2775_v15 = vadd.f32 1.0, %v3792_v56 }
0x27ed   :  { %3793 = vrcp.f32 %v2775_v15 }
0x27fa   :  { %v3794_v59 = vpop.eup %3793 }
0x27fb   :  { %v2782_v22 = vmul.f32 %v3794_v59, %v2679_v62 }
0x285c   :  { %v2785_v1 = vpop.permute.xlu1 %2784 }
0x285d   :  { %v2787_v18 = vmul.f32 %v3794_v59, %v2785_v1 }
0x285f   :  { %2789 = vrot.lane.b32.xlu0 %v2787_v18, %s4055_s3 }
0x28d1   :  { %v2790_v24 = vpop.permute.xlu0 %2789 }
0x28d2   :  { %v2792_v32 = vadd.f32 %v2790_v24, %v2782_v22 }
0x28d4   :  { %3795 = vtanh.f32 %v2792_v32 }
0x28d5   :  { %3797 = vpow2.f32 %v3552_v26 }
0x28e1   :  { %v3796_v4 = vpop.eup %3795 }
0x28e2   :  { %2795 = vrot.lane.b32.xlu1 %v3796_v4, %s4055_s3  ;;  %v3798_v43 = vpop.eup %3797 }
0x28e3   :  { %v2776_v2 = vadd.f32 1.0, %v3798_v43 }
0x28e5   :  { %3799 = vrcp.f32 %v2776_v2 }
0x28f2   :  { %v3800_v46 = vpop.eup %3799 }
0x2954   :  { %v2796_v63 = vpop.permute.xlu1 %2795 }
0x2955   :  { %v2798_v49 = vmul.f32 %v3800_v46, %v2796_v63 }
0x2957   :  { %3553 = vmatmul.mubr.msk.f32.vlgmr.msra.gmra.mxu0 %vm174_vm0, %v2798_v49 }
0x2958   :  { %3045 = vmatpush1.msra.mxu0 %v4973_v34  ;;  %3092 = vmatprep.mubr.f32.mxu0 %v4054_v0 }
0x2959   :  { %3046 = vmatprep.subr.mxu0 %v4976_v36 }
0x295a   :  { %3047 = vmatpush1.msra.mxu0 %v4981_v40 }
0x295b   :  { %3048 = vmatprep.subr.mxu0 %v4984_v11 }
0x295c   :  { %3049 = vmatpush1.msra.mxu0 %v4986_v21 }
0x295d   :  { %3050 = vmatprep.subr.mxu0 %v4989_v30 }
0x295e   :  { %3051 = vmatpush1.msra.mxu0 %v4993_v54 }
0x295f   :  { %3052 = vmatprep.subr.mxu0 %v4996_v60 }
0x2960   :  { %3053 = vmatpush1.msra.mxu0 %v4998_v16 }
0x2961   :  { %3054 = vmatprep.subr.mxu0 %v5001_v42 }
0x2962   :  { %3055 = vmatpush1.msra.mxu0 %v5005_v55 }
0x2963   :  { %3056 = vmatprep.subr.mxu0 %v5008_v28 }
0x2964   :  { %3057 = vmatpush1.msra.mxu0 %v5010_v33 }
0x2965   :  { %3058 = vmatprep.subr.mxu0 %v5013_v20 }
0x2966   :  { %3059 = vmatpush1.msra.mxu0 %v5017_v57 }
0x2967   :  { %3260 = vmatprep.subr.mxu0 %v4971_v29 }
0x2a17   :  { %v2874_v62 = vpop.f32.mrf.mxu0 }
0x2a18   :  { %v2879_v14 = vadd.f32 %v2874_v62, %v2803_v19 }
0x2a19   :  { %v2876_v45 = vpop.f32.mrf.mxu0 }
0x2a1a   :  { %v2880_v56 = vadd.f32 %v2876_v45, %v2804_v44  ;;  %v3554_v59 = vmul.f32 -1.442695, %v2879_v14 }
0x2a1c   :  { %3801 = vtanh.f32 %v2880_v56  ;;  %v3555_v44 = vmul.f32 -1.442695, %v2880_v56 }
0x2a1d   :  { %3803 = vpow2.f32 %v3554_v59 }
0x2a29   :  { %v3802_v15 = vpop.eup %3801 }
0x2a2a   :  { %2896 = vrot.lane.b32.xlu0 %v3802_v15, %s4055_s3  ;;  %v3804_v1 = vpop.eup %3803 }
0x2a2b   :  { %v2887_v18 = vadd.f32 1.0, %v3804_v1 }
0x2a2d   :  { %3805 = vrcp.f32 %v2887_v18 }
0x2a3a   :  { %v3806_v22 = vpop.eup %3805 }
0x2a3b   :  { %v2894_v19 = vmul.f32 %v3806_v22, %v2792_v32 }
0x2a9c   :  { %v2897_v24 = vpop.permute.xlu0 %2896 }
0x2a9d   :  { %v2899_v4 = vmul.f32 %v3806_v22, %v2897_v24 }
0x2a9f   :  { %2901 = vrot.lane.b32.xlu1 %v2899_v4, %s4055_s3 }
0x2b11   :  { %v2902_v26 = vpop.permute.xlu1 %2901 }
0x2b12   :  { %v2904_v43 = vadd.f32 %v2902_v26, %v2894_v19 }
0x2b14   :  { %3807 = vtanh.f32 %v2904_v43 }
0x2b15   :  { %3809 = vpow2.f32 %v3555_v44 }
0x2b21   :  { %v3808_v2 = vpop.eup %3807 }
0x2b22   :  { %2907 = vrot.lane.b32.xlu0 %v3808_v2, %s4055_s3  ;;  %v3810_v46 = vpop.eup %3809 }
0x2b23   :  { %v2888_v63 = vadd.f32 1.0, %v3810_v46 }
0x2b25   :  { %3811 = vrcp.f32 %v2888_v63 }
0x2b32   :  { %v3812_v49 = vpop.eup %3811 }
0x2b94   :  { %v2908_v62 = vpop.permute.xlu0 %2907 }
0x2b95   :  { %v2910_v14 = vmul.f32 %v3812_v49, %v2908_v62 }
0x2b97   :  { %3556 = vmatmul.mubr.msk.f32.vlgmr.msra.gmra.mxu1 %vm174_vm0, %v2910_v14 }
0x2b98   :  { %3153 = vmatpush1.msra.mxu1 %v4973_v34  ;;  %3200 = vmatprep.mubr.f32.mxu1 %v4054_v0 }
0x2b99   :  { %3154 = vmatprep.subr.mxu1 %v4976_v36 }
0x2b9a   :  { %3155 = vmatpush1.msra.mxu1 %v4981_v40 }
0x2b9b   :  { %3156 = vmatprep.subr.mxu1 %v4984_v11 }
0x2b9c   :  { %3157 = vmatpush1.msra.mxu1 %v4986_v21 }
0x2b9d   :  { %3158 = vmatprep.subr.mxu1 %v4989_v30 }
0x2b9e   :  { %3159 = vmatpush1.msra.mxu1 %v4993_v54 }
0x2b9f   :  { %3160 = vmatprep.subr.mxu1 %v4996_v60 }
0x2ba0   :  { %3161 = vmatpush1.msra.mxu1 %v4998_v16 }
0x2ba1   :  { %3162 = vmatprep.subr.mxu1 %v5001_v42 }
0x2ba2   :  { %3163 = vmatpush1.msra.mxu1 %v5005_v55 }
0x2ba3   :  { %3164 = vmatprep.subr.mxu1 %v5008_v28 }
0x2ba4   :  { %3165 = vmatpush1.msra.mxu1 %v5010_v33 }
0x2ba5   :  { %3166 = vmatprep.subr.mxu1 %v5013_v20 }
0x2ba6   :  { %3167 = vmatpush1.msra.mxu1 %v5017_v57 }
0x2ba7   :  { %3372 = vmatprep.subr.mxu1 %v4971_v29 }
0x2c57   :  { %v2986_v32 = vpop.f32.mrf.mxu1 }
0x2c58   :  { %v2991_v45 = vadd.f32 %v2986_v32, %v2915_v53 }
0x2c59   :  { %v2988_v56 = vpop.f32.mrf.mxu1 }
0x2c5a   :  { %v2992_v15 = vadd.f32 %v2988_v56, %v2916_v58  ;;  %v3557_v1 = vmul.f32 -1.442695, %v2991_v45 }
0x2c5c   :  { %3813 = vtanh.f32 %v2992_v15  ;;  %v3558_v58 = vmul.f32 -1.442695, %v2992_v15 }
0x2c5d   :  { %3815 = vpow2.f32 %v3557_v1 }
0x2c69   :  { %v3814_v59 = vpop.eup %3813 }
0x2c6a   :  { %3008 = vrot.lane.b32.xlu1 %v3814_v59, %s4055_s3  ;;  %v3816_v29 = vpop.eup %3815 }
0x2c6b   :  { %v2999_v18 = vadd.f32 1.0, %v3816_v29 }
0x2c6d   :  { %3817 = vrcp.f32 %v2999_v18 }
0x2c7a   :  { %v3818_v22 = vpop.eup %3817 }
0x2c7b   :  { %v3006_v53 = vmul.f32 %v3818_v22, %v2904_v43 }
0x2cdc   :  { %v3009_v24 = vpop.permute.xlu1 %3008 }
0x2cdd   :  { %v3011_v4 = vmul.f32 %v3818_v22, %v3009_v24 }
0x2cdf   :  { %3013 = vrot.lane.b32.xlu0 %v3011_v4, %s4055_s3 }
0x2d51   :  { %v3014_v19 = vpop.permute.xlu0 %3013 }
0x2d52   :  { %v3016_v26 = vadd.f32 %v3014_v19, %v3006_v53 }
0x2d54   :  { %3819 = vtanh.f32 %v3016_v26 }
0x2d55   :  { %3821 = vpow2.f32 %v3558_v58 }
0x2d61   :  { %v3820_v2 = vpop.eup %3819 }
0x2d62   :  { %3019 = vrot.lane.b32.xlu1 %v3820_v2, %s4055_s3  ;;  %v3822_v44 = vpop.eup %3821 }
0x2d63   :  { %v3000_v46 = vadd.f32 1.0, %v3822_v44 }
0x2d65   :  { %3823 = vrcp.f32 %v3000_v46 }
0x2d72   :  { %v3824_v63 = vpop.eup %3823 }
0x2dd4   :  { %v3020_v49 = vpop.permute.xlu1 %3019 }
0x2dd5   :  { %v3022_v62 = vmul.f32 %v3824_v63, %v3020_v49 }
0x2dd7   :  { %3559 = vmatmul.mubr.msk.f32.vlgmr.msra.gmra.mxu0 %vm174_vm0, %v3022_v62 }
0x2dd8   :  { %3261 = vmatpush1.msra.mxu0 %v4973_v34  ;;  %3308 = vmatprep.mubr.f32.mxu0 %v4054_v0 }
0x2dd9   :  { %3262 = vmatprep.subr.mxu0 %v4976_v36 }
0x2dda   :  { %3263 = vmatpush1.msra.mxu0 %v4981_v40 }
0x2ddb   :  { %3264 = vmatprep.subr.mxu0 %v4984_v11 }
0x2ddc   :  { %3265 = vmatpush1.msra.mxu0 %v4986_v21 }
0x2ddd   :  { %3266 = vmatprep.subr.mxu0 %v4989_v30 }
0x2dde   :  { %3267 = vmatpush1.msra.mxu0 %v4993_v54 }
0x2ddf   :  { %3268 = vmatprep.subr.mxu0 %v4996_v60 }
0x2de0   :  { %3269 = vmatpush1.msra.mxu0 %v4998_v16 }
0x2de1   :  { %3270 = vmatprep.subr.mxu0 %v5001_v42 }
0x2de2   :  { %3271 = vmatpush1.msra.mxu0 %v5005_v55 }
0x2de3   :  { %3272 = vmatprep.subr.mxu0 %v5008_v28 }
0x2de4   :  { %3273 = vmatpush1.msra.mxu0 %v5010_v33 }
0x2de5   :  { %3274 = vmatprep.subr.mxu0 %v5013_v20 }
0x2de6   :  { %3275 = vmatpush1.msra.mxu0 %v5017_v57 }
0x2e97   :  { %v3094_v43 = vpop.f32.mrf.mxu0 }
0x2e98   :  { %v3099_v14 = vadd.f32 %v3094_v43, %v3023_v47 }
0x2e99   :  { %v3096_v32 = vpop.f32.mrf.mxu0 }
0x2e9a   :  { %v3100_v45 = vadd.f32 %v3096_v32, %v3024_v50  ;;  %v3560_v15 = vmul.f32 -1.442695, %v3099_v14 }
0x2e9c   :  { %3825 = vtanh.f32 %v3100_v45  ;;  %v3561_v61 = vmul.f32 -1.442695, %v3100_v45 }
0x2e9d   :  { %3827 = vpow2.f32 %v3560_v15 }
0x2ea9   :  { %v3826_v56 = vpop.eup %3825 }
0x2eaa   :  { %3116 = vrot.lane.b32.xlu0 %v3826_v56, %s4055_s3  ;;  %v3828_v59 = vpop.eup %3827 }
0x2eab   :  { %v3107_v1 = vadd.f32 1.0, %v3828_v59 }
0x2ead   :  { %3829 = vrcp.f32 %v3107_v1  ;;  %v5378_v1 = vsel %vm4274_vm1, %v5145_v12, %v5143_v5 }
0x2eba   :  { %v3830_v29 = vpop.eup %3829 }
0x2ebb   :  { %v3114_v37 = vmul.f32 %v3830_v29, %v3016_v26 }
0x2f1c   :  { %v3117_v18 = vpop.permute.xlu0 %3116 }
0x2f1d   :  { %v3119_v25 = vmul.f32 %v3830_v29, %v3117_v18 }
0x2f1f   :  { %3121 = vrot.lane.b32.xlu1 %v3119_v25, %s4055_s3 }
0x2f91   :  { %v3122_v47 = vpop.permute.xlu1 %3121 }
0x2f92   :  { %v3124_v22 = vadd.f32 %v3122_v47, %v3114_v37 }
0x2f94   :  { %3831 = vtanh.f32 %v3124_v22 }
0x2f95   :  { %3833 = vpow2.f32 %v3561_v61 }
0x2fa1   :  { %v3832_v38 = vpop.eup %3831 }
0x2fa2   :  { %3127 = vrot.lane.b32.xlu0 %v3832_v38, %s4055_s3  ;;  %v3834_v50 = vpop.eup %3833 }
0x2fa3   :  { %v3108_v24 = vadd.f32 1.0, %v3834_v50 }
0x2fa5   :  { %3835 = vrcp.f32 %v3108_v24 }
0x2fb2   :  { %v3836_v4 = vpop.eup %3835 }
0x3014   :  { %v3128_v53 = vpop.permute.xlu0 %3127 }
0x3015   :  { %v3130_v19 = vmul.f32 %v3836_v4, %v3128_v53 }
0x3017   :  { %3562 = vmatmul.mubr.msk.f32.vlgmr.msra.gmra.mxu1 %vm174_vm0, %v3130_v19 }
0x3018   :  { %3373 = vmatpush1.msra.mxu1 %v4973_v34  ;;  %3420 = vmatprep.mubr.f32.mxu1 %v4054_v0 }
0x3019   :  { %3374 = vmatprep.subr.mxu1 %v4976_v36 }
0x301a   :  { %3375 = vmatpush1.msra.mxu1 %v4981_v40 }
0x301b   :  { %3376 = vmatprep.subr.mxu1 %v4984_v11 }
0x301c   :  { %3377 = vmatpush1.msra.mxu1 %v4986_v21 }
0x301d   :  { %3378 = vmatprep.subr.mxu1 %v4989_v30 }
0x301e   :  { %3379 = vmatpush1.msra.mxu1 %v4993_v54 }
0x301f   :  { %3380 = vmatprep.subr.mxu1 %v4996_v60 }
0x3020   :  { %3381 = vmatpush1.msra.mxu1 %v4998_v16 }
0x3021   :  { %3382 = vmatprep.subr.mxu1 %v5001_v42 }
0x3022   :  { %3383 = vmatpush1.msra.mxu1 %v5005_v55 }
0x3023   :  { %3384 = vmatprep.subr.mxu1 %v5008_v28 }
0x3024   :  { %3385 = vmatpush1.msra.mxu1 %v5010_v33 }
0x3025   :  { %3386 = vmatprep.subr.mxu1 %v5013_v20 }
0x3026   :  { %3387 = vmatpush1.msra.mxu1 %v5017_v57 }
0x30d7   :  { %v3202_v0 = vpop.f32.mrf.mxu1 }
0x30d8   :  { %v3207_v34 = vadd.f32 %v3202_v0, %v3131_v48 }
0x30d9   :  { %v3204_v36 = vpop.f32.mrf.mxu1 }
0x30da   :  { %v3208_v40 = vadd.f32 %v3204_v36, %v3132_v52  ;;  %v3563_v21 = vmul.f32 -1.442695, %v3207_v34 }
0x30dc   :  { %3837 = vtanh.f32 %v3208_v40  ;;  %v3564_v57 = vmul.f32 -1.442695, %v3208_v40 }
0x30dd   :  { %3839 = vpow2.f32 %v3563_v21 }
0x30e9   :  { %v3838_v11 = vpop.eup %3837 }
0x30ea   :  { %3224 = vrot.lane.b32.xlu1 %v3838_v11, %s4055_s3  ;;  %v3840_v30 = vpop.eup %3839 }
0x30eb   :  { %v3215_v54 = vadd.f32 1.0, %v3840_v30 }
0x30ed   :  { %3841 = vrcp.f32 %v3215_v54 }
0x30fa   :  { %v3842_v60 = vpop.eup %3841 }
0x30fb   :  { %v3222_v55 = vmul.f32 %v3842_v60, %v3124_v22 }
0x315c   :  { %v3225_v16 = vpop.permute.xlu1 %3224 }
0x315d   :  { %v3227_v42 = vmul.f32 %v3842_v60, %v3225_v16 }
0x315f   :  { %3229 = vrot.lane.b32.xlu0 %v3227_v42, %s4055_s3 }
0x31d1   :  { %v3230_v28 = vpop.permute.xlu0 %3229 }
0x31d2   :  { %v3232_v33 = vadd.f32 %v3230_v28, %v3222_v55 }
0x31d4   :  { %3843 = vtanh.f32 %v3232_v33 }
0x31d5   :  { %3845 = vpow2.f32 %v3564_v57 }
0x31e1   :  { %v3844_v20 = vpop.eup %3843 }
0x31e2   :  { %3235 = vrot.lane.b32.xlu1 %v3844_v20, %s4055_s3  ;;  %v3846_v17 = vpop.eup %3845 }
0x31e3   :  { %v3216_v8 = vadd.f32 1.0, %v3846_v17 }
0x31e5   :  { %3847 = vrcp.f32 %v3216_v8 }
0x31f2   :  { %v3848_v35 = vpop.eup %3847 }
0x3254   :  { %v3236_v41 = vpop.permute.xlu1 %3235 }
0x3255   :  { %v3238_v48 = vmul.f32 %v3848_v35, %v3236_v41 }
0x3257   :  { %3565 = vmatmul.mubr.msk.f32.vlgmr.msra.gmra.mxu0 %vm174_vm0, %v3238_v48 }
0x3317   :  { %v3310_v52 = vpop.f32.mrf.mxu0 }
0x3318   :  { %v3315_v26 = vadd.f32 %v3310_v52, %v3239_v13 }
0x3319   :  { %v3312_v2 = vpop.f32.mrf.mxu0 }
0x331a   :  { %v3316_v58 = vadd.f32 %v3312_v2, %v3240_v39  ;;  %v3566_v46 = vmul.f32 -1.442695, %v3315_v26 }
0x331c   :  { %3849 = vtanh.f32 %v3316_v58  ;;  %v3567_v7 = vmul.f32 -1.442695, %v3316_v58 }
0x331d   :  { %3851 = vpow2.f32 %v3566_v46 }
0x3329   :  { %v3850_v44 = vpop.eup %3849 }
0x332a   :  { %3332 = vrot.lane.b32.xlu0 %v3850_v44, %s4055_s3  ;;  %v3852_v63 = vpop.eup %3851 }
0x332b   :  { %v3323_v49 = vadd.f32 1.0, %v3852_v63 }
0x332d   :  { %3853 = vrcp.f32 %v3323_v49 }
0x333a   :  { %v3854_v62 = vpop.eup %3853 }
0x333b   :  { %v3330_v23 = vmul.f32 %v3854_v62, %v3232_v33 }
0x339c   :  { %v3333_v43 = vpop.permute.xlu0 %3332 }
0x339d   :  { %v3335_v27 = vmul.f32 %v3854_v62, %v3333_v43 }
0x339f   :  { %3337 = vrot.lane.b32.xlu1 %v3335_v27, %s4055_s3 }
0x3411   :  { %v3338_v13 = vpop.permute.xlu1 %3337 }
0x3412   :  { %v3340_v14 = vadd.f32 %v3338_v13, %v3330_v23 }
0x3414   :  { %3855 = vtanh.f32 %v3340_v14 }
0x3415   :  { %3857 = vpow2.f32 %v3567_v7 }
0x3421   :  { %v3856_v51 = vpop.eup %3855 }
0x3422   :  { %3343 = vrot.lane.b32.xlu0 %v3856_v51, %s4055_s3  ;;  %v3858_v39 = vpop.eup %3857 }
0x3423   :  { %v3324_v32 = vadd.f32 1.0, %v3858_v39 }
0x3425   :  { %3859 = vrcp.f32 %v3324_v32 }
0x3432   :  { %v3860_v45 = vpop.eup %3859 }
0x3494   :  { %v3344_v56 = vpop.permute.xlu0 %3343 }
0x3495   :  { %v3346_v15 = vmul.f32 %v3860_v45, %v3344_v56 }
0x3497   :  { %3568 = vmatmul.mubr.msk.f32.vlgmr.msra.gmra.mxu1 %vm174_vm0, %v3346_v15 }
0x3557   :  { %v3422_v59 = vpop.f32.mrf.mxu1 }
0x3558   :  { %v3427_v29 = vadd.f32 %v3422_v59, %v5378_v1 }
0x3559   :  { %v3424_v18 = vpop.f32.mrf.mxu1 }
0x355a   :  { %v3428_v25 = vadd.f32 %v3424_v18, %v3352_v31  ;;  %v3569_v47 = vmul.f32 -1.442695, %v3427_v29 }
0x355c   :  { %3861 = vtanh.f32 %v3428_v25  ;;  %v3570_v9 = vmul.f32 -1.442695, %v3428_v25 }
0x355d   :  { %3863 = vpow2.f32 %v3569_v47 }
0x3569   :  { %v3862_v37 = vpop.eup %3861 }
0x356a   :  { %3444 = vrot.lane.b32.xlu1 %v3862_v37, %s4055_s3  ;;  %v3864_v22 = vpop.eup %3863 }
0x356b   :  { %v3435_v38 = vadd.f32 1.0, %v3864_v22 }
0x356d   :  { %3865 = vrcp.f32 %v3435_v38 }
0x357a   :  { %v3866_v3 = vpop.eup %3865 }
0x357b   :  { %v3442_v12 = vmul.f32 %v3866_v3, %v3340_v14 }
0x35dc   :  { %v3445_v61 = vpop.permute.xlu1 %3444 }
0x35dd   :  { %v3447_v5 = vmul.f32 %v3866_v3, %v3445_v61 }
0x35df   :  { %3449 = vrot.lane.b32.xlu0 %v3447_v5, %s4055_s3 }
0x3651   :  { %v3450_v6 = vpop.permute.xlu0 %3449 }
0x3652   :  { %v3452_v50 = vadd.f32 %v3450_v6, %v3442_v12 }
0x3654   :  { %3867 = vtanh.f32 %v3452_v50 }
0x3655   :  { %3869 = vpow2.f32 %v3570_v9 }
0x3661   :  { %v3868_v10 = vpop.eup %3867 }
0x3662   :  { %3455 = vrot.lane.b32.xlu1 %v3868_v10, %s4055_s3  ;;  %v3870_v31 = vpop.eup %3869 }
0x3663   :  { %v3436_v24 = vadd.f32 1.0, %v3870_v31 }
0x3665   :  { %3871 = vrcp.f32 %v3436_v24 }
0x3672   :  { %v3872_v4 = vpop.eup %3871 }
0x36d4   :  { %v3456_v53 = vpop.permute.xlu1 %3455 }
0x36d5   :  { %v3458_v19 = vmul.f32 %v3872_v4, %v3456_v53 }
0x36d7   :  { %3459 = vst.msk [vmem:[#allocation16] sm:$0xff] %vm456_vm3, %v3458_v19 }
0x36d8   :  { %4024 = shalt.err (!%p4021_p11)
}
0x36d9   :  { %3469 = dma.vmem_to_hbm [thread:$0]  %s3467_s29, 128, %s5369_s10, [#allocation6]  }
0x36da   :  { %4041 = dma.done.wait [#allocation6], 128  }
0x36db   :  { %4042 = vsyncadd [#allocation6], 4294967168 }
0x36dc   :  { %3473 = vsyncpa [#allocation5], 1 }
0x36dd   :  { %3474 = vsyncpa [#allocation8], 1 }
0x36de   :  { %3475 = vsyncpa [#allocation11], 1 }
0x36df   :  { %3476 = vsyncpa [#allocation14], 1 }
0x36e0   :  { %3477 = vsyncpa [#allocation6], 1 }

</bundles_post_ra>
